<compile_context>
chip_gen: v6e
topology: v6e:2x2x1
jax: 0.10.0
libtpu: 0.0.40
codegen_flags: <defaults>
</compile_context>

<pallas_src>
import functools
import jax
import jax.numpy as jnp
from jax import lax
from jax.experimental import pallas as pl
from jax.experimental.pallas import tpu as pltpu


def _vmem():
    return pl.BlockSpec(memory_space=pltpu.MemorySpace.VMEM)


# ---------------------------------------------------------------------------
# One fused forward kernel
# ---------------------------------------------------------------------------

def sagpool_forward(params, sc_x, a_sc, fc_x, a_fc, batch, *,
                    num_graphs, ratio, temperature, negative_w):
    n = sc_x.shape[0]
    hidden = params['sc']['conv1']['w_rel'].shape[1]
    num_layers = 1 + len(params['sc']['convs'])
    d_cat = num_layers * hidden                         # JumpingKnowledge width per branch
    num_classes = params['lin3']['w'].shape[1]

    f32 = jnp.float32
    inv_t = 1.0 / float(temperature)
    neg_w = float(negative_w)
    ratio_f = float(ratio)

    # Host-side constants (tiny): one-hot pooling matrix and same-graph mask.
    onehot = (batch[None, :] == jnp.arange(num_graphs, dtype=batch.dtype)[:, None]).astype(f32)
    same = (batch[:, None] == batch[None, :]).astype(f32)

    # Flatten the parameter pytree so every weight lives in VMEM for the whole kernel.
    params2d = jax.tree_util.tree_map(lambda a: a.reshape(1, -1) if a.ndim == 1 else a, params)
    leaves, treedef = jax.tree_util.tree_flatten(params2d)

    def kernel(sc_x_ref, a_sc_ref, fc_x_ref, a_fc_ref, onehot_ref, same_ref, *rest):
        *leaf_refs, out_ref = rest
        p = jax.tree_util.tree_unflatten(treedef, list(leaf_refs))

        onehot_v = onehot_ref[...]                      # [G, N]
        same_v = same_ref[...]                          # [N, N]

        ones_nn = jnp.ones((n, n), f32)
        row_i = lax.broadcasted_iota(jnp.int32, (n, n), 0)
        col_j = lax.broadcasted_iota(jnp.int32, (n, n), 1)
        eye_nn = jnp.where(row_i == col_j, 1.0, 0.0)

        def row_bcast(v_col):
            # [N,1] -> [N,N] with out[i, j] = v[j]; MXU matmul instead of a transpose.
            return jnp.dot(ones_nn, eye_nn * v_col, preferred_element_type=f32)

        # Selection matrices: place a pooled [G,H] block at JK columns [i*H, (i+1)*H)
        # without any in-kernel concatenate.
        jk_row = lax.broadcasted_iota(jnp.int32, (hidden, d_cat), 0)
        jk_col = lax.broadcasted_iota(jnp.int32, (hidden, d_cat), 1)

        def jk_place(i):
            return jnp.where(jk_col == jk_row + i * hidden, 1.0, 0.0)

        def graph_conv(a, x, cp, mask, *, aggr_mean, apply_relu):
            # torch_geometric GraphConv: lin_rel(aggr_{j->i} x_j) + lin_root(x_i)
            agg = jnp.dot(a, x, preferred_element_type=f32)
            if aggr_mean:
                deg = jnp.sum(a, axis=1, keepdims=True)
                agg = agg * pl.reciprocal(jnp.maximum(deg, 1.0), approx=True)
            out = (jnp.dot(agg, cp['w_rel'][...], preferred_element_type=f32)
                   + jnp.dot(x, cp['w_root'][...], preferred_element_type=f32)
                   + cp['b'][...])
            if apply_relu:
                out = jnp.maximum(out, 0.0)
            return out * mask                           # dropped (pooled-out) nodes stay zero

        def branch(x_ref, a_ref, bp):
            x = x_ref[...]
            a = a_ref[...]
            mask = jnp.ones((n, 1), f32)

            x = graph_conv(a, x, bp['conv1'], mask, aggr_mean=True, apply_relu=True)
            pooled = jnp.dot(onehot_v, x, preferred_element_type=f32)        # global_add_pool
            cat = jnp.dot(pooled, jk_place(0), preferred_element_type=f32)   # [G, D]

            num_convs = len(bp['convs'])
            for i, cp in enumerate(bp['convs']):
                x = graph_conv(a, x, cp, mask, aggr_mean=True, apply_relu=True)
                pooled = jnp.dot(onehot_v, x, preferred_element_type=f32)
                cat = cat + jnp.dot(pooled, jk_place(i + 1), preferred_element_type=f32)

                if i % 2 == 0 and i < num_convs - 1:
                    # SAGPooling: score = tanh(GraphConv(H,1,aggr='add')); keep top ceil(ratio*n)
                    pp = bp['pools'][i // 2]
                    score = jnp.tanh(graph_conv(a, x, pp, mask,
                                                aggr_mean=False, apply_relu=False))  # [N,1]
                    valid = mask
                    s = jnp.where(valid > 0.5, score, jnp.full_like(score, -1e30))
                    s_row = row_bcast(s)                     # s[j] broadcast across rows
                    valid_row = row_bcast(valid)             # valid[j]
                    sel = same_v * valid_row                 # j alive & in same graph as i
                    n_per_graph = jnp.sum(sel, axis=1, keepdims=True)        # [N,1]
                    higher = jnp.where((s_row > s) | ((s_row == s) & (col_j < row_i)), 1.0, 0.0)
                    rank = jnp.sum(sel * higher, axis=1, keepdims=True)
                    # rank < ceil(ratio*n)  <=>  rank < ratio*n  (rank is integer-valued)
                    keep = jnp.where((valid > 0.5) & (rank < ratio_f * n_per_graph), 1.0, 0.0)
                    x = x * score * keep                     # x[perm] * tanh(score)[perm]
                    a = a * keep * row_bcast(keep)           # filter_adj, kept in VMEM only
                    mask = keep
            return cat                                       # JumpingKnowledge(mode='cat')

        # TODO(synk): the reference reuses the sc-pooled `batch` for the fc branch
        # (a shape-mismatch bug in the original); we use the original batch for both.
        sc_cat = branch(sc_x_ref, a_sc_ref, p['sc'])
        fc_cat = branch(fc_x_ref, a_fc_ref, p['fc'])

        # ----- classifier head (dropout is identity in eval mode) -----
        w1 = p['lin1']['w']
        h1 = (jnp.dot(sc_cat, w1[:d_cat, :], preferred_element_type=f32)
              + jnp.dot(fc_cat, w1[d_cat:, :], preferred_element_type=f32)
              + p['lin1']['b'][...])
        h1 = jnp.maximum(h1, 0.0)
        h2 = jnp.maximum(jnp.dot(h1, p['lin2']['w'][...], preferred_element_type=f32)
                         + p['lin2']['b'][...], 0.0)
        logits = (jnp.dot(h2, p['lin3']['w'][...], preferred_element_type=f32)
                  + p['lin3']['b'][...])                                      # [G, C]

        # ----- CLIP-style contrastive loss on the JK embeddings -----
        def l2norm(v):                                   # F.normalize(dim=1)
            ssq = jnp.sum(v * v, axis=1, keepdims=True)
            return v * lax.rsqrt(jnp.maximum(ssq, 1e-24))

        sc_n = l2norm(sc_cat)
        fc_n = l2norm(fc_cat)

        def dot_t(a_, b_):                               # a @ b.T without a transpose
            return lax.dot_general(a_, b_, (((1,), (1,)), ((), ())),
                                   preferred_element_type=f32)

        per_sc = dot_t(sc_n, fc_n) * inv_t
        per_fc = dot_t(fc_n, sc_n) * inv_t
        clstr_sc = dot_t(sc_n, sc_n) * inv_t
        clstr_fc = dot_t(fc_n, fc_n) * inv_t

        g = onehot_v.shape[0]
        rg = lax.broadcasted_iota(jnp.int32, (g, g), 0)
        cg = lax.broadcasted_iota(jnp.int32, (g, g), 1)
        eye_g = jnp.where(rg == cg, 1.0, 0.0)
        off_diag = 1.0 - eye_g

        def nce_loss(per, clstr):
            # loss = -log((softmax(cat([per, neg],1),1) * cat([I, 0],1)).sum(1))
            # (zeroed diagonal of `neg` still contributes exp(.) to the denominator,
            #  exactly as in the PyTorch reference)
            neg = neg_w * (clstr * off_diag)
            m = jnp.maximum(jnp.max(per, axis=1, keepdims=True),
                            jnp.max(neg, axis=1, keepdims=True))
            denom = (jnp.sum(jnp.exp(per - m), axis=1, keepdims=True)
                     + jnp.sum(jnp.exp(neg - m), axis=1, keepdims=True))
            num = jnp.sum(jnp.exp(per - m) * eye_g, axis=1, keepdims=True)
            return jnp.log(denom) - jnp.log(num)         # [g, 1]

        loss = (jnp.mean(nce_loss(per_sc, clstr_sc), axis=0, keepdims=True)
                + jnp.mean(nce_loss(per_fc, clstr_fc), axis=0, keepdims=True)) * 0.5  # [1,1]

        # ----- log_softmax + loss; the only HBM store in the whole forward -----
        mx = jnp.max(logits, axis=-1, keepdims=True)
        lse = jnp.log(jnp.sum(jnp.exp(logits - mx), axis=-1, keepdims=True)) + mx
        out_ref[...] = (logits - lse) + loss

    return pl.pallas_call(
        kernel,
        out_shape=jax.ShapeDtypeStruct((num_graphs, num_classes), jnp.float32),
        in_specs=[_vmem()] * (6 + len(leaves)),
        out_specs=_vmem(),
    )(sc_x, a_sc, fc_x, a_fc, onehot, same, *leaves)


# ---------------------------------------------------------------------------
# Deterministic parameter init (shapes per SAGPool.__init__)
# ---------------------------------------------------------------------------

def init_params(key, *, sc_features, fc_features, hidden, num_layers, num_classes):
    state = {'key': key}

    def nxt():
        state['key'], sub = jax.random.split(state['key'])
        return sub

    def gconv(fin, fout):
        return dict(w_rel=0.1 * jax.random.normal(nxt(), (fin, fout), jnp.float32),
                    w_root=0.1 * jax.random.normal(nxt(), (fin, fout), jnp.float32),
                    b=0.1 * jax.random.normal(nxt(), (fout,), jnp.float32))

    def lin(fin, fout):
        return dict(w=0.1 * jax.random.normal(nxt(), (fin, fout), jnp.float32),
                    b=0.1 * jax.random.normal(nxt(), (fout,), jnp.float32))

    def branch(fin):
        return dict(conv1=gconv(fin, hidden),
                    convs=[gconv(hidden, hidden) for _ in range(num_layers - 1)],
                    pools=[gconv(hidden, 1) for _ in range(num_layers // 2)])

    return dict(sc=branch(sc_features), fc=branch(fc_features),
                lin1=lin(num_layers * hidden * 2, hidden),
                lin2=lin(hidden, hidden // 2),
                lin3=lin(hidden // 2, num_classes))


# ---------------------------------------------------------------------------
# Main
# ---------------------------------------------------------------------------

if __name__ == "__main__":
    num_graphs = 2
    nodes_per_graph = 8
    N = num_graphs * nodes_per_graph
    sc_features = 16
    fc_features = 16
    hidden = 32
    num_layers = 4
    num_classes = 3
    ratio = 0.8
    temperature = 0.5
    negative_w = 0.8

    key = jax.random.PRNGKey(0)
    k_params, k_scx, k_fcx, k_asc, k_afc = jax.random.split(key, 5)

    params = init_params(k_params, sc_features=sc_features, fc_features=fc_features,
                         hidden=hidden, num_layers=num_layers, num_classes=num_classes)

    sc_x = jax.random.normal(k_scx, (N, sc_features), jnp.float32)
    fc_x = jax.random.normal(k_fcx, (N, fc_features), jnp.float32)
    batch = jnp.repeat(jnp.arange(num_graphs, dtype=jnp.int32), nodes_per_graph)

    def rand_adj(k):
        dense = (jax.random.uniform(k, (N, N)) < 0.3).astype(jnp.float32)
        same = (batch[:, None] == batch[None, :]).astype(jnp.float32)   # block-diagonal graphs
        no_self = 1.0 - jnp.eye(N, dtype=jnp.float32)
        return dense * same * no_self

    a_sc = rand_adj(k_asc)
    a_fc = rand_adj(k_afc)

    out = sagpool_forward(params, sc_x, a_sc, fc_x, a_fc, batch,
                          num_graphs=num_graphs, ratio=ratio,
                          temperature=temperature, negative_w=negative_w)
    out = jax.block_until_ready(out)
    assert out.shape == (num_graphs, num_classes)
    assert bool(jnp.all(jnp.isfinite(out)))
    print("KERNEL_OK")
</pallas_src>

<mosaic_0001>
module attributes {stable_mosaic.version = 11 : i64} {
  func.func @kernel(%arg0: memref<16x16xf32, #tpu.memory_space<vmem>>, %arg1: memref<16x16xf32, #tpu.memory_space<vmem>>, %arg2: memref<16x16xf32, #tpu.memory_space<vmem>>, %arg3: memref<16x16xf32, #tpu.memory_space<vmem>>, %arg4: memref<2x16xf32, #tpu.memory_space<vmem>>, %arg5: memref<16x16xf32, #tpu.memory_space<vmem>>, %arg6: memref<1x32xf32, #tpu.memory_space<vmem>>, %arg7: memref<16x32xf32, #tpu.memory_space<vmem>>, %arg8: memref<16x32xf32, #tpu.memory_space<vmem>>, %arg9: memref<1x32xf32, #tpu.memory_space<vmem>>, %arg10: memref<32x32xf32, #tpu.memory_space<vmem>>, %arg11: memref<32x32xf32, #tpu.memory_space<vmem>>, %arg12: memref<1x32xf32, #tpu.memory_space<vmem>>, %arg13: memref<32x32xf32, #tpu.memory_space<vmem>>, %arg14: memref<32x32xf32, #tpu.memory_space<vmem>>, %arg15: memref<1x32xf32, #tpu.memory_space<vmem>>, %arg16: memref<32x32xf32, #tpu.memory_space<vmem>>, %arg17: memref<32x32xf32, #tpu.memory_space<vmem>>, %arg18: memref<1x1xf32, #tpu.memory_space<vmem>>, %arg19: memref<32x1xf32, #tpu.memory_space<vmem>>, %arg20: memref<32x1xf32, #tpu.memory_space<vmem>>, %arg21: memref<1x1xf32, #tpu.memory_space<vmem>>, %arg22: memref<32x1xf32, #tpu.memory_space<vmem>>, %arg23: memref<32x1xf32, #tpu.memory_space<vmem>>, %arg24: memref<1x32xf32, #tpu.memory_space<vmem>>, %arg25: memref<256x32xf32, #tpu.memory_space<vmem>>, %arg26: memref<1x16xf32, #tpu.memory_space<vmem>>, %arg27: memref<32x16xf32, #tpu.memory_space<vmem>>, %arg28: memref<1x3xf32, #tpu.memory_space<vmem>>, %arg29: memref<16x3xf32, #tpu.memory_space<vmem>>, %arg30: memref<1x32xf32, #tpu.memory_space<vmem>>, %arg31: memref<16x32xf32, #tpu.memory_space<vmem>>, %arg32: memref<16x32xf32, #tpu.memory_space<vmem>>, %arg33: memref<1x32xf32, #tpu.memory_space<vmem>>, %arg34: memref<32x32xf32, #tpu.memory_space<vmem>>, %arg35: memref<32x32xf32, #tpu.memory_space<vmem>>, %arg36: memref<1x32xf32, #tpu.memory_space<vmem>>, %arg37: memref<32x32xf32, #tpu.memory_space<vmem>>, %arg38: memref<32x32xf32, #tpu.memory_space<vmem>>, %arg39: memref<1x32xf32, #tpu.memory_space<vmem>>, %arg40: memref<32x32xf32, #tpu.memory_space<vmem>>, %arg41: memref<32x32xf32, #tpu.memory_space<vmem>>, %arg42: memref<1x1xf32, #tpu.memory_space<vmem>>, %arg43: memref<32x1xf32, #tpu.memory_space<vmem>>, %arg44: memref<32x1xf32, #tpu.memory_space<vmem>>, %arg45: memref<1x1xf32, #tpu.memory_space<vmem>>, %arg46: memref<32x1xf32, #tpu.memory_space<vmem>>, %arg47: memref<32x1xf32, #tpu.memory_space<vmem>>, %arg48: memref<2x3xf32, #tpu.memory_space<vmem>>) attributes {dimension_semantics = [], scalar_prefetch = 0 : i64, scratch_operands = 0 : i64, tpu.core_type = #tpu.core_type<tc>} {
    %c0 = arith.constant 0 : index
    %c0_0 = arith.constant 0 : index
    %0 = vector.load %arg4[%c0, %c0_0] : memref<2x16xf32, #tpu.memory_space<vmem>>, vector<2x16xf32>
    %c0_1 = arith.constant 0 : index
    %c0_2 = arith.constant 0 : index
    %1 = vector.load %arg5[%c0_1, %c0_2] : memref<16x16xf32, #tpu.memory_space<vmem>>, vector<16x16xf32>
    %cst = arith.constant 1.000000e+00 : f32
    %2 = vector.broadcast %cst : f32 to vector<16x16xf32>
    %3 = tpu.iota {dimensions = array<i32: 0>} : vector<16x16xi32>
    %4 = tpu.iota {dimensions = array<i32: 1>} : vector<16x16xi32>
    %5 = arith.cmpi eq, %3, %4 : vector<16x16xi32>
    %cst_3 = arith.constant 1.000000e+00 : f32
    %cst_4 = arith.constant 0.000000e+00 : f32
    %6 = vector.broadcast %cst_3 : f32 to vector<16x16xf32>
    %7 = vector.broadcast %cst_4 : f32 to vector<16x16xf32>
    %8 = arith.select %5, %6, %7 : vector<16x16xi1>, vector<16x16xf32>
    %9 = tpu.iota {dimensions = array<i32: 0>} : vector<32x128xi32>
    %10 = tpu.iota {dimensions = array<i32: 1>} : vector<32x128xi32>
    %c0_5 = arith.constant 0 : index
    %c0_6 = arith.constant 0 : index
    %11 = vector.load %arg0[%c0_5, %c0_6] : memref<16x16xf32, #tpu.memory_space<vmem>>, vector<16x16xf32>
    %c0_7 = arith.constant 0 : index
    %c0_8 = arith.constant 0 : index
    %12 = vector.load %arg1[%c0_7, %c0_8] : memref<16x16xf32, #tpu.memory_space<vmem>>, vector<16x16xf32>
    %cst_9 = arith.constant 1.000000e+00 : f32
    %13 = vector.broadcast %cst_9 : f32 to vector<16x1xf32>
    %cst_10 = arith.constant dense<0.000000e+00> : vector<16x16xf32>
    %14 = tpu.matmul %12, %11, %cst_10 {dimension_numbers = #tpu.dot_dimension_numbers<[1], [0], [0], [1], [0, 0, 1, 1], [], []>} : vector<16x16xf32>, vector<16x16xf32>, vector<16x16xf32> -> vector<16x16xf32>
    %cst_11 = arith.constant dense<0.000000e+00> : vector<16xf32>
    %15 = vector.multi_reduction <add>, %12, %cst_11 [1] : vector<16x16xf32> to vector<16xf32>
    %16 = vector.shape_cast %15 : vector<16xf32> to vector<16x1xf32>
    %cst_12 = arith.constant 1.000000e+00 : f32
    %17 = vector.broadcast %cst_12 : f32 to vector<16x1xf32>
    %18 = arith.maximumf %16, %17 : vector<16x1xf32>
    %19 = tpu.reciprocal %18 {approx = true} : vector<16x1xf32> -> vector<16x1xf32>
    %20 = vector.broadcast %19 : vector<16x1xf32> to vector<16x16xf32>
    %21 = arith.mulf %14, %20 : vector<16x16xf32>
    %c0_13 = arith.constant 0 : index
    %c0_14 = arith.constant 0 : index
    %22 = vector.load %arg31[%c0_13, %c0_14] : memref<16x32xf32, #tpu.memory_space<vmem>>, vector<16x32xf32>
    %cst_15 = arith.constant dense<0.000000e+00> : vector<16x32xf32>
    %23 = tpu.matmul %21, %22, %cst_15 {dimension_numbers = #tpu.dot_dimension_numbers<[1], [0], [0], [1], [0, 0, 1, 1], [], []>} : vector<16x16xf32>, vector<16x32xf32>, vector<16x32xf32> -> vector<16x32xf32>
    %c0_16 = arith.constant 0 : index
    %c0_17 = arith.constant 0 : index
    %24 = vector.load %arg32[%c0_16, %c0_17] : memref<16x32xf32, #tpu.memory_space<vmem>>, vector<16x32xf32>
    %cst_18 = arith.constant dense<0.000000e+00> : vector<16x32xf32>
    %25 = tpu.matmul %11, %24, %cst_18 {dimension_numbers = #tpu.dot_dimension_numbers<[1], [0], [0], [1], [0, 0, 1, 1], [], []>} : vector<16x16xf32>, vector<16x32xf32>, vector<16x32xf32> -> vector<16x32xf32>
    %26 = arith.addf %23, %25 : vector<16x32xf32>
    %c0_19 = arith.constant 0 : index
    %c0_20 = arith.constant 0 : index
    %27 = vector.load %arg30[%c0_19, %c0_20] : memref<1x32xf32, #tpu.memory_space<vmem>>, vector<1x32xf32>
    %28 = vector.broadcast %27 : vector<1x32xf32> to vector<16x32xf32>
    %29 = arith.addf %26, %28 : vector<16x32xf32>
    %cst_21 = arith.constant 0.000000e+00 : f32
    %30 = vector.broadcast %cst_21 : f32 to vector<16x32xf32>
    %31 = arith.maximumf %29, %30 : vector<16x32xf32>
    %32 = vector.broadcast %13 : vector<16x1xf32> to vector<16x32xf32>
    %33 = arith.mulf %31, %32 : vector<16x32xf32>
    %cst_22 = arith.constant dense<0.000000e+00> : vector<2x32xf32>
    %34 = tpu.matmul %0, %33, %cst_22 {dimension_numbers = #tpu.dot_dimension_numbers<[1], [0], [0], [1], [0, 0, 1, 1], [], []>} : vector<2x16xf32>, vector<16x32xf32>, vector<2x32xf32> -> vector<2x32xf32>
    %c0_i32 = arith.constant 0 : i32
    %35 = vector.broadcast %c0_i32 : i32 to vector<32x128xi32>
    %36 = arith.addi %9, %35 : vector<32x128xi32>
    %37 = arith.cmpi eq, %10, %36 : vector<32x128xi32>
    %cst_23 = arith.constant 1.000000e+00 : f32
    %cst_24 = arith.constant 0.000000e+00 : f32
    %38 = vector.broadcast %cst_23 : f32 to vector<32x128xf32>
    %39 = vector.broadcast %cst_24 : f32 to vector<32x128xf32>
    %40 = arith.select %37, %38, %39 : vector<32x128xi1>, vector<32x128xf32>
    %cst_25 = arith.constant dense<0.000000e+00> : vector<2x128xf32>
    %41 = tpu.matmul %34, %40, %cst_25 {dimension_numbers = #tpu.dot_dimension_numbers<[1], [0], [0], [1], [0, 0, 1, 1], [], []>} : vector<2x32xf32>, vector<32x128xf32>, vector<2x128xf32> -> vector<2x128xf32>
    %cst_26 = arith.constant dense<0.000000e+00> : vector<16x32xf32>
    %42 = tpu.matmul %12, %33, %cst_26 {dimension_numbers = #tpu.dot_dimension_numbers<[1], [0], [0], [1], [0, 0, 1, 1], [], []>} : vector<16x16xf32>, vector<16x32xf32>, vector<16x32xf32> -> vector<16x32xf32>
    %cst_27 = arith.constant dense<0.000000e+00> : vector<16xf32>
    %43 = vector.multi_reduction <add>, %12, %cst_27 [1] : vector<16x16xf32> to vector<16xf32>
    %44 = vector.shape_cast %43 : vector<16xf32> to vector<16x1xf32>
    %cst_28 = arith.constant 1.000000e+00 : f32
    %45 = vector.broadcast %cst_28 : f32 to vector<16x1xf32>
    %46 = arith.maximumf %44, %45 : vector<16x1xf32>
    %47 = tpu.reciprocal %46 {approx = true} : vector<16x1xf32> -> vector<16x1xf32>
    %48 = vector.broadcast %47 : vector<16x1xf32> to vector<16x32xf32>
    %49 = arith.mulf %42, %48 : vector<16x32xf32>
    %c0_29 = arith.constant 0 : index
    %c0_30 = arith.constant 0 : index
    %50 = vector.load %arg34[%c0_29, %c0_30] : memref<32x32xf32, #tpu.memory_space<vmem>>, vector<32x32xf32>
    %cst_31 = arith.constant dense<0.000000e+00> : vector<16x32xf32>
    %51 = tpu.matmul %49, %50, %cst_31 {dimension_numbers = #tpu.dot_dimension_numbers<[1], [0], [0], [1], [0, 0, 1, 1], [], []>} : vector<16x32xf32>, vector<32x32xf32>, vector<16x32xf32> -> vector<16x32xf32>
    %c0_32 = arith.constant 0 : index
    %c0_33 = arith.constant 0 : index
    %52 = vector.load %arg35[%c0_32, %c0_33] : memref<32x32xf32, #tpu.memory_space<vmem>>, vector<32x32xf32>
    %cst_34 = arith.constant dense<0.000000e+00> : vector<16x32xf32>
    %53 = tpu.matmul %33, %52, %cst_34 {dimension_numbers = #tpu.dot_dimension_numbers<[1], [0], [0], [1], [0, 0, 1, 1], [], []>} : vector<16x32xf32>, vector<32x32xf32>, vector<16x32xf32> -> vector<16x32xf32>
    %54 = arith.addf %51, %53 : vector<16x32xf32>
    %c0_35 = arith.constant 0 : index
    %c0_36 = arith.constant 0 : index
    %55 = vector.load %arg33[%c0_35, %c0_36] : memref<1x32xf32, #tpu.memory_space<vmem>>, vector<1x32xf32>
    %56 = vector.broadcast %55 : vector<1x32xf32> to vector<16x32xf32>
    %57 = arith.addf %54, %56 : vector<16x32xf32>
    %cst_37 = arith.constant 0.000000e+00 : f32
    %58 = vector.broadcast %cst_37 : f32 to vector<16x32xf32>
    %59 = arith.maximumf %57, %58 : vector<16x32xf32>
    %60 = vector.broadcast %13 : vector<16x1xf32> to vector<16x32xf32>
    %61 = arith.mulf %59, %60 : vector<16x32xf32>
    %cst_38 = arith.constant dense<0.000000e+00> : vector<2x32xf32>
    %62 = tpu.matmul %0, %61, %cst_38 {dimension_numbers = #tpu.dot_dimension_numbers<[1], [0], [0], [1], [0, 0, 1, 1], [], []>} : vector<2x16xf32>, vector<16x32xf32>, vector<2x32xf32> -> vector<2x32xf32>
    %c32_i32 = arith.constant 32 : i32
    %63 = vector.broadcast %c32_i32 : i32 to vector<32x128xi32>
    %64 = arith.addi %9, %63 : vector<32x128xi32>
    %65 = arith.cmpi eq, %10, %64 : vector<32x128xi32>
    %cst_39 = arith.constant 1.000000e+00 : f32
    %cst_40 = arith.constant 0.000000e+00 : f32
    %66 = vector.broadcast %cst_39 : f32 to vector<32x128xf32>
    %67 = vector.broadcast %cst_40 : f32 to vector<32x128xf32>
    %68 = arith.select %65, %66, %67 : vector<32x128xi1>, vector<32x128xf32>
    %cst_41 = arith.constant dense<0.000000e+00> : vector<2x128xf32>
    %69 = tpu.matmul %62, %68, %cst_41 {dimension_numbers = #tpu.dot_dimension_numbers<[1], [0], [0], [1], [0, 0, 1, 1], [], []>} : vector<2x32xf32>, vector<32x128xf32>, vector<2x128xf32> -> vector<2x128xf32>
    %70 = arith.addf %41, %69 : vector<2x128xf32>
    %cst_42 = arith.constant dense<0.000000e+00> : vector<16x32xf32>
    %71 = tpu.matmul %12, %61, %cst_42 {dimension_numbers = #tpu.dot_dimension_numbers<[1], [0], [0], [1], [0, 0, 1, 1], [], []>} : vector<16x16xf32>, vector<16x32xf32>, vector<16x32xf32> -> vector<16x32xf32>
    %c0_43 = arith.constant 0 : index
    %c0_44 = arith.constant 0 : index
    %72 = vector.load %arg43[%c0_43, %c0_44] : memref<32x1xf32, #tpu.memory_space<vmem>>, vector<32x1xf32>
    %cst_45 = arith.constant dense<0.000000e+00> : vector<16x1xf32>
    %73 = tpu.matmul %71, %72, %cst_45 {dimension_numbers = #tpu.dot_dimension_numbers<[1], [0], [0], [1], [0, 0, 1, 1], [], []>} : vector<16x32xf32>, vector<32x1xf32>, vector<16x1xf32> -> vector<16x1xf32>
    %c0_46 = arith.constant 0 : index
    %c0_47 = arith.constant 0 : index
    %74 = vector.load %arg44[%c0_46, %c0_47] : memref<32x1xf32, #tpu.memory_space<vmem>>, vector<32x1xf32>
    %cst_48 = arith.constant dense<0.000000e+00> : vector<16x1xf32>
    %75 = tpu.matmul %61, %74, %cst_48 {dimension_numbers = #tpu.dot_dimension_numbers<[1], [0], [0], [1], [0, 0, 1, 1], [], []>} : vector<16x32xf32>, vector<32x1xf32>, vector<16x1xf32> -> vector<16x1xf32>
    %76 = arith.addf %73, %75 : vector<16x1xf32>
    %c0_49 = arith.constant 0 : index
    %c0_50 = arith.constant 0 : index
    %77 = vector.load %arg42[%c0_49, %c0_50] : memref<1x1xf32, #tpu.memory_space<vmem>>, vector<1x1xf32>
    %78 = vector.broadcast %77 : vector<1x1xf32> to vector<16x1xf32>
    %79 = arith.addf %76, %78 : vector<16x1xf32>
    %80 = arith.mulf %79, %13 : vector<16x1xf32>
    %81 = math.tanh %80 : vector<16x1xf32>
    %cst_51 = arith.constant 5.000000e-01 : f32
    %82 = vector.broadcast %cst_51 : f32 to vector<16x1xf32>
    %83 = arith.cmpf ogt, %13, %82 : vector<16x1xf32>
    %cst_52 = arith.constant -1.000000e+30 : f32
    %84 = vector.broadcast %cst_52 : f32 to vector<16x1xf32>
    %85 = arith.select %83, %81, %84 : vector<16x1xi1>, vector<16x1xf32>
    %86 = vector.broadcast %85 : vector<16x1xf32> to vector<16x16xf32>
    %87 = arith.mulf %8, %86 : vector<16x16xf32>
    %cst_53 = arith.constant dense<0.000000e+00> : vector<16x16xf32>
    %88 = tpu.matmul %2, %87, %cst_53 {dimension_numbers = #tpu.dot_dimension_numbers<[1], [0], [0], [1], [0, 0, 1, 1], [], []>} : vector<16x16xf32>, vector<16x16xf32>, vector<16x16xf32> -> vector<16x16xf32>
    %89 = vector.broadcast %13 : vector<16x1xf32> to vector<16x16xf32>
    %90 = arith.mulf %8, %89 : vector<16x16xf32>
    %cst_54 = arith.constant dense<0.000000e+00> : vector<16x16xf32>
    %91 = tpu.matmul %2, %90, %cst_54 {dimension_numbers = #tpu.dot_dimension_numbers<[1], [0], [0], [1], [0, 0, 1, 1], [], []>} : vector<16x16xf32>, vector<16x16xf32>, vector<16x16xf32> -> vector<16x16xf32>
    %92 = arith.mulf %1, %91 : vector<16x16xf32>
    %cst_55 = arith.constant dense<0.000000e+00> : vector<16xf32>
    %93 = vector.multi_reduction <add>, %92, %cst_55 [1] : vector<16x16xf32> to vector<16xf32>
    %94 = vector.shape_cast %93 : vector<16xf32> to vector<16x1xf32>
    %95 = vector.broadcast %85 : vector<16x1xf32> to vector<16x16xf32>
    %96 = arith.cmpf ogt, %88, %95 : vector<16x16xf32>
    %97 = vector.broadcast %85 : vector<16x1xf32> to vector<16x16xf32>
    %98 = arith.cmpf oeq, %88, %97 : vector<16x16xf32>
    %99 = arith.cmpi slt, %4, %3 : vector<16x16xi32>
    %100 = arith.andi %98, %99 : vector<16x16xi1>
    %101 = arith.ori %96, %100 : vector<16x16xi1>
    %cst_56 = arith.constant 1.000000e+00 : f32
    %cst_57 = arith.constant 0.000000e+00 : f32
    %102 = vector.broadcast %cst_56 : f32 to vector<16x16xf32>
    %103 = vector.broadcast %cst_57 : f32 to vector<16x16xf32>
    %104 = arith.select %101, %102, %103 : vector<16x16xi1>, vector<16x16xf32>
    %105 = arith.mulf %92, %104 : vector<16x16xf32>
    %cst_58 = arith.constant dense<0.000000e+00> : vector<16xf32>
    %106 = vector.multi_reduction <add>, %105, %cst_58 [1] : vector<16x16xf32> to vector<16xf32>
    %107 = vector.shape_cast %106 : vector<16xf32> to vector<16x1xf32>
    %cst_59 = arith.constant 5.000000e-01 : f32
    %108 = vector.broadcast %cst_59 : f32 to vector<16x1xf32>
    %109 = arith.cmpf ogt, %13, %108 : vector<16x1xf32>
    %cst_60 = arith.constant 8.000000e-01 : f32
    %110 = vector.broadcast %cst_60 : f32 to vector<16x1xf32>
    %111 = arith.mulf %110, %94 : vector<16x1xf32>
    %112 = arith.cmpf olt, %107, %111 : vector<16x1xf32>
    %113 = arith.andi %109, %112 : vector<16x1xi1>
    %cst_61 = arith.constant 1.000000e+00 : f32
    %cst_62 = arith.constant 0.000000e+00 : f32
    %114 = vector.broadcast %cst_61 : f32 to vector<16x1xf32>
    %115 = vector.broadcast %cst_62 : f32 to vector<16x1xf32>
    %116 = arith.select %113, %114, %115 : vector<16x1xi1>, vector<16x1xf32>
    %117 = vector.broadcast %81 : vector<16x1xf32> to vector<16x32xf32>
    %118 = arith.mulf %61, %117 : vector<16x32xf32>
    %119 = vector.broadcast %116 : vector<16x1xf32> to vector<16x32xf32>
    %120 = arith.mulf %118, %119 : vector<16x32xf32>
    %121 = vector.broadcast %116 : vector<16x1xf32> to vector<16x16xf32>
    %122 = arith.mulf %12, %121 : vector<16x16xf32>
    %123 = vector.broadcast %116 : vector<16x1xf32> to vector<16x16xf32>
    %124 = arith.mulf %8, %123 : vector<16x16xf32>
    %cst_63 = arith.constant dense<0.000000e+00> : vector<16x16xf32>
    %125 = tpu.matmul %2, %124, %cst_63 {dimension_numbers = #tpu.dot_dimension_numbers<[1], [0], [0], [1], [0, 0, 1, 1], [], []>} : vector<16x16xf32>, vector<16x16xf32>, vector<16x16xf32> -> vector<16x16xf32>
    %126 = arith.mulf %122, %125 : vector<16x16xf32>
    %cst_64 = arith.constant dense<0.000000e+00> : vector<16x32xf32>
    %127 = tpu.matmul %126, %120, %cst_64 {dimension_numbers = #tpu.dot_dimension_numbers<[1], [0], [0], [1], [0, 0, 1, 1], [], []>} : vector<16x16xf32>, vector<16x32xf32>, vector<16x32xf32> -> vector<16x32xf32>
    %cst_65 = arith.constant dense<0.000000e+00> : vector<16xf32>
    %128 = vector.multi_reduction <add>, %126, %cst_65 [1] : vector<16x16xf32> to vector<16xf32>
    %129 = vector.shape_cast %128 : vector<16xf32> to vector<16x1xf32>
    %cst_66 = arith.constant 1.000000e+00 : f32
    %130 = vector.broadcast %cst_66 : f32 to vector<16x1xf32>
    %131 = arith.maximumf %129, %130 : vector<16x1xf32>
    %132 = tpu.reciprocal %131 {approx = true} : vector<16x1xf32> -> vector<16x1xf32>
    %133 = vector.broadcast %132 : vector<16x1xf32> to vector<16x32xf32>
    %134 = arith.mulf %127, %133 : vector<16x32xf32>
    %c0_67 = arith.constant 0 : index
    %c0_68 = arith.constant 0 : index
    %135 = vector.load %arg37[%c0_67, %c0_68] : memref<32x32xf32, #tpu.memory_space<vmem>>, vector<32x32xf32>
    %cst_69 = arith.constant dense<0.000000e+00> : vector<16x32xf32>
    %136 = tpu.matmul %134, %135, %cst_69 {dimension_numbers = #tpu.dot_dimension_numbers<[1], [0], [0], [1], [0, 0, 1, 1], [], []>} : vector<16x32xf32>, vector<32x32xf32>, vector<16x32xf32> -> vector<16x32xf32>
    %c0_70 = arith.constant 0 : index
    %c0_71 = arith.constant 0 : index
    %137 = vector.load %arg38[%c0_70, %c0_71] : memref<32x32xf32, #tpu.memory_space<vmem>>, vector<32x32xf32>
    %cst_72 = arith.constant dense<0.000000e+00> : vector<16x32xf32>
    %138 = tpu.matmul %120, %137, %cst_72 {dimension_numbers = #tpu.dot_dimension_numbers<[1], [0], [0], [1], [0, 0, 1, 1], [], []>} : vector<16x32xf32>, vector<32x32xf32>, vector<16x32xf32> -> vector<16x32xf32>
    %139 = arith.addf %136, %138 : vector<16x32xf32>
    %c0_73 = arith.constant 0 : index
    %c0_74 = arith.constant 0 : index
    %140 = vector.load %arg36[%c0_73, %c0_74] : memref<1x32xf32, #tpu.memory_space<vmem>>, vector<1x32xf32>
    %141 = vector.broadcast %140 : vector<1x32xf32> to vector<16x32xf32>
    %142 = arith.addf %139, %141 : vector<16x32xf32>
    %cst_75 = arith.constant 0.000000e+00 : f32
    %143 = vector.broadcast %cst_75 : f32 to vector<16x32xf32>
    %144 = arith.maximumf %142, %143 : vector<16x32xf32>
    %145 = vector.broadcast %116 : vector<16x1xf32> to vector<16x32xf32>
    %146 = arith.mulf %144, %145 : vector<16x32xf32>
    %cst_76 = arith.constant dense<0.000000e+00> : vector<2x32xf32>
    %147 = tpu.matmul %0, %146, %cst_76 {dimension_numbers = #tpu.dot_dimension_numbers<[1], [0], [0], [1], [0, 0, 1, 1], [], []>} : vector<2x16xf32>, vector<16x32xf32>, vector<2x32xf32> -> vector<2x32xf32>
    %c64_i32 = arith.constant 64 : i32
    %148 = vector.broadcast %c64_i32 : i32 to vector<32x128xi32>
    %149 = arith.addi %9, %148 : vector<32x128xi32>
    %150 = arith.cmpi eq, %10, %149 : vector<32x128xi32>
    %cst_77 = arith.constant 1.000000e+00 : f32
    %cst_78 = arith.constant 0.000000e+00 : f32
    %151 = vector.broadcast %cst_77 : f32 to vector<32x128xf32>
    %152 = vector.broadcast %cst_78 : f32 to vector<32x128xf32>
    %153 = arith.select %150, %151, %152 : vector<32x128xi1>, vector<32x128xf32>
    %cst_79 = arith.constant dense<0.000000e+00> : vector<2x128xf32>
    %154 = tpu.matmul %147, %153, %cst_79 {dimension_numbers = #tpu.dot_dimension_numbers<[1], [0], [0], [1], [0, 0, 1, 1], [], []>} : vector<2x32xf32>, vector<32x128xf32>, vector<2x128xf32> -> vector<2x128xf32>
    %155 = arith.addf %70, %154 : vector<2x128xf32>
    %cst_80 = arith.constant dense<0.000000e+00> : vector<16x32xf32>
    %156 = tpu.matmul %126, %146, %cst_80 {dimension_numbers = #tpu.dot_dimension_numbers<[1], [0], [0], [1], [0, 0, 1, 1], [], []>} : vector<16x16xf32>, vector<16x32xf32>, vector<16x32xf32> -> vector<16x32xf32>
    %cst_81 = arith.constant dense<0.000000e+00> : vector<16xf32>
    %157 = vector.multi_reduction <add>, %126, %cst_81 [1] : vector<16x16xf32> to vector<16xf32>
    %158 = vector.shape_cast %157 : vector<16xf32> to vector<16x1xf32>
    %cst_82 = arith.constant 1.000000e+00 : f32
    %159 = vector.broadcast %cst_82 : f32 to vector<16x1xf32>
    %160 = arith.maximumf %158, %159 : vector<16x1xf32>
    %161 = tpu.reciprocal %160 {approx = true} : vector<16x1xf32> -> vector<16x1xf32>
    %162 = vector.broadcast %161 : vector<16x1xf32> to vector<16x32xf32>
    %163 = arith.mulf %156, %162 : vector<16x32xf32>
    %c0_83 = arith.constant 0 : index
    %c0_84 = arith.constant 0 : index
    %164 = vector.load %arg40[%c0_83, %c0_84] : memref<32x32xf32, #tpu.memory_space<vmem>>, vector<32x32xf32>
    %cst_85 = arith.constant dense<0.000000e+00> : vector<16x32xf32>
    %165 = tpu.matmul %163, %164, %cst_85 {dimension_numbers = #tpu.dot_dimension_numbers<[1], [0], [0], [1], [0, 0, 1, 1], [], []>} : vector<16x32xf32>, vector<32x32xf32>, vector<16x32xf32> -> vector<16x32xf32>
    %c0_86 = arith.constant 0 : index
    %c0_87 = arith.constant 0 : index
    %166 = vector.load %arg41[%c0_86, %c0_87] : memref<32x32xf32, #tpu.memory_space<vmem>>, vector<32x32xf32>
    %cst_88 = arith.constant dense<0.000000e+00> : vector<16x32xf32>
    %167 = tpu.matmul %146, %166, %cst_88 {dimension_numbers = #tpu.dot_dimension_numbers<[1], [0], [0], [1], [0, 0, 1, 1], [], []>} : vector<16x32xf32>, vector<32x32xf32>, vector<16x32xf32> -> vector<16x32xf32>
    %168 = arith.addf %165, %167 : vector<16x32xf32>
    %c0_89 = arith.constant 0 : index
    %c0_90 = arith.constant 0 : index
    %169 = vector.load %arg39[%c0_89, %c0_90] : memref<1x32xf32, #tpu.memory_space<vmem>>, vector<1x32xf32>
    %170 = vector.broadcast %169 : vector<1x32xf32> to vector<16x32xf32>
    %171 = arith.addf %168, %170 : vector<16x32xf32>
    %cst_91 = arith.constant 0.000000e+00 : f32
    %172 = vector.broadcast %cst_91 : f32 to vector<16x32xf32>
    %173 = arith.maximumf %171, %172 : vector<16x32xf32>
    %174 = vector.broadcast %116 : vector<16x1xf32> to vector<16x32xf32>
    %175 = arith.mulf %173, %174 : vector<16x32xf32>
    %cst_92 = arith.constant dense<0.000000e+00> : vector<2x32xf32>
    %176 = tpu.matmul %0, %175, %cst_92 {dimension_numbers = #tpu.dot_dimension_numbers<[1], [0], [0], [1], [0, 0, 1, 1], [], []>} : vector<2x16xf32>, vector<16x32xf32>, vector<2x32xf32> -> vector<2x32xf32>
    %c96_i32 = arith.constant 96 : i32
    %177 = vector.broadcast %c96_i32 : i32 to vector<32x128xi32>
    %178 = arith.addi %9, %177 : vector<32x128xi32>
    %179 = arith.cmpi eq, %10, %178 : vector<32x128xi32>
    %cst_93 = arith.constant 1.000000e+00 : f32
    %cst_94 = arith.constant 0.000000e+00 : f32
    %180 = vector.broadcast %cst_93 : f32 to vector<32x128xf32>
    %181 = vector.broadcast %cst_94 : f32 to vector<32x128xf32>
    %182 = arith.select %179, %180, %181 : vector<32x128xi1>, vector<32x128xf32>
    %cst_95 = arith.constant dense<0.000000e+00> : vector<2x128xf32>
    %183 = tpu.matmul %176, %182, %cst_95 {dimension_numbers = #tpu.dot_dimension_numbers<[1], [0], [0], [1], [0, 0, 1, 1], [], []>} : vector<2x32xf32>, vector<32x128xf32>, vector<2x128xf32> -> vector<2x128xf32>
    %184 = arith.addf %155, %183 : vector<2x128xf32>
    %c0_96 = arith.constant 0 : index
    %c0_97 = arith.constant 0 : index
    %185 = vector.load %arg2[%c0_96, %c0_97] : memref<16x16xf32, #tpu.memory_space<vmem>>, vector<16x16xf32>
    %c0_98 = arith.constant 0 : index
    %c0_99 = arith.constant 0 : index
    %186 = vector.load %arg3[%c0_98, %c0_99] : memref<16x16xf32, #tpu.memory_space<vmem>>, vector<16x16xf32>
    %cst_100 = arith.constant 1.000000e+00 : f32
    %187 = vector.broadcast %cst_100 : f32 to vector<16x1xf32>
    %cst_101 = arith.constant dense<0.000000e+00> : vector<16x16xf32>
    %188 = tpu.matmul %186, %185, %cst_101 {dimension_numbers = #tpu.dot_dimension_numbers<[1], [0], [0], [1], [0, 0, 1, 1], [], []>} : vector<16x16xf32>, vector<16x16xf32>, vector<16x16xf32> -> vector<16x16xf32>
    %cst_102 = arith.constant dense<0.000000e+00> : vector<16xf32>
    %189 = vector.multi_reduction <add>, %186, %cst_102 [1] : vector<16x16xf32> to vector<16xf32>
    %190 = vector.shape_cast %189 : vector<16xf32> to vector<16x1xf32>
    %cst_103 = arith.constant 1.000000e+00 : f32
    %191 = vector.broadcast %cst_103 : f32 to vector<16x1xf32>
    %192 = arith.maximumf %190, %191 : vector<16x1xf32>
    %193 = tpu.reciprocal %192 {approx = true} : vector<16x1xf32> -> vector<16x1xf32>
    %194 = vector.broadcast %193 : vector<16x1xf32> to vector<16x16xf32>
    %195 = arith.mulf %188, %194 : vector<16x16xf32>
    %c0_104 = arith.constant 0 : index
    %c0_105 = arith.constant 0 : index
    %196 = vector.load %arg7[%c0_104, %c0_105] : memref<16x32xf32, #tpu.memory_space<vmem>>, vector<16x32xf32>
    %cst_106 = arith.constant dense<0.000000e+00> : vector<16x32xf32>
    %197 = tpu.matmul %195, %196, %cst_106 {dimension_numbers = #tpu.dot_dimension_numbers<[1], [0], [0], [1], [0, 0, 1, 1], [], []>} : vector<16x16xf32>, vector<16x32xf32>, vector<16x32xf32> -> vector<16x32xf32>
    %c0_107 = arith.constant 0 : index
    %c0_108 = arith.constant 0 : index
    %198 = vector.load %arg8[%c0_107, %c0_108] : memref<16x32xf32, #tpu.memory_space<vmem>>, vector<16x32xf32>
    %cst_109 = arith.constant dense<0.000000e+00> : vector<16x32xf32>
    %199 = tpu.matmul %185, %198, %cst_109 {dimension_numbers = #tpu.dot_dimension_numbers<[1], [0], [0], [1], [0, 0, 1, 1], [], []>} : vector<16x16xf32>, vector<16x32xf32>, vector<16x32xf32> -> vector<16x32xf32>
    %200 = arith.addf %197, %199 : vector<16x32xf32>
    %c0_110 = arith.constant 0 : index
    %c0_111 = arith.constant 0 : index
    %201 = vector.load %arg6[%c0_110, %c0_111] : memref<1x32xf32, #tpu.memory_space<vmem>>, vector<1x32xf32>
    %202 = vector.broadcast %201 : vector<1x32xf32> to vector<16x32xf32>
    %203 = arith.addf %200, %202 : vector<16x32xf32>
    %cst_112 = arith.constant 0.000000e+00 : f32
    %204 = vector.broadcast %cst_112 : f32 to vector<16x32xf32>
    %205 = arith.maximumf %203, %204 : vector<16x32xf32>
    %206 = vector.broadcast %187 : vector<16x1xf32> to vector<16x32xf32>
    %207 = arith.mulf %205, %206 : vector<16x32xf32>
    %cst_113 = arith.constant dense<0.000000e+00> : vector<2x32xf32>
    %208 = tpu.matmul %0, %207, %cst_113 {dimension_numbers = #tpu.dot_dimension_numbers<[1], [0], [0], [1], [0, 0, 1, 1], [], []>} : vector<2x16xf32>, vector<16x32xf32>, vector<2x32xf32> -> vector<2x32xf32>
    %c0_i32_114 = arith.constant 0 : i32
    %209 = vector.broadcast %c0_i32_114 : i32 to vector<32x128xi32>
    %210 = arith.addi %9, %209 : vector<32x128xi32>
    %211 = arith.cmpi eq, %10, %210 : vector<32x128xi32>
    %cst_115 = arith.constant 1.000000e+00 : f32
    %cst_116 = arith.constant 0.000000e+00 : f32
    %212 = vector.broadcast %cst_115 : f32 to vector<32x128xf32>
    %213 = vector.broadcast %cst_116 : f32 to vector<32x128xf32>
    %214 = arith.select %211, %212, %213 : vector<32x128xi1>, vector<32x128xf32>
    %cst_117 = arith.constant dense<0.000000e+00> : vector<2x128xf32>
    %215 = tpu.matmul %208, %214, %cst_117 {dimension_numbers = #tpu.dot_dimension_numbers<[1], [0], [0], [1], [0, 0, 1, 1], [], []>} : vector<2x32xf32>, vector<32x128xf32>, vector<2x128xf32> -> vector<2x128xf32>
    %cst_118 = arith.constant dense<0.000000e+00> : vector<16x32xf32>
    %216 = tpu.matmul %186, %207, %cst_118 {dimension_numbers = #tpu.dot_dimension_numbers<[1], [0], [0], [1], [0, 0, 1, 1], [], []>} : vector<16x16xf32>, vector<16x32xf32>, vector<16x32xf32> -> vector<16x32xf32>
    %cst_119 = arith.constant dense<0.000000e+00> : vector<16xf32>
    %217 = vector.multi_reduction <add>, %186, %cst_119 [1] : vector<16x16xf32> to vector<16xf32>
    %218 = vector.shape_cast %217 : vector<16xf32> to vector<16x1xf32>
    %cst_120 = arith.constant 1.000000e+00 : f32
    %219 = vector.broadcast %cst_120 : f32 to vector<16x1xf32>
    %220 = arith.maximumf %218, %219 : vector<16x1xf32>
    %221 = tpu.reciprocal %220 {approx = true} : vector<16x1xf32> -> vector<16x1xf32>
    %222 = vector.broadcast %221 : vector<16x1xf32> to vector<16x32xf32>
    %223 = arith.mulf %216, %222 : vector<16x32xf32>
    %c0_121 = arith.constant 0 : index
    %c0_122 = arith.constant 0 : index
    %224 = vector.load %arg10[%c0_121, %c0_122] : memref<32x32xf32, #tpu.memory_space<vmem>>, vector<32x32xf32>
    %cst_123 = arith.constant dense<0.000000e+00> : vector<16x32xf32>
    %225 = tpu.matmul %223, %224, %cst_123 {dimension_numbers = #tpu.dot_dimension_numbers<[1], [0], [0], [1], [0, 0, 1, 1], [], []>} : vector<16x32xf32>, vector<32x32xf32>, vector<16x32xf32> -> vector<16x32xf32>
    %c0_124 = arith.constant 0 : index
    %c0_125 = arith.constant 0 : index
    %226 = vector.load %arg11[%c0_124, %c0_125] : memref<32x32xf32, #tpu.memory_space<vmem>>, vector<32x32xf32>
    %cst_126 = arith.constant dense<0.000000e+00> : vector<16x32xf32>
    %227 = tpu.matmul %207, %226, %cst_126 {dimension_numbers = #tpu.dot_dimension_numbers<[1], [0], [0], [1], [0, 0, 1, 1], [], []>} : vector<16x32xf32>, vector<32x32xf32>, vector<16x32xf32> -> vector<16x32xf32>
    %228 = arith.addf %225, %227 : vector<16x32xf32>
    %c0_127 = arith.constant 0 : index
    %c0_128 = arith.constant 0 : index
    %229 = vector.load %arg9[%c0_127, %c0_128] : memref<1x32xf32, #tpu.memory_space<vmem>>, vector<1x32xf32>
    %230 = vector.broadcast %229 : vector<1x32xf32> to vector<16x32xf32>
    %231 = arith.addf %228, %230 : vector<16x32xf32>
    %cst_129 = arith.constant 0.000000e+00 : f32
    %232 = vector.broadcast %cst_129 : f32 to vector<16x32xf32>
    %233 = arith.maximumf %231, %232 : vector<16x32xf32>
    %234 = vector.broadcast %187 : vector<16x1xf32> to vector<16x32xf32>
    %235 = arith.mulf %233, %234 : vector<16x32xf32>
    %cst_130 = arith.constant dense<0.000000e+00> : vector<2x32xf32>
    %236 = tpu.matmul %0, %235, %cst_130 {dimension_numbers = #tpu.dot_dimension_numbers<[1], [0], [0], [1], [0, 0, 1, 1], [], []>} : vector<2x16xf32>, vector<16x32xf32>, vector<2x32xf32> -> vector<2x32xf32>
    %c32_i32_131 = arith.constant 32 : i32
    %237 = vector.broadcast %c32_i32_131 : i32 to vector<32x128xi32>
    %238 = arith.addi %9, %237 : vector<32x128xi32>
    %239 = arith.cmpi eq, %10, %238 : vector<32x128xi32>
    %cst_132 = arith.constant 1.000000e+00 : f32
    %cst_133 = arith.constant 0.000000e+00 : f32
    %240 = vector.broadcast %cst_132 : f32 to vector<32x128xf32>
    %241 = vector.broadcast %cst_133 : f32 to vector<32x128xf32>
    %242 = arith.select %239, %240, %241 : vector<32x128xi1>, vector<32x128xf32>
    %cst_134 = arith.constant dense<0.000000e+00> : vector<2x128xf32>
    %243 = tpu.matmul %236, %242, %cst_134 {dimension_numbers = #tpu.dot_dimension_numbers<[1], [0], [0], [1], [0, 0, 1, 1], [], []>} : vector<2x32xf32>, vector<32x128xf32>, vector<2x128xf32> -> vector<2x128xf32>
    %244 = arith.addf %215, %243 : vector<2x128xf32>
    %cst_135 = arith.constant dense<0.000000e+00> : vector<16x32xf32>
    %245 = tpu.matmul %186, %235, %cst_135 {dimension_numbers = #tpu.dot_dimension_numbers<[1], [0], [0], [1], [0, 0, 1, 1], [], []>} : vector<16x16xf32>, vector<16x32xf32>, vector<16x32xf32> -> vector<16x32xf32>
    %c0_136 = arith.constant 0 : index
    %c0_137 = arith.constant 0 : index
    %246 = vector.load %arg19[%c0_136, %c0_137] : memref<32x1xf32, #tpu.memory_space<vmem>>, vector<32x1xf32>
    %cst_138 = arith.constant dense<0.000000e+00> : vector<16x1xf32>
    %247 = tpu.matmul %245, %246, %cst_138 {dimension_numbers = #tpu.dot_dimension_numbers<[1], [0], [0], [1], [0, 0, 1, 1], [], []>} : vector<16x32xf32>, vector<32x1xf32>, vector<16x1xf32> -> vector<16x1xf32>
    %c0_139 = arith.constant 0 : index
    %c0_140 = arith.constant 0 : index
    %248 = vector.load %arg20[%c0_139, %c0_140] : memref<32x1xf32, #tpu.memory_space<vmem>>, vector<32x1xf32>
    %cst_141 = arith.constant dense<0.000000e+00> : vector<16x1xf32>
    %249 = tpu.matmul %235, %248, %cst_141 {dimension_numbers = #tpu.dot_dimension_numbers<[1], [0], [0], [1], [0, 0, 1, 1], [], []>} : vector<16x32xf32>, vector<32x1xf32>, vector<16x1xf32> -> vector<16x1xf32>
    %250 = arith.addf %247, %249 : vector<16x1xf32>
    %c0_142 = arith.constant 0 : index
    %c0_143 = arith.constant 0 : index
    %251 = vector.load %arg18[%c0_142, %c0_143] : memref<1x1xf32, #tpu.memory_space<vmem>>, vector<1x1xf32>
    %252 = vector.broadcast %251 : vector<1x1xf32> to vector<16x1xf32>
    %253 = arith.addf %250, %252 : vector<16x1xf32>
    %254 = arith.mulf %253, %187 : vector<16x1xf32>
    %255 = math.tanh %254 : vector<16x1xf32>
    %cst_144 = arith.constant 5.000000e-01 : f32
    %256 = vector.broadcast %cst_144 : f32 to vector<16x1xf32>
    %257 = arith.cmpf ogt, %187, %256 : vector<16x1xf32>
    %cst_145 = arith.constant -1.000000e+30 : f32
    %258 = vector.broadcast %cst_145 : f32 to vector<16x1xf32>
    %259 = arith.select %257, %255, %258 : vector<16x1xi1>, vector<16x1xf32>
    %260 = vector.broadcast %259 : vector<16x1xf32> to vector<16x16xf32>
    %261 = arith.mulf %8, %260 : vector<16x16xf32>
    %cst_146 = arith.constant dense<0.000000e+00> : vector<16x16xf32>
    %262 = tpu.matmul %2, %261, %cst_146 {dimension_numbers = #tpu.dot_dimension_numbers<[1], [0], [0], [1], [0, 0, 1, 1], [], []>} : vector<16x16xf32>, vector<16x16xf32>, vector<16x16xf32> -> vector<16x16xf32>
    %263 = vector.broadcast %187 : vector<16x1xf32> to vector<16x16xf32>
    %264 = arith.mulf %8, %263 : vector<16x16xf32>
    %cst_147 = arith.constant dense<0.000000e+00> : vector<16x16xf32>
    %265 = tpu.matmul %2, %264, %cst_147 {dimension_numbers = #tpu.dot_dimension_numbers<[1], [0], [0], [1], [0, 0, 1, 1], [], []>} : vector<16x16xf32>, vector<16x16xf32>, vector<16x16xf32> -> vector<16x16xf32>
    %266 = arith.mulf %1, %265 : vector<16x16xf32>
    %cst_148 = arith.constant dense<0.000000e+00> : vector<16xf32>
    %267 = vector.multi_reduction <add>, %266, %cst_148 [1] : vector<16x16xf32> to vector<16xf32>
    %268 = vector.shape_cast %267 : vector<16xf32> to vector<16x1xf32>
    %269 = vector.broadcast %259 : vector<16x1xf32> to vector<16x16xf32>
    %270 = arith.cmpf ogt, %262, %269 : vector<16x16xf32>
    %271 = vector.broadcast %259 : vector<16x1xf32> to vector<16x16xf32>
    %272 = arith.cmpf oeq, %262, %271 : vector<16x16xf32>
    %273 = arith.cmpi slt, %4, %3 : vector<16x16xi32>
    %274 = arith.andi %272, %273 : vector<16x16xi1>
    %275 = arith.ori %270, %274 : vector<16x16xi1>
    %cst_149 = arith.constant 1.000000e+00 : f32
    %cst_150 = arith.constant 0.000000e+00 : f32
    %276 = vector.broadcast %cst_149 : f32 to vector<16x16xf32>
    %277 = vector.broadcast %cst_150 : f32 to vector<16x16xf32>
    %278 = arith.select %275, %276, %277 : vector<16x16xi1>, vector<16x16xf32>
    %279 = arith.mulf %266, %278 : vector<16x16xf32>
    %cst_151 = arith.constant dense<0.000000e+00> : vector<16xf32>
    %280 = vector.multi_reduction <add>, %279, %cst_151 [1] : vector<16x16xf32> to vector<16xf32>
    %281 = vector.shape_cast %280 : vector<16xf32> to vector<16x1xf32>
    %cst_152 = arith.constant 5.000000e-01 : f32
    %282 = vector.broadcast %cst_152 : f32 to vector<16x1xf32>
    %283 = arith.cmpf ogt, %187, %282 : vector<16x1xf32>
    %cst_153 = arith.constant 8.000000e-01 : f32
    %284 = vector.broadcast %cst_153 : f32 to vector<16x1xf32>
    %285 = arith.mulf %284, %268 : vector<16x1xf32>
    %286 = arith.cmpf olt, %281, %285 : vector<16x1xf32>
    %287 = arith.andi %283, %286 : vector<16x1xi1>
    %cst_154 = arith.constant 1.000000e+00 : f32
    %cst_155 = arith.constant 0.000000e+00 : f32
    %288 = vector.broadcast %cst_154 : f32 to vector<16x1xf32>
    %289 = vector.broadcast %cst_155 : f32 to vector<16x1xf32>
    %290 = arith.select %287, %288, %289 : vector<16x1xi1>, vector<16x1xf32>
    %291 = vector.broadcast %255 : vector<16x1xf32> to vector<16x32xf32>
    %292 = arith.mulf %235, %291 : vector<16x32xf32>
    %293 = vector.broadcast %290 : vector<16x1xf32> to vector<16x32xf32>
    %294 = arith.mulf %292, %293 : vector<16x32xf32>
    %295 = vector.broadcast %290 : vector<16x1xf32> to vector<16x16xf32>
    %296 = arith.mulf %186, %295 : vector<16x16xf32>
    %297 = vector.broadcast %290 : vector<16x1xf32> to vector<16x16xf32>
    %298 = arith.mulf %8, %297 : vector<16x16xf32>
    %cst_156 = arith.constant dense<0.000000e+00> : vector<16x16xf32>
    %299 = tpu.matmul %2, %298, %cst_156 {dimension_numbers = #tpu.dot_dimension_numbers<[1], [0], [0], [1], [0, 0, 1, 1], [], []>} : vector<16x16xf32>, vector<16x16xf32>, vector<16x16xf32> -> vector<16x16xf32>
    %300 = arith.mulf %296, %299 : vector<16x16xf32>
    %cst_157 = arith.constant dense<0.000000e+00> : vector<16x32xf32>
    %301 = tpu.matmul %300, %294, %cst_157 {dimension_numbers = #tpu.dot_dimension_numbers<[1], [0], [0], [1], [0, 0, 1, 1], [], []>} : vector<16x16xf32>, vector<16x32xf32>, vector<16x32xf32> -> vector<16x32xf32>
    %cst_158 = arith.constant dense<0.000000e+00> : vector<16xf32>
    %302 = vector.multi_reduction <add>, %300, %cst_158 [1] : vector<16x16xf32> to vector<16xf32>
    %303 = vector.shape_cast %302 : vector<16xf32> to vector<16x1xf32>
    %cst_159 = arith.constant 1.000000e+00 : f32
    %304 = vector.broadcast %cst_159 : f32 to vector<16x1xf32>
    %305 = arith.maximumf %303, %304 : vector<16x1xf32>
    %306 = tpu.reciprocal %305 {approx = true} : vector<16x1xf32> -> vector<16x1xf32>
    %307 = vector.broadcast %306 : vector<16x1xf32> to vector<16x32xf32>
    %308 = arith.mulf %301, %307 : vector<16x32xf32>
    %c0_160 = arith.constant 0 : index
    %c0_161 = arith.constant 0 : index
    %309 = vector.load %arg13[%c0_160, %c0_161] : memref<32x32xf32, #tpu.memory_space<vmem>>, vector<32x32xf32>
    %cst_162 = arith.constant dense<0.000000e+00> : vector<16x32xf32>
    %310 = tpu.matmul %308, %309, %cst_162 {dimension_numbers = #tpu.dot_dimension_numbers<[1], [0], [0], [1], [0, 0, 1, 1], [], []>} : vector<16x32xf32>, vector<32x32xf32>, vector<16x32xf32> -> vector<16x32xf32>
    %c0_163 = arith.constant 0 : index
    %c0_164 = arith.constant 0 : index
    %311 = vector.load %arg14[%c0_163, %c0_164] : memref<32x32xf32, #tpu.memory_space<vmem>>, vector<32x32xf32>
    %cst_165 = arith.constant dense<0.000000e+00> : vector<16x32xf32>
    %312 = tpu.matmul %294, %311, %cst_165 {dimension_numbers = #tpu.dot_dimension_numbers<[1], [0], [0], [1], [0, 0, 1, 1], [], []>} : vector<16x32xf32>, vector<32x32xf32>, vector<16x32xf32> -> vector<16x32xf32>
    %313 = arith.addf %310, %312 : vector<16x32xf32>
    %c0_166 = arith.constant 0 : index
    %c0_167 = arith.constant 0 : index
    %314 = vector.load %arg12[%c0_166, %c0_167] : memref<1x32xf32, #tpu.memory_space<vmem>>, vector<1x32xf32>
    %315 = vector.broadcast %314 : vector<1x32xf32> to vector<16x32xf32>
    %316 = arith.addf %313, %315 : vector<16x32xf32>
    %cst_168 = arith.constant 0.000000e+00 : f32
    %317 = vector.broadcast %cst_168 : f32 to vector<16x32xf32>
    %318 = arith.maximumf %316, %317 : vector<16x32xf32>
    %319 = vector.broadcast %290 : vector<16x1xf32> to vector<16x32xf32>
    %320 = arith.mulf %318, %319 : vector<16x32xf32>
    %cst_169 = arith.constant dense<0.000000e+00> : vector<2x32xf32>
    %321 = tpu.matmul %0, %320, %cst_169 {dimension_numbers = #tpu.dot_dimension_numbers<[1], [0], [0], [1], [0, 0, 1, 1], [], []>} : vector<2x16xf32>, vector<16x32xf32>, vector<2x32xf32> -> vector<2x32xf32>
    %c64_i32_170 = arith.constant 64 : i32
    %322 = vector.broadcast %c64_i32_170 : i32 to vector<32x128xi32>
    %323 = arith.addi %9, %322 : vector<32x128xi32>
    %324 = arith.cmpi eq, %10, %323 : vector<32x128xi32>
    %cst_171 = arith.constant 1.000000e+00 : f32
    %cst_172 = arith.constant 0.000000e+00 : f32
    %325 = vector.broadcast %cst_171 : f32 to vector<32x128xf32>
    %326 = vector.broadcast %cst_172 : f32 to vector<32x128xf32>
    %327 = arith.select %324, %325, %326 : vector<32x128xi1>, vector<32x128xf32>
    %cst_173 = arith.constant dense<0.000000e+00> : vector<2x128xf32>
    %328 = tpu.matmul %321, %327, %cst_173 {dimension_numbers = #tpu.dot_dimension_numbers<[1], [0], [0], [1], [0, 0, 1, 1], [], []>} : vector<2x32xf32>, vector<32x128xf32>, vector<2x128xf32> -> vector<2x128xf32>
    %329 = arith.addf %244, %328 : vector<2x128xf32>
    %cst_174 = arith.constant dense<0.000000e+00> : vector<16x32xf32>
    %330 = tpu.matmul %300, %320, %cst_174 {dimension_numbers = #tpu.dot_dimension_numbers<[1], [0], [0], [1], [0, 0, 1, 1], [], []>} : vector<16x16xf32>, vector<16x32xf32>, vector<16x32xf32> -> vector<16x32xf32>
    %cst_175 = arith.constant dense<0.000000e+00> : vector<16xf32>
    %331 = vector.multi_reduction <add>, %300, %cst_175 [1] : vector<16x16xf32> to vector<16xf32>
    %332 = vector.shape_cast %331 : vector<16xf32> to vector<16x1xf32>
    %cst_176 = arith.constant 1.000000e+00 : f32
    %333 = vector.broadcast %cst_176 : f32 to vector<16x1xf32>
    %334 = arith.maximumf %332, %333 : vector<16x1xf32>
    %335 = tpu.reciprocal %334 {approx = true} : vector<16x1xf32> -> vector<16x1xf32>
    %336 = vector.broadcast %335 : vector<16x1xf32> to vector<16x32xf32>
    %337 = arith.mulf %330, %336 : vector<16x32xf32>
    %c0_177 = arith.constant 0 : index
    %c0_178 = arith.constant 0 : index
    %338 = vector.load %arg16[%c0_177, %c0_178] : memref<32x32xf32, #tpu.memory_space<vmem>>, vector<32x32xf32>
    %cst_179 = arith.constant dense<0.000000e+00> : vector<16x32xf32>
    %339 = tpu.matmul %337, %338, %cst_179 {dimension_numbers = #tpu.dot_dimension_numbers<[1], [0], [0], [1], [0, 0, 1, 1], [], []>} : vector<16x32xf32>, vector<32x32xf32>, vector<16x32xf32> -> vector<16x32xf32>
    %c0_180 = arith.constant 0 : index
    %c0_181 = arith.constant 0 : index
    %340 = vector.load %arg17[%c0_180, %c0_181] : memref<32x32xf32, #tpu.memory_space<vmem>>, vector<32x32xf32>
    %cst_182 = arith.constant dense<0.000000e+00> : vector<16x32xf32>
    %341 = tpu.matmul %320, %340, %cst_182 {dimension_numbers = #tpu.dot_dimension_numbers<[1], [0], [0], [1], [0, 0, 1, 1], [], []>} : vector<16x32xf32>, vector<32x32xf32>, vector<16x32xf32> -> vector<16x32xf32>
    %342 = arith.addf %339, %341 : vector<16x32xf32>
    %c0_183 = arith.constant 0 : index
    %c0_184 = arith.constant 0 : index
    %343 = vector.load %arg15[%c0_183, %c0_184] : memref<1x32xf32, #tpu.memory_space<vmem>>, vector<1x32xf32>
    %344 = vector.broadcast %343 : vector<1x32xf32> to vector<16x32xf32>
    %345 = arith.addf %342, %344 : vector<16x32xf32>
    %cst_185 = arith.constant 0.000000e+00 : f32
    %346 = vector.broadcast %cst_185 : f32 to vector<16x32xf32>
    %347 = arith.maximumf %345, %346 : vector<16x32xf32>
    %348 = vector.broadcast %290 : vector<16x1xf32> to vector<16x32xf32>
    %349 = arith.mulf %347, %348 : vector<16x32xf32>
    %cst_186 = arith.constant dense<0.000000e+00> : vector<2x32xf32>
    %350 = tpu.matmul %0, %349, %cst_186 {dimension_numbers = #tpu.dot_dimension_numbers<[1], [0], [0], [1], [0, 0, 1, 1], [], []>} : vector<2x16xf32>, vector<16x32xf32>, vector<2x32xf32> -> vector<2x32xf32>
    %c96_i32_187 = arith.constant 96 : i32
    %351 = vector.broadcast %c96_i32_187 : i32 to vector<32x128xi32>
    %352 = arith.addi %9, %351 : vector<32x128xi32>
    %353 = arith.cmpi eq, %10, %352 : vector<32x128xi32>
    %cst_188 = arith.constant 1.000000e+00 : f32
    %cst_189 = arith.constant 0.000000e+00 : f32
    %354 = vector.broadcast %cst_188 : f32 to vector<32x128xf32>
    %355 = vector.broadcast %cst_189 : f32 to vector<32x128xf32>
    %356 = arith.select %353, %354, %355 : vector<32x128xi1>, vector<32x128xf32>
    %cst_190 = arith.constant dense<0.000000e+00> : vector<2x128xf32>
    %357 = tpu.matmul %350, %356, %cst_190 {dimension_numbers = #tpu.dot_dimension_numbers<[1], [0], [0], [1], [0, 0, 1, 1], [], []>} : vector<2x32xf32>, vector<32x128xf32>, vector<2x128xf32> -> vector<2x128xf32>
    %358 = arith.addf %329, %357 : vector<2x128xf32>
    %c0_191 = arith.constant 0 : index
    %c0_192 = arith.constant 0 : index
    %359 = vector.load %arg25[%c0_191, %c0_192] : memref<256x32xf32, #tpu.memory_space<vmem>>, vector<128x32xf32>
    %cst_193 = arith.constant dense<0.000000e+00> : vector<2x32xf32>
    %360 = tpu.matmul %184, %359, %cst_193 {dimension_numbers = #tpu.dot_dimension_numbers<[1], [0], [0], [1], [0, 0, 1, 1], [], []>} : vector<2x128xf32>, vector<128x32xf32>, vector<2x32xf32> -> vector<2x32xf32>
    %c128 = arith.constant 128 : index
    %c0_194 = arith.constant 0 : index
    %361 = vector.load %arg25[%c128, %c0_194] : memref<256x32xf32, #tpu.memory_space<vmem>>, vector<128x32xf32>
    %cst_195 = arith.constant dense<0.000000e+00> : vector<2x32xf32>
    %362 = tpu.matmul %358, %361, %cst_195 {dimension_numbers = #tpu.dot_dimension_numbers<[1], [0], [0], [1], [0, 0, 1, 1], [], []>} : vector<2x128xf32>, vector<128x32xf32>, vector<2x32xf32> -> vector<2x32xf32>
    %363 = arith.addf %360, %362 : vector<2x32xf32>
    %c0_196 = arith.constant 0 : index
    %c0_197 = arith.constant 0 : index
    %364 = vector.load %arg24[%c0_196, %c0_197] : memref<1x32xf32, #tpu.memory_space<vmem>>, vector<1x32xf32>
    %365 = vector.broadcast %364 : vector<1x32xf32> to vector<2x32xf32>
    %366 = arith.addf %363, %365 : vector<2x32xf32>
    %cst_198 = arith.constant 0.000000e+00 : f32
    %367 = vector.broadcast %cst_198 : f32 to vector<2x32xf32>
    %368 = arith.maximumf %366, %367 : vector<2x32xf32>
    %c0_199 = arith.constant 0 : index
    %c0_200 = arith.constant 0 : index
    %369 = vector.load %arg27[%c0_199, %c0_200] : memref<32x16xf32, #tpu.memory_space<vmem>>, vector<32x16xf32>
    %cst_201 = arith.constant dense<0.000000e+00> : vector<2x16xf32>
    %370 = tpu.matmul %368, %369, %cst_201 {dimension_numbers = #tpu.dot_dimension_numbers<[1], [0], [0], [1], [0, 0, 1, 1], [], []>} : vector<2x32xf32>, vector<32x16xf32>, vector<2x16xf32> -> vector<2x16xf32>
    %c0_202 = arith.constant 0 : index
    %c0_203 = arith.constant 0 : index
    %371 = vector.load %arg26[%c0_202, %c0_203] : memref<1x16xf32, #tpu.memory_space<vmem>>, vector<1x16xf32>
    %372 = vector.broadcast %371 : vector<1x16xf32> to vector<2x16xf32>
    %373 = arith.addf %370, %372 : vector<2x16xf32>
    %cst_204 = arith.constant 0.000000e+00 : f32
    %374 = vector.broadcast %cst_204 : f32 to vector<2x16xf32>
    %375 = arith.maximumf %373, %374 : vector<2x16xf32>
    %c0_205 = arith.constant 0 : index
    %c0_206 = arith.constant 0 : index
    %376 = vector.load %arg29[%c0_205, %c0_206] : memref<16x3xf32, #tpu.memory_space<vmem>>, vector<16x3xf32>
    %cst_207 = arith.constant dense<0.000000e+00> : vector<2x3xf32>
    %377 = tpu.matmul %375, %376, %cst_207 {dimension_numbers = #tpu.dot_dimension_numbers<[1], [0], [0], [1], [0, 0, 1, 1], [], []>} : vector<2x16xf32>, vector<16x3xf32>, vector<2x3xf32> -> vector<2x3xf32>
    %c0_208 = arith.constant 0 : index
    %c0_209 = arith.constant 0 : index
    %378 = vector.load %arg28[%c0_208, %c0_209] : memref<1x3xf32, #tpu.memory_space<vmem>>, vector<1x3xf32>
    %379 = vector.broadcast %378 : vector<1x3xf32> to vector<2x3xf32>
    %380 = arith.addf %377, %379 : vector<2x3xf32>
    %381 = arith.mulf %184, %184 : vector<2x128xf32>
    %cst_210 = arith.constant dense<0.000000e+00> : vector<2xf32>
    %382 = vector.multi_reduction <add>, %381, %cst_210 [1] : vector<2x128xf32> to vector<2xf32>
    %383 = vector.shape_cast %382 : vector<2xf32> to vector<2x1xf32>
    %cst_211 = arith.constant 1.000000e-24 : f32
    %384 = vector.broadcast %cst_211 : f32 to vector<2x1xf32>
    %385 = arith.maximumf %383, %384 : vector<2x1xf32>
    %386 = math.rsqrt %385 : vector<2x1xf32>
    %387 = vector.broadcast %386 : vector<2x1xf32> to vector<2x128xf32>
    %388 = arith.mulf %184, %387 : vector<2x128xf32>
    %389 = arith.mulf %358, %358 : vector<2x128xf32>
    %cst_212 = arith.constant dense<0.000000e+00> : vector<2xf32>
    %390 = vector.multi_reduction <add>, %389, %cst_212 [1] : vector<2x128xf32> to vector<2xf32>
    %391 = vector.shape_cast %390 : vector<2xf32> to vector<2x1xf32>
    %cst_213 = arith.constant 1.000000e-24 : f32
    %392 = vector.broadcast %cst_213 : f32 to vector<2x1xf32>
    %393 = arith.maximumf %391, %392 : vector<2x1xf32>
    %394 = math.rsqrt %393 : vector<2x1xf32>
    %395 = vector.broadcast %394 : vector<2x1xf32> to vector<2x128xf32>
    %396 = arith.mulf %358, %395 : vector<2x128xf32>
    %cst_214 = arith.constant dense<0.000000e+00> : vector<2x2xf32>
    %397 = tpu.matmul %388, %396, %cst_214 {dimension_numbers = #tpu.dot_dimension_numbers<[1], [1], [0], [0], [0, 0, 1, 0], [], []>} : vector<2x128xf32>, vector<2x128xf32>, vector<2x2xf32> -> vector<2x2xf32>
    %cst_215 = arith.constant 2.000000e+00 : f32
    %398 = vector.broadcast %cst_215 : f32 to vector<2x2xf32>
    %399 = arith.mulf %397, %398 : vector<2x2xf32>
    %cst_216 = arith.constant dense<0.000000e+00> : vector<2x2xf32>
    %400 = tpu.matmul %396, %388, %cst_216 {dimension_numbers = #tpu.dot_dimension_numbers<[1], [1], [0], [0], [0, 0, 1, 0], [], []>} : vector<2x128xf32>, vector<2x128xf32>, vector<2x2xf32> -> vector<2x2xf32>
    %cst_217 = arith.constant 2.000000e+00 : f32
    %401 = vector.broadcast %cst_217 : f32 to vector<2x2xf32>
    %402 = arith.mulf %400, %401 : vector<2x2xf32>
    %cst_218 = arith.constant dense<0.000000e+00> : vector<2x2xf32>
    %403 = tpu.matmul %388, %388, %cst_218 {dimension_numbers = #tpu.dot_dimension_numbers<[1], [1], [0], [0], [0, 0, 1, 0], [], []>} : vector<2x128xf32>, vector<2x128xf32>, vector<2x2xf32> -> vector<2x2xf32>
    %cst_219 = arith.constant 2.000000e+00 : f32
    %404 = vector.broadcast %cst_219 : f32 to vector<2x2xf32>
    %405 = arith.mulf %403, %404 : vector<2x2xf32>
    %cst_220 = arith.constant dense<0.000000e+00> : vector<2x2xf32>
    %406 = tpu.matmul %396, %396, %cst_220 {dimension_numbers = #tpu.dot_dimension_numbers<[1], [1], [0], [0], [0, 0, 1, 0], [], []>} : vector<2x128xf32>, vector<2x128xf32>, vector<2x2xf32> -> vector<2x2xf32>
    %cst_221 = arith.constant 2.000000e+00 : f32
    %407 = vector.broadcast %cst_221 : f32 to vector<2x2xf32>
    %408 = arith.mulf %406, %407 : vector<2x2xf32>
    %409 = tpu.iota {dimensions = array<i32: 0>} : vector<2x2xi32>
    %410 = tpu.iota {dimensions = array<i32: 1>} : vector<2x2xi32>
    %411 = arith.cmpi eq, %409, %410 : vector<2x2xi32>
    %cst_222 = arith.constant 1.000000e+00 : f32
    %cst_223 = arith.constant 0.000000e+00 : f32
    %412 = vector.broadcast %cst_222 : f32 to vector<2x2xf32>
    %413 = vector.broadcast %cst_223 : f32 to vector<2x2xf32>
    %414 = arith.select %411, %412, %413 : vector<2x2xi1>, vector<2x2xf32>
    %cst_224 = arith.constant 1.000000e+00 : f32
    %415 = vector.broadcast %cst_224 : f32 to vector<2x2xf32>
    %416 = arith.subf %415, %414 : vector<2x2xf32>
    %417 = arith.mulf %405, %416 : vector<2x2xf32>
    %cst_225 = arith.constant 8.000000e-01 : f32
    %418 = vector.broadcast %cst_225 : f32 to vector<2x2xf32>
    %419 = arith.mulf %418, %417 : vector<2x2xf32>
    %cst_226 = arith.constant dense<0xFF800000> : vector<2xf32>
    %420 = vector.multi_reduction <maximumf>, %399, %cst_226 [1] : vector<2x2xf32> to vector<2xf32>
    %421 = vector.shape_cast %420 : vector<2xf32> to vector<2x1xf32>
    %cst_227 = arith.constant dense<0xFF800000> : vector<2xf32>
    %422 = vector.multi_reduction <maximumf>, %419, %cst_227 [1] : vector<2x2xf32> to vector<2xf32>
    %423 = vector.shape_cast %422 : vector<2xf32> to vector<2x1xf32>
    %424 = arith.maximumf %421, %423 : vector<2x1xf32>
    %425 = vector.broadcast %424 : vector<2x1xf32> to vector<2x2xf32>
    %426 = arith.subf %399, %425 : vector<2x2xf32>
    %427 = math.exp %426 : vector<2x2xf32>
    %cst_228 = arith.constant dense<0.000000e+00> : vector<2xf32>
    %428 = vector.multi_reduction <add>, %427, %cst_228 [1] : vector<2x2xf32> to vector<2xf32>
    %429 = vector.shape_cast %428 : vector<2xf32> to vector<2x1xf32>
    %430 = vector.broadcast %424 : vector<2x1xf32> to vector<2x2xf32>
    %431 = arith.subf %419, %430 : vector<2x2xf32>
    %432 = math.exp %431 : vector<2x2xf32>
    %cst_229 = arith.constant dense<0.000000e+00> : vector<2xf32>
    %433 = vector.multi_reduction <add>, %432, %cst_229 [1] : vector<2x2xf32> to vector<2xf32>
    %434 = vector.shape_cast %433 : vector<2xf32> to vector<2x1xf32>
    %435 = arith.addf %429, %434 : vector<2x1xf32>
    %436 = vector.broadcast %424 : vector<2x1xf32> to vector<2x2xf32>
    %437 = arith.subf %399, %436 : vector<2x2xf32>
    %438 = math.exp %437 : vector<2x2xf32>
    %439 = arith.mulf %438, %414 : vector<2x2xf32>
    %cst_230 = arith.constant dense<0.000000e+00> : vector<2xf32>
    %440 = vector.multi_reduction <add>, %439, %cst_230 [1] : vector<2x2xf32> to vector<2xf32>
    %441 = vector.shape_cast %440 : vector<2xf32> to vector<2x1xf32>
    %442 = math.log %435 : vector<2x1xf32>
    %443 = math.log %441 : vector<2x1xf32>
    %444 = arith.subf %442, %443 : vector<2x1xf32>
    %cst_231 = arith.constant dense<0.000000e+00> : vector<1xf32>
    %445 = vector.multi_reduction <add>, %444, %cst_231 [0] : vector<2x1xf32> to vector<1xf32>
    %446 = vector.shape_cast %445 : vector<1xf32> to vector<1x1xf32>
    %cst_232 = arith.constant 2.000000e+00 : f32
    %447 = vector.broadcast %cst_232 : f32 to vector<1x1xf32>
    %448 = arith.divf %446, %447 : vector<1x1xf32>
    %449 = arith.mulf %408, %416 : vector<2x2xf32>
    %cst_233 = arith.constant 8.000000e-01 : f32
    %450 = vector.broadcast %cst_233 : f32 to vector<2x2xf32>
    %451 = arith.mulf %450, %449 : vector<2x2xf32>
    %cst_234 = arith.constant dense<0xFF800000> : vector<2xf32>
    %452 = vector.multi_reduction <maximumf>, %402, %cst_234 [1] : vector<2x2xf32> to vector<2xf32>
    %453 = vector.shape_cast %452 : vector<2xf32> to vector<2x1xf32>
    %cst_235 = arith.constant dense<0xFF800000> : vector<2xf32>
    %454 = vector.multi_reduction <maximumf>, %451, %cst_235 [1] : vector<2x2xf32> to vector<2xf32>
    %455 = vector.shape_cast %454 : vector<2xf32> to vector<2x1xf32>
    %456 = arith.maximumf %453, %455 : vector<2x1xf32>
    %457 = vector.broadcast %456 : vector<2x1xf32> to vector<2x2xf32>
    %458 = arith.subf %402, %457 : vector<2x2xf32>
    %459 = math.exp %458 : vector<2x2xf32>
    %cst_236 = arith.constant dense<0.000000e+00> : vector<2xf32>
    %460 = vector.multi_reduction <add>, %459, %cst_236 [1] : vector<2x2xf32> to vector<2xf32>
    %461 = vector.shape_cast %460 : vector<2xf32> to vector<2x1xf32>
    %462 = vector.broadcast %456 : vector<2x1xf32> to vector<2x2xf32>
    %463 = arith.subf %451, %462 : vector<2x2xf32>
    %464 = math.exp %463 : vector<2x2xf32>
    %cst_237 = arith.constant dense<0.000000e+00> : vector<2xf32>
    %465 = vector.multi_reduction <add>, %464, %cst_237 [1] : vector<2x2xf32> to vector<2xf32>
    %466 = vector.shape_cast %465 : vector<2xf32> to vector<2x1xf32>
    %467 = arith.addf %461, %466 : vector<2x1xf32>
    %468 = vector.broadcast %456 : vector<2x1xf32> to vector<2x2xf32>
    %469 = arith.subf %402, %468 : vector<2x2xf32>
    %470 = math.exp %469 : vector<2x2xf32>
    %471 = arith.mulf %470, %414 : vector<2x2xf32>
    %cst_238 = arith.constant dense<0.000000e+00> : vector<2xf32>
    %472 = vector.multi_reduction <add>, %471, %cst_238 [1] : vector<2x2xf32> to vector<2xf32>
    %473 = vector.shape_cast %472 : vector<2xf32> to vector<2x1xf32>
    %474 = math.log %467 : vector<2x1xf32>
    %475 = math.log %473 : vector<2x1xf32>
    %476 = arith.subf %474, %475 : vector<2x1xf32>
    %cst_239 = arith.constant dense<0.000000e+00> : vector<1xf32>
    %477 = vector.multi_reduction <add>, %476, %cst_239 [0] : vector<2x1xf32> to vector<1xf32>
    %478 = vector.shape_cast %477 : vector<1xf32> to vector<1x1xf32>
    %cst_240 = arith.constant 2.000000e+00 : f32
    %479 = vector.broadcast %cst_240 : f32 to vector<1x1xf32>
    %480 = arith.divf %478, %479 : vector<1x1xf32>
    %481 = arith.addf %448, %480 : vector<1x1xf32>
    %cst_241 = arith.constant 5.000000e-01 : f32
    %482 = vector.broadcast %cst_241 : f32 to vector<1x1xf32>
    %483 = arith.mulf %481, %482 : vector<1x1xf32>
    %cst_242 = arith.constant dense<0xFF800000> : vector<2xf32>
    %484 = vector.multi_reduction <maximumf>, %380, %cst_242 [1] : vector<2x3xf32> to vector<2xf32>
    %485 = vector.shape_cast %484 : vector<2xf32> to vector<2x1xf32>
    %486 = vector.broadcast %485 : vector<2x1xf32> to vector<2x3xf32>
    %487 = arith.subf %380, %486 : vector<2x3xf32>
    %488 = math.exp %487 : vector<2x3xf32>
    %cst_243 = arith.constant dense<0.000000e+00> : vector<2xf32>
    %489 = vector.multi_reduction <add>, %488, %cst_243 [1] : vector<2x3xf32> to vector<2xf32>
    %490 = vector.shape_cast %489 : vector<2xf32> to vector<2x1xf32>
    %491 = math.log %490 : vector<2x1xf32>
    %492 = arith.addf %491, %485 : vector<2x1xf32>
    %493 = vector.broadcast %492 : vector<2x1xf32> to vector<2x3xf32>
    %494 = arith.subf %380, %493 : vector<2x3xf32>
    %495 = vector.broadcast %483 : vector<1x1xf32> to vector<2x3xf32>
    %496 = arith.addf %494, %495 : vector<2x3xf32>
    %c0_244 = arith.constant 0 : index
    %c0_245 = arith.constant 0 : index
    %497 = vector.load %arg48[%c0_244, %c0_245] : memref<2x3xf32, #tpu.memory_space<vmem>>, vector<2x3xf32>
    tpu.vector_store %arg48[%c0_244, %c0_245], %496 {strides = array<i32>} : memref<2x3xf32, #tpu.memory_space<vmem>>, vector<2x3xf32>,
    return
  }
}

</mosaic_0001>

<bundles_post_ra>
// kernel: tpu_custom_call.1
= control target key start
LH: loop header
LB: loop body
LE: loop exit
PB: predicated region body
PF: predicated region fallthrough
CT: control target
= control target key end

     0   :  { %s6481_s6 = smov 1   ;;  %s6482_s10 = smov 2   ;;  %s7620_s0 = inlined_call_operand.smem [shape: u32[49], index: -1, kind: input, shape index: {}] }
   0x1   :  { %s6536_s5 = sld [smem:[%s7620_s0]]   ;;  %s6483_s14 = smov 3  }
   0x2   :  { %s6541_s9 = sld [smem:[%s7620_s0 + %s6481_s6]]   ;;  %s6484_s18 = smov 4  }
   0x3   :  { %s6546_s13 = sld [smem:[%s7620_s0 + %s6482_s10]]   ;;  %s6485_s22 = smov 5  }
   0x4   :  { %s6551_s17 = sld [smem:[%s7620_s0 + %s6483_s14]]   ;;  %s6486_s26 = smov 6  }
   0x5   :  { %s6556_s21 = sld [smem:[%s7620_s0 + %s6484_s18]]   ;;  %s6487_s30 = smov 7  }
   0x6   :  { %s6561_s25 = sld [smem:[%s7620_s0 + %s6485_s22]]   ;;  %s6488_s4 = smov 8  }
   0x7   :  { %s6566_s29 = sld [smem:[%s7620_s0 + %s6486_s26]]   ;;  %s6489_s10 = smov 9  }
   0x8   :  { %s6571_s3 = sld [smem:[%s7620_s0 + %s6487_s30]]   ;;  %s6490_s15 = smov 10  }
   0x9   :  { %7647 = sst [smem:[#allocation9_spill]] %s6546_s13  ;;  %s6491_s20 = smov 11  }
   0xa   :  { %7648 = sst [smem:[#allocation10_spill]] %s6551_s17  ;;  %s6492_s26 = smov 12  }
   0xb   :  { %s6576_s8 = sld [smem:[%s7620_s0 + %s6488_s4]]   ;;  %s6493_s1 = smov 13  }
   0xc   :  { %s6581_s14 = sld [smem:[%s7620_s0 + %s6489_s10]]   ;;  %s6494_s7 = smov 14  }
   0xd   :  { %7649 = sst [smem:[#allocation11_spill]] %s6566_s29  ;;  %s6496_s22 = smov 16  }
   0xe   :  { %7650 = sst [smem:[#allocation12_spill]] %s6571_s3  ;;  %s6497_s28 = smov 17  }
   0xf   :  { %s6586_s19 = sld [smem:[%s7620_s0 + %s6490_s15]]   ;;  %s6495_s15 = smov 15  }
  0x10   :  { %s6591_s24 = sld [smem:[%s7620_s0 + %s6491_s20]]   ;;  %s6499_s16 = smov 19  }
  0x11   :  { %7651 = sst [smem:[#allocation13_spill]] %s6576_s8  ;;  %s6500_s23 = smov 20  }
  0x12   :  { %7652 = sst [smem:[#allocation14_spill]] %s6581_s14  ;;  %s6502_s10 = smov 25  }
  0x13   :  { %s6596_s30 = sld [smem:[%s7620_s0 + %s6492_s26]]  }
  0x14   :  { %s6601_s6 = sld [smem:[%s7620_s0 + %s6493_s1]]   ;;  %s6501_s1 = smov 24  }
  0x15   :  { %7653 = sst [smem:[#allocation15_spill]] %s6586_s19 }
  0x16   :  { %7654 = sst [smem:[#allocation16_spill]] %s6591_s24 }
  0x17   :  { %s6606_s12 = sld [smem:[%s7620_s0 + %s6494_s7]]   ;;  %s6498_s7 = smov 18  }
  0x18   :  { %s6611_s20 = sld [smem:[%s7620_s0 + %s6495_s15]]   ;;  %s6507_s15 = smov 30  }
  0x19   :  { %7655 = sst [smem:[#allocation17_spill]] %s6596_s30 }
  0x1a   :  { %7656 = sst [smem:[#allocation18_spill]] %s6601_s6 }
  0x1b   :  { %s6616_s27 = sld [smem:[%s7620_s0 + %s6496_s22]]  }
  0x1c   :  { %s6621_s4 = sld [smem:[%s7620_s0 + %s6497_s28]]  }
  0x1d   :  { %7657 = sst [smem:[#allocation19_spill]] %s6606_s12 }
  0x1e   :  { %7658 = sst [smem:[#allocation20_spill]] %s6611_s20 }
  0x1f   :  { %s5350_s30 = sld [smem:[%s7620_s0 + %s6498_s7]]  }
  0x20   :  { %s6629_s20 = sld [smem:[%s7620_s0 + %s6499_s16]]   ;;  %s6503_s16 = smov 26  }
  0x21   :  { %7659 = sst [smem:[#allocation21_spill]] %s6616_s27 }
  0x22   :  { %7660 = sst [smem:[#allocation22_spill]] %s6621_s4 }
  0x23   :  { %s6634_s27 = sld [smem:[%s7620_s0 + %s6500_s23]]   ;;  %s6504_s23 = smov 27  }
  0x24   :  { %s6639_s4 = sld [smem:[%s7620_s0 + %s6501_s1]]   ;;  %s6505_s1 = smov 28  }
  0x25   :  { %s6644_s6 = sld [smem:[%s7620_s0 + %s6502_s10]]   ;;  %v102_v0 = vstv %s5350_s30  ;;  %s6506_s10 = smov 29  }
  0x26   :  { %7661 = sst [smem:[#allocation23_spill]] %s6629_s20  ;;  %103 = vst [vmem:[#allocation2] sm:$0x1] %v102_v0  ;;  %s6508_s30 = smov 31  }
  0x27   :  { %s6649_s12 = sld [smem:[%s7620_s0 + %s6503_s16]]  }
  0x28   :  { %s6654_s20 = sld [smem:[%s7620_s0 + %s6504_s23]]  }
  0x29   :  { %7662 = sst [smem:[#allocation24_spill]] %s6634_s27 }
  0x2a   :  { %7663 = sst [smem:[#allocation25_spill]] %s6639_s4  ;;  %s6510_s4 = smov 33  }
  0x2b   :  { %7664 = sst [smem:[#allocation26_spill]] %s6644_s6 }
  0x2c   :  { %s6659_s7 = sld [smem:[%s7620_s0 + %s6505_s1]]   ;;  %s6509_s1 = smov 32  }
  0x2d   :  { %7665 = sst [smem:[#allocation27_spill]] %s6649_s12  ;;  %s6511_s12 = smov 34  }
  0x2e   :  { %7666 = sst [smem:[#allocation28_spill]] %s6654_s20 }
  0x2f   :  { %s6664_s16 = sld [smem:[%s7620_s0 + %s6506_s10]]  }
  0x30   :  { %s6669_s23 = sld [smem:[%s7620_s0 + %s6507_s15]]  }
  0x31   :  { %s6674_s28 = sld [smem:[%s7620_s0 + %s6508_s30]]   ;;  %s6512_s30 = smov 35  }
  0x32   :  { %7667 = sst [smem:[#allocation29_spill]] %s6659_s7  ;;  %s6513_s7 = smov 36  }
  0x33   :  { %s6679_s20 = sld [smem:[%s7620_s0 + %s6509_s1]]  }
  0x34   :  { %s6689_s6 = sld [smem:[%s7620_s0 + %s6511_s12]]   ;;  %s6515_s12 = smov 38  }
  0x35   :  { %7668 = sst [smem:[#allocation30_spill]] %s6664_s16 }
  0x36   :  { %s6684_s16 = sld [smem:[%s7620_s0 + %s6510_s4]]   ;;  %s6514_s4 = smov 37  }
  0x37   :  { %s6694_s27 = sld [smem:[%s7620_s0 + %s6512_s30]]   ;;  %s6516_s30 = smov 39  }
  0x38   :  { %s6699_s14 = sld [smem:[%s7620_s0 + %s6513_s7]]   ;;  %s6517_s7 = smov 40  }
  0x39   :  { %s6704_s19 = sld [smem:[%s7620_s0 + %s6514_s4]]   ;;  %s6518_s4 = smov 41  }
  0x3a   :  { %s6709_s24 = sld [smem:[%s7620_s0 + %s6515_s12]]   ;;  %s6519_s12 = smov 43  }
  0x3b   :  { %s6714_s29 = sld [smem:[%s7620_s0 + %s6516_s30]]   ;;  %s6520_s30 = smov 44  }
  0x3c   :  { %s6719_s3 = sld [smem:[%s7620_s0 + %s6517_s7]]   ;;  %s6521_s7 = smov 48  }
  0x3d   :  { %s6724_s8 = sld [smem:[%s7620_s0 + %s6518_s4]]   ;;  %s6522_s4 = smov 42  }
  0x3e   :  { %s6729_s13 = sld [smem:[%s7620_s0 + %s6519_s12]]  }
  0x3f   :  { %s6739_s17 = sld [smem:[%s7620_s0 + %s6521_s7]]  }
  0x41   :  { %7669 = sst [smem:[#allocation31_spill]] %s6714_s29 }
  0x42   :  { %7670 = sst [smem:[#allocation32_spill]] %s6719_s3 }
  0x43   :  { %s6734_s29 = sld [smem:[%s7620_s0 + %s6520_s30]]  }
  0x44   :  { %s5372_s3 = sld [smem:[%s7620_s0 + %s6522_s4]]  }
  0x4a   :  { %v106_v1 = vstv %s5372_s3 }
  0x4b   :  { %107 = vst [vmem:[#allocation4] sm:$0x1] %v106_v1 }
  0x4c   :  { %v222_v2 = vld [vmem:[%s6536_s5 + $0x8] sm:$0xff]  ;;  %v221_v3 = vld [vmem:[%s6536_s5] sm:$0xff]  ;;  %vm225_vm0 = vcmask 130048  }
  0x4d   :  { %v6747_v4 = vld [vmem:[%s6541_s9] sm:$0xff]  ;;  %5798 = vmatprep.subr.mxu0 %v222_v2 }
  0x4e   :  { %5802 = vmatprep.mubr.msk.f32.mxu0 %vm225_vm0, %v6747_v4  ;;  %v307_v5 = vsel %vm225_vm0, %v6747_v4, 0.0 }
  0x4f   :  { %110 = vsyncpa [#allocation7], 0  ;;  %5799 = vmatpush3.msra.mxu0 %v222_v2  ;;  %v6754_v6 = vld [vmem:[%s6541_s9 + $0x8] sm:$0xff]  ;;  %308 = vadd.xlane.f32.xlu0 %v307_v5  ;;  %v321_v9 = vld [vmem:[%s6679_s20] sm:$0xff]  ;;  %v6523_v22 = vmov 0.0   ;;  %vm6524_vm1 = vmmov 0   ;;  %v210_v49 = vlaneseq }
  0x50   :  { %5800 = vmatprep.subr.mxu0 %v221_v3  ;;  %v310_v7 = vsel %vm225_vm0, %v6754_v6, 0.0  ;;  %5809 = vmatprep.mubr.msk.f32.mxu1 %vm225_vm0, %v221_v3  ;;  %v322_v8 = vld [vmem:[%s6679_s20 + $0x8] sm:$0xff]  ;;  %v319_v11 = vld [vmem:[%s6674_s28] sm:$0xff]  ;;  %v661_v35 = vld [vmem:[%s6694_s27 + $0x18] sm:$0xff]  ;;  %vm662_vm2 = vcmask 261120   ;;  %v6525_v57 = vmov 1.0  }
  0x51   :  { %5801 = vmatpush3.msra.mxu0 %v221_v3  ;;  %5805 = vmatprep.subr.mxu1 %v322_v8  ;;  %v320_v10 = vld [vmem:[%s6674_s28 + $0x8] sm:$0xff]  ;;  %v5383_v25 = vld [vmem:[%s6669_s23] ss:$0 sm:$0xff]  ;;  %v660_v36 = vld [vmem:[%s6694_s27 + $0x10] sm:$0xff]  ;;  %v6808_v50 = vshrl.u32 %v210_v49, 7  ;;  %v6813_v52 = vand.u32 127, %v210_v49 }
  0x52   :  { %5803 = vmatmul.mubr.msk.f32.vlgmr.msra.gmra.mxu0 %vm225_vm0, %v6754_v6  ;;  %5806 = vmatpush3.msra.mxu1 %v322_v8  ;;  %v6781_v34 = vld [vmem:[%s6556_s21] sm:$0x3]  ;;  %v657_v37 = vld [vmem:[%s6689_s6 + $0x18] sm:$0xff]  ;;  %v659_v38 = vld [vmem:[%s6694_s27 + $0x8] sm:$0xff]  ;;  %s7671_s0 = sld [smem:[#allocation32_spill]]  ;;  %s6527_s7 = smov [#allocation6]  }
  0x53   :  { %311 = vadd.xlane.f32.xlu0 %v310_v7  ;;  %5807 = vmatprep.subr.mxu1 %v321_v9  ;;  %v658_v39 = vld [vmem:[%s6694_s27] sm:$0xff]  ;;  %v656_v40 = vld [vmem:[%s6689_s6 + $0x10] sm:$0xff]  ;;  %v655_v41 = vld [vmem:[%s6689_s6 + $0x8] sm:$0xff]  ;;  %v6811_v51 = vadd.s32 24, %v6808_v50  ;;  %v6819_v54 = vadd.s32 16, %v6808_v50  ;;  %v6827_v56 = vadd.s32 8, %v6808_v50  ;;  %vm7637_vm10 = vcmp.eq.s32.totalorder %v6813_v52, %v6808_v50 }
  0x54   :  { %5812 = vmatprep.subr.mxu0 %v320_v10  ;;  %5808 = vmatpush3.msra.mxu1 %v321_v9  ;;  %v654_v42 = vld [vmem:[%s6689_s6] sm:$0xff]  ;;  %v6847_v59 = vadd.s32 32, %v6808_v50  ;;  %v1146_v9 = vld [vmem:[%s6734_s29 + $0x18] sm:$0xff]  ;;  %vm215_vm12 = vcmp.eq.s32.totalorder %v6808_v50, %v6813_v52  ;;  %s7672_s5 = sld [smem:[#allocation10_spill]]  ;;  %s5325_s1 = sshll.u32 %s6527_s7, 4  ;;  %s5326_s1 = int_to_ptr.vmem [resolvable:$true] %s5325_s1 }
  0x55   :  { %5813 = vmatpush3.msra.mxu0 %v320_v10  ;;  %5810 = vmatmul.mubr.msk.f32.vlgmr.msra.gmra.mxu1 %vm225_vm0, %v222_v2  ;;  %v6816_v53 = vadd.s32 32, %v6811_v51  ;;  %v6824_v55 = vadd.s32 32, %v6819_v54  ;;  %v6837_v58 = vadd.s32 32, %v6827_v56  ;;  %v5391_v62 = vld [vmem:[%s6684_s16] ss:$0 sm:$0xff]  ;;  %vm7640_vm7 = vcmp.eq.s32.totalorder %v6813_v52, %v6811_v51  ;;  %v1145_v10 = vld [vmem:[%s6734_s29 + $0x10] sm:$0xff]  ;;  %p6464_p1 = scmp.lt.s32.totalorder %s5326_s1, %s5326_s1 }
  0x56   :  { %5814 = vmatprep.subr.mxu0 %v319_v11  ;;  %5819 = vmatprep.subr.mxu1 %v6523_v22  ;;  %vm7641_vm6 = vcmp.eq.s32.totalorder %v6813_v52, %v6847_v59  ;;  %vm7639_vm8 = vcmp.eq.s32.totalorder %v6813_v52, %v6819_v54  ;;  %vm7638_vm9 = vcmp.eq.s32.totalorder %v6813_v52, %v6827_v56  ;;  %s7673_s9 = sld [smem:[#allocation31_spill]]  ;;  %s6459_s2 = scalar_lea.vmem %s5326_s1, 32 }
  0x57   :  { %5815 = vmatpush3.msra.mxu0 %v319_v11  ;;  %5823 = vmatprep.mubr.msk.f32.mxu1 %vm6524_vm1, %v6523_v22  ;;  %vm913_vm3 = vcmp.eq.s32.totalorder %v6813_v52, %v6816_v53  ;;  %vm912_vm4 = vcmp.eq.s32.totalorder %v6813_v52, %v6824_v55  ;;  %vm911_vm5 = vcmp.eq.s32.totalorder %v6813_v52, %v6837_v58  ;;  %v1144_v11 = vld [vmem:[%s6734_s29 + $0x8] sm:$0xff]  ;;  %s7677_s3 = sld [smem:[#allocation11_spill]]  ;;  %p6460_p0 = scmp.ne.s32.totalorder %s5326_s1, %s6459_s2 }
  0x58   :  { %vm216_vm11 = vcmp.eq.s32.totalorder %v6827_v56, %v6813_v52  ;;  %vm1501_vm13 = vcmp.lt.s32.totalorder %v6813_v52, %v6827_v56  ;;  %s7688_s6 = sld [smem:[#allocation19_spill]]  ;;  %p6465_p2 = scmp.lt.s32.totalorder %s6459_s2, %s6459_s2 }
  0x59   :  { %s7689_s20 = sld [smem:[#allocation18_spill]] }
  0x5a   :  { %s7690_s27 = sld [smem:[#allocation17_spill]]  ;;  %p6466_p3 = por %p6465_p2, %p6464_p1 }
  0x5b   :  { %s7692_s16 = sld [smem:[#allocation22_spill]] }
  0x5c   :  { %s7693_s23 = sld [smem:[#allocation21_spill]]  ;;  %p6467_p4 = pnand %p6466_p3, %p6460_p0 }
  0x5d   :  { %s7695_s28 = sld [smem:[#allocation20_spill]] }
  0x5e   :  { %s7699_s12 = sld [smem:[#allocation26_spill]] }
  0x5f   :  { %s7700_s15 = sld [smem:[#allocation28_spill]] }
  0x60   :  { %s7701_s18 = sld [smem:[#allocation25_spill]] }
  0x61   :  { %s7702_s30 = sld [smem:[#allocation30_spill]] }
  0x62   :  { %s7703_s22 = sld [smem:[#allocation27_spill]] }
  0x63   :  { %s7704_s26 = sld [smem:[#allocation29_spill]] }
  0xd8   :  { %v309_v12 = vpop.xlane.xlu0 %308 }
  0xd9   :  { %v313_v15 = vmax.f32 %v309_v12, 1.0  ;;  %v1143_v12 = vld [vmem:[%s6734_s29] sm:$0xff]  ;;  %s7676_s29 = sld [smem:[#allocation12_spill]] }
  0xdc   :  { %v312_v13 = vpop.xlane.xlu0 %311 }
  0xdd   :  { %v314_v14 = vmax.f32 %v312_v13, 1.0 }
  0xdf   :  { %6410 = vrcp.f32 %v314_v14 }
  0xe0   :  { %6412 = vrcp.f32 %v313_v15 }
  0xec   :  { %v6766_v17 = vpop.eup %6410 }
  0xed   :  { %v6768_v18 = vpop.eup %6412 }
 0x112   :  { %v5804_v16 = vpop.f32.mrf.mxu0 }
 0x113   :  { %v318_v21 = vmul.f32 %v6766_v17, %v5804_v16 }
 0x114   :  { %v298_v19 = vpop.f32.mrf.mxu0 }
 0x115   :  { %v317_v20 = vmul.f32 %v6768_v18, %v298_v19  ;;  %v5811_v23 = vpop.f32.mrf.mxu1  ;;  %v1140_v19 = vld [vmem:[%s6729_s13 + $0x8] sm:$0xff] }
 0x117   :  { %5816 = vmatprep.mubr.msk.f32.mxu0 %vm225_vm0, %v317_v20  ;;  %v395_v27 = vpop.f32.mrf.mxu1  ;;  %v1139_v20 = vld [vmem:[%s6729_s13] sm:$0xff] }
 0x118   :  { %5817 = vmatmul.mubr.msk.f32.vlgmr.msra.gmra.mxu0 %vm225_vm0, %v318_v21 }
 0x119   :  { %5830 = vmatprep.mubr.msk.f32.mxu0 %vm225_vm0, %v6747_v4 }
 0x1d8   :  { %v5818_v24 = vpop.f32.mrf.mxu0 }
 0x1d9   :  { %v482_v26 = vadd.f32 %v5818_v24, %v5811_v23 }
 0x1da   :  { %v476_v28 = vpop.f32.mrf.mxu0 }
 0x1db   :  { %v493_v29 = vadd.f32 %v5383_v25, %v482_v26  ;;  %v477_v30 = vadd.f32 %v476_v28, %v395_v27  ;;  %v6526_v26 = vmov 0  }
 0x1dc   :  { %6408 = vset.pattern.permute.xlu1 %v6526_v26  ;;  %6409 = vset.pattern.permute.xlu0 %v6526_v26  ;;  %v1719_v26 = vld [vmem:[%s6709_s24 + $0x18] sm:$0xff] }
 0x1dd   :  { %v495_v31 = vmax.f32 %v493_v29, 0.0  ;;  %v492_v32 = vadd.f32 %v5383_v25, %v477_v30  ;;  %v5409_v29 = vld [vmem:[#allocation4] ss:$0 sm:$0xff] }
 0x1df   :  { %v494_v33 = vmax.f32 %v492_v32, 0.0  ;;  %5820 = vmatpush3.msra.mxu1 %v495_v31  ;;  %5826 = vmatprep.subr.mxu0 %v495_v31 }
 0x1e0   :  { %5821 = vmatprep.subr.mxu1 %v6523_v22  ;;  %5827 = vmatpush3.msra.mxu0 %v495_v31 }
 0x1e1   :  { %5822 = vmatpush3.msra.mxu1 %v494_v33  ;;  %5828 = vmatprep.subr.mxu0 %v494_v33 }
 0x1e2   :  { %5824 = vmatmul.mubr.msk.f32.vlgmr.msra.gmra.mxu1 %vm225_vm0, %v6781_v34  ;;  %5829 = vmatpush3.msra.mxu0 %v494_v33 }
 0x1e3   :  { %5833 = vmatprep.subr.mxu1 %v661_v35  ;;  %5831 = vmatmul.mubr.msk.f32.vlgmr.msra.gmra.mxu0 %vm225_vm0, %v6754_v6 }
 0x1e4   :  { %5834 = vmatpush3.msra.mxu1 %v661_v35  ;;  %5841 = vmatprep.mubr.msk.f32.mxu1 %vm662_vm2, %v494_v33 }
 0x1e5   :  { %5835 = vmatprep.subr.mxu1 %v660_v36  ;;  %5844 = vmatprep.subr.mxu0 %v657_v37 }
 0x1e6   :  { %5836 = vmatpush3.msra.mxu1 %v660_v36  ;;  %5845 = vmatpush3.msra.mxu0 %v657_v37 }
 0x1e7   :  { %5837 = vmatprep.subr.mxu1 %v659_v38  ;;  %5846 = vmatprep.subr.mxu0 %v656_v40 }
 0x1e8   :  { %5838 = vmatpush3.msra.mxu1 %v659_v38  ;;  %5847 = vmatpush3.msra.mxu0 %v656_v40  ;;  %v208_v40 = vld [vmem:[%s6561_s25] sm:$0xff] }
 0x1e9   :  { %5839 = vmatprep.subr.mxu1 %v658_v39  ;;  %5848 = vmatprep.subr.mxu0 %v655_v41 }
 0x1ea   :  { %5840 = vmatpush3.msra.mxu1 %v658_v39  ;;  %5849 = vmatpush3.msra.mxu0 %v655_v41 }
 0x1eb   :  { %5842 = vmatmul.mubr.msk.f32.vlgmr.msra.gmra.mxu1 %vm662_vm2, %v495_v31  ;;  %5855 = vmatprep.subr.mxu1 %v6523_v22 }
 0x1ec   :  { %5859 = vmatprep.mubr.msk.f32.mxu1 %vm6524_vm1, %v6523_v22  ;;  %5850 = vmatprep.subr.mxu0 %v654_v42 }
 0x1ed   :  { %5851 = vmatpush3.msra.mxu0 %v654_v42 }
 0x1ee   :  { %5862 = vmatprep.subr.mxu0 %v6523_v22 }
 0x2a2   :  { %v565_v43 = vpop.f32.mrf.mxu1 }
 0x2a3   :  { %v5832_v44 = vpop.f32.mrf.mxu0 }
 0x2a4   :  { %v5825_v45 = vpop.f32.mrf.mxu1  ;;  %v653_v48 = vmul.f32 %v6766_v17, %v5832_v44  ;;  %v1142_v17 = vld [vmem:[%s6729_s13 + $0x18] sm:$0xff]  ;;  %v6963_v44 = vsel %vm216_vm11, 1.0, %v6523_v22 }
 0x2a5   :  { %v643_v46 = vpop.f32.mrf.mxu0 }
 0x2a6   :  { %v652_v47 = vmul.f32 %v6768_v18, %v643_v46  ;;  %v1141_v18 = vld [vmem:[%s6729_s13 + $0x10] sm:$0xff]  ;;  %s7674_s13 = sld [smem:[#allocation9_spill]] }
 0x2a8   :  { %5852 = vmatprep.mubr.msk.f32.mxu0 %vm662_vm2, %v652_v47  ;;  %v6970_v47 = vsel %vm215_vm12, 1.0, %v6523_v22 }
 0x2a9   :  { %5853 = vmatmul.mubr.msk.f32.vlgmr.msra.gmra.mxu0 %vm662_vm2, %v653_v48 }
 0x2aa   :  { %5870 = vmatprep.mubr.msk.f32.mxu0 %vm6524_vm1, %v6523_v22  ;;  %5863 = vmatpush3.msk.msra.mxu0 %vm913_vm3, %v6525_v57 }
 0x2ab   :  { %5864 = vmatprep.subr.mxu0 %v6523_v22  ;;  %v5843_v60 = vpop.f32.mrf.mxu1 }
 0x2ac   :  { %5865 = vmatpush3.msk.msra.mxu0 %vm912_vm4, %v6525_v57 }
 0x2ad   :  { %5866 = vmatprep.subr.mxu0 %v6523_v22  ;;  %v735_v0 = vpop.f32.mrf.mxu1 }
 0x2ae   :  { %5867 = vmatpush3.msk.msra.mxu0 %vm911_vm5, %v6525_v57 }
 0x2af   :  { %5868 = vmatprep.subr.mxu0 %v6523_v22 }
 0x2b0   :  { %5869 = vmatpush3.msk.msra.mxu0 %vm7641_vm6, %v6525_v57 }
 0x369   :  { %v5854_v61 = vpop.f32.mrf.mxu0 }
 0x36a   :  { %v822_v63 = vadd.f32 %v5854_v61, %v5843_v60  ;;  %v209_v60 = vld [vmem:[%s6561_s25 + $0x8] sm:$0xff]  ;;  %s7675_s25 = sld [smem:[#allocation13_spill]] }
 0x36b   :  { %v816_v1 = vpop.f32.mrf.mxu0 }
 0x36c   :  { %v833_v2 = vadd.f32 %v5391_v62, %v822_v63  ;;  %v817_v3 = vadd.f32 %v816_v1, %v735_v0 }
 0x36e   :  { %v6861_v5 = vmax.f32 %v833_v2, 0.0  ;;  %v832_v7 = vadd.f32 %v5391_v62, %v817_v3 }
 0x370   :  { %v6863_v8 = vmax.f32 %v832_v7, 0.0  ;;  %5856 = vmatpush3.msra.mxu1 %v6861_v5  ;;  %5884 = vmatprep.subr.mxu0 %v6861_v5 }
 0x371   :  { %5857 = vmatprep.subr.mxu1 %v6523_v22 }
 0x372   :  { %5858 = vmatpush3.msra.mxu1 %v6863_v8 }
 0x373   :  { %5860 = vmatmul.mubr.msk.f32.vlgmr.msra.gmra.mxu1 %vm225_vm0, %v6781_v34  ;;  %5873 = vmatprep.subr.mxu1 %v6523_v22 }
 0x374   :  { %5874 = vmatpush3.msk.msra.mxu1 %vm7640_vm7, %v6525_v57  ;;  %5881 = vmatprep.mubr.msk.f32.mxu1 %vm6524_vm1, %v6523_v22 }
 0x375   :  { %5875 = vmatprep.subr.mxu1 %v6523_v22 }
 0x376   :  { %5876 = vmatpush3.msk.msra.mxu1 %vm7639_vm8, %v6525_v57 }
 0x377   :  { %5877 = vmatprep.subr.mxu1 %v6523_v22 }
 0x378   :  { %5878 = vmatpush3.msk.msra.mxu1 %vm7638_vm9, %v6525_v57 }
 0x379   :  { %5879 = vmatprep.subr.mxu1 %v6523_v22 }
 0x37a   :  { %5880 = vmatpush3.msk.msra.mxu1 %vm7637_vm10, %v6525_v57 }
 0x37b   :  { %5882 = vmatmul.mubr.msk.f32.vlgmr.msra.gmra.mxu1 %vm662_vm2, %v565_v43  ;;  %5891 = vmatprep.subr.mxu1 %v1146_v9 }
 0x37c   :  { %5892 = vmatpush3.msra.mxu1 %v1146_v9  ;;  %5899 = vmatprep.mubr.msk.f32.mxu1 %vm662_vm2, %v6863_v8 }
 0x37d   :  { %5893 = vmatprep.subr.mxu1 %v1145_v10 }
 0x37e   :  { %5894 = vmatpush3.msra.mxu1 %v1145_v10 }
 0x37f   :  { %5895 = vmatprep.subr.mxu1 %v1144_v11 }
 0x380   :  { %5896 = vmatpush3.msra.mxu1 %v1144_v11 }
 0x381   :  { %5897 = vmatprep.subr.mxu1 %v1143_v12 }
 0x382   :  { %5898 = vmatpush3.msra.mxu1 %v1143_v12 }
 0x383   :  { %5900 = vmatmul.mubr.msk.f32.vlgmr.msra.gmra.mxu1 %vm662_vm2, %v6861_v5 }
 0x384   :  { %5917 = vmatprep.mubr.msk.f32.mxu1 %vm225_vm0, %v6525_v57 }
 0x433   :  { %v902_v13 = vpop.f32.mrf.mxu1 }
 0x434   :  { %5871 = vmatmul.mubr.msk.f32.vlgmr.msra.gmra.mxu0 %vm662_vm2, %v902_v13 }
 0x435   :  { %5885 = vmatpush3.msra.mxu0 %v6861_v5  ;;  %v5861_v14 = vpop.f32.mrf.mxu1  ;;  %5888 = vmatprep.mubr.msk.f32.mxu0 %vm225_vm0, %v6747_v4 }
 0x436   :  { %5886 = vmatprep.subr.mxu0 %v6863_v8 }
 0x437   :  { %5887 = vmatpush3.msra.mxu0 %v6863_v8 }
 0x438   :  { %5889 = vmatmul.mubr.msk.f32.vlgmr.msra.gmra.mxu0 %vm225_vm0, %v6754_v6  ;;  %5902 = vmatprep.subr.mxu0 %v1142_v17 }
 0x439   :  { %5903 = vmatpush3.msra.mxu0 %v1142_v17 }
 0x43a   :  { %5904 = vmatprep.subr.mxu0 %v1141_v18 }
 0x43b   :  { %v6920_v15 = vpop.f32.mrf.mxu1  ;;  %5905 = vmatpush3.msra.mxu0 %v1141_v18 }
 0x43c   :  { %5906 = vmatprep.subr.mxu0 %v1140_v19 }
 0x43d   :  { %v5883_v16 = vpop.f32.mrf.mxu1  ;;  %5907 = vmatpush3.msra.mxu0 %v1140_v19 }
 0x43e   :  { %5908 = vmatprep.subr.mxu0 %v1139_v20 }
 0x43f   :  { %5909 = vmatpush3.msra.mxu0 %v1139_v20 }
 0x440   :  { %5920 = vmatprep.subr.msk.mxu0 %vm216_vm11, %v6525_v57 }
 0x443   :  { %v5901_v27 = vpop.f32.mrf.mxu1 }
 0x445   :  { %v1219_v31 = vpop.f32.mrf.mxu1 }
 0x4f4   :  { %v6932_v21 = vpop.f32.mrf.mxu0 }
 0x4f6   :  { %v5872_v23 = vpop.f32.mrf.mxu0 }
 0x4f8   :  { %v5890_v24 = vpop.f32.mrf.mxu0 }
 0x4fa   :  { %v1130_v25 = vpop.f32.mrf.mxu0 }
 0x4fb   :  { %5910 = vmatprep.mubr.msk.f32.mxu0 %vm662_vm2, %v1130_v25 }
 0x4fc   :  { %5911 = vmatmul.mubr.msk.f32.vlgmr.msra.gmra.mxu0 %vm662_vm2, %v5890_v24 }
 0x4fd   :  { %5921 = vmatpush3.msk.msra.mxu0 %vm216_vm11, %v6525_v57  ;;  %5924 = vmatprep.mubr.msk.f32.mxu0 %vm225_vm0, %v6525_v57  ;;  %vm1500_vm11 = vcmp.lt.s32.totalorder %v6813_v52, %v6808_v50 }
 0x4fe   :  { %5922 = vmatprep.subr.msk.mxu0 %vm215_vm12, %v6525_v57 }
 0x4ff   :  { %5923 = vmatpush3.msk.msra.mxu0 %vm215_vm12, %v6525_v57 }
 0x500   :  { %5925 = vmatmul.mubr.msk.f32.vlgmr.msra.gmra.mxu0 %vm225_vm0, %v6525_v57 }
 0x5bc   :  { %v5912_v28 = vpop.f32.mrf.mxu0 }
 0x5bd   :  { %v1306_v30 = vadd.f32 %v5912_v28, %v5901_v27  ;;  %v1718_v28 = vld [vmem:[%s6709_s24 + $0x10] sm:$0xff] }
 0x5be   :  { %v1300_v32 = vpop.f32.mrf.mxu0 }
 0x5bf   :  { %v1317_v33 = vadd.f32 %v5409_v29, %v1306_v30  ;;  %v1301_v35 = vadd.f32 %v1300_v32, %v1219_v31  ;;  %v1717_v30 = vld [vmem:[%s6709_s24 + $0x8] sm:$0xff] }
 0x5c0   :  { %v5926_v39 = vpop.f32.mrf.mxu0 }
 0x5c1   :  { %6414 = vtanh.f32 %v1317_v33  ;;  %v1316_v36 = vadd.f32 %v5409_v29, %v1301_v35  ;;  %v6978_v61 = vmul.f32 %v5926_v39, %v209_v60 }
 0x5c2   :  { %v1479_v41 = vpop.f32.mrf.mxu0 }
 0x5c3   :  { %6416 = vtanh.f32 %v1316_v36  ;;  %v6955_v42 = vmul.f32 %v1479_v41, %v208_v40  ;;  %v1493_v62 = vsel %vm225_vm0, %v6978_v61, 0.0  ;;  %v1715_v40 = vld [vmem:[%s6704_s19 + $0x18] sm:$0xff]  ;;  %v1713_v41 = vld [vmem:[%s6704_s19 + $0x8] sm:$0xff] }
 0x5c4   :  { %1494 = vadd.xlane.f32.xlu0 %v1493_v62 }
 0x5c5   :  { %v1490_v43 = vsel %vm225_vm0, %v6955_v42, 0.0 }
 0x5ce   :  { %v6415_v37 = vpop.eup %6414 }
 0x5cf   :  { %1330 = vperm.xlu1 %6408, %v6415_v37  }
 0x5d0   :  { %v6417_v38 = vpop.eup %6416 }
 0x5d3   :  { %1325 = vperm.xlu1 %6408, %v6417_v38  }
 0x5f7   :  { %1491 = vadd.xlane.f32.xlu1 %v1490_v43  ;;  %v1712_v43 = vld [vmem:[%s6704_s19] sm:$0xff] }
 0x608   :  { %1526 = vperm.xlu1 %6408, %v6417_v38  }
 0x64a   :  { %v1331_v45 = vpop.permute.xlu1 %1330 }
 0x64b   :  { %v1334_v46 = vmul.f32 %v1331_v45, %v6963_v44 }
 0x64d   :  { %5913 = vmatprep.subr.mxu1 %v1334_v46  ;;  %v1495_v11 = vpop.xlane.xlu0 %1494 }
 0x64e   :  { %5914 = vmatpush3.msra.mxu1 %v1334_v46  ;;  %v1326_v48 = vpop.permute.xlu1 %1325  ;;  %v6998_v13 = vmul.f32 0.8, %v1495_v11 }
 0x64f   :  { %v1333_v49 = vmul.f32 %v1326_v48, %v6970_v47 }
 0x651   :  { %5915 = vmatprep.subr.mxu1 %v1333_v49 }
 0x652   :  { %5916 = vmatpush3.msra.mxu1 %v1333_v49 }
 0x653   :  { %5918 = vmatmul.mubr.msk.f32.vlgmr.msra.gmra.mxu1 %vm225_vm0, %v6525_v57 }
 0x654   :  { %5931 = vmatprep.mubr.msk.f32.mxu1 %vm225_vm0, %v6525_v57 }
 0x680   :  { %v1492_v12 = vpop.xlane.xlu1 %1491 }
 0x681   :  { %v7004_v17 = vmul.f32 0.8, %v1492_v12  ;;  %v5424_v12 = vld [vmem:[%s6699_s14] ss:$0 sm:$0xff]  ;;  %s7679_s14 = sld [smem:[#allocation15_spill]] }
 0x684   :  { %v1527_v20 = vpop.permute.xlu1 %1526 }
 0x685   :  { %v1534_v25 = vmul.f32 %v1527_v20, %v6863_v8  ;;  %v1716_v8 = vld [vmem:[%s6709_s24] sm:$0xff]  ;;  %s7682_s24 = sld [smem:[#allocation24_spill]] }
 0x713   :  { %v5919_v63 = vpop.f32.mrf.mxu1 }
 0x714   :  { %vm1497_vm14 = vcmp.gt.f32.partialorder %v5919_v63, %v1331_v45  ;;  %vm1499_vm15 = vcmp.eq.f32.partialorder %v5919_v63, %v1331_v45 }
 0x715   :  { %vm1503_vm12 = vmand %vm1499_vm15, %vm1501_vm13  ;;  %v1404_v0 = vpop.f32.mrf.mxu1 }
 0x716   :  { %vm1505_vm10 = vmor %vm1497_vm14, %vm1503_vm12  ;;  %vm1496_vm9 = vcmp.gt.f32.partialorder %v1404_v0, %v1326_v48  ;;  %vm1498_vm8 = vcmp.eq.f32.partialorder %v1404_v0, %v1326_v48 }
 0x717   :  { %vm1502_vm7 = vmand %vm1498_vm8, %vm1500_vm11  ;;  %v1507_v1 = vsel %vm1505_vm10, 1.0, %v6523_v22 }
 0x718   :  { %vm1504_vm6 = vmor %vm1496_vm9, %vm1502_vm7  ;;  %v1509_v2 = vmul.f32 %v1507_v1, %v6978_v61 }
 0x719   :  { %v1506_v3 = vsel %vm1504_vm6, 1.0, %v6523_v22 }
 0x71a   :  { %v1513_v7 = vsel %vm225_vm0, %v1509_v2, 0.0  ;;  %v1508_v9 = vmul.f32 %v1506_v3, %v6955_v42  ;;  %v7061_v3 = vadd.s32 64, %v6811_v51 }
 0x71b   :  { %1514 = vadd.xlane.f32.xlu0 %v1513_v7  ;;  %v7064_v7 = vadd.s32 64, %v6819_v54 }
 0x71c   :  { %v1510_v10 = vsel %vm225_vm0, %v1508_v9, 0.0  ;;  %v7067_v9 = vadd.s32 64, %v6827_v56  ;;  %vm1972_vm8 = vcmp.eq.s32.totalorder %v6813_v52, %v7061_v3 }
 0x71d   :  { %vm1971_vm9 = vcmp.eq.s32.totalorder %v6813_v52, %v7064_v7 }
 0x71e   :  { %vm1970_vm10 = vcmp.eq.s32.totalorder %v6813_v52, %v7067_v9 }
 0x71f   :  { %1511 = vadd.xlane.f32.xlu0 %v1510_v10 }
 0x735   :  { %1531 = vperm.xlu0 %6409, %v6415_v37  }
 0x7a4   :  { %v1515_v14 = vpop.xlane.xlu0 %1514 }
 0x7a5   :  { %vm1519_vm7 = vcmp.lt.f32.partialorder %v1515_v14, %v6998_v13 }
 0x7a6   :  { %v7002_v16 = vsel %vm1519_vm7, 1.0, %v6523_v22 }
 0x7a7   :  { %v1541_v18 = vmul.f32 %v7002_v16, %v6963_v44 }
 0x7a8   :  { %v1512_v19 = vpop.xlane.xlu0 %1511 }
 0x7a9   :  { %vm1518_vm6 = vcmp.lt.f32.partialorder %v1512_v19, %v7004_v17  ;;  %5927 = vmatprep.subr.mxu1 %v1541_v18 }
 0x7aa   :  { %v7010_v23 = vsel %vm1518_vm6, 1.0, %v6523_v22  ;;  %5928 = vmatpush3.msra.mxu1 %v1541_v18 }
 0x7ab   :  { %v1540_v24 = vmul.f32 %v7010_v23, %v6970_v47  ;;  %v1536_v27 = vmul.f32 %v1534_v25, %v7010_v23  ;;  %v1538_v36 = vmul.f32 %v7010_v23, %v6747_v4  ;;  %v1714_v4 = vld [vmem:[%s6704_s19 + $0x10] sm:$0xff]  ;;  %s7680_s19 = sld [smem:[#allocation14_spill]] }
 0x7ad   :  { %5929 = vmatprep.subr.mxu1 %v1540_v24 }
 0x7ae   :  { %5930 = vmatpush3.msra.mxu1 %v1540_v24 }
 0x7af   :  { %5932 = vmatmul.mubr.msk.f32.vlgmr.msra.gmra.mxu1 %vm225_vm0, %v6525_v57  ;;  %5941 = vmatprep.subr.mxu1 %v1719_v26 }
 0x7b0   :  { %v1532_v29 = vpop.permute.xlu0 %1531  ;;  %5942 = vmatpush3.msra.mxu1 %v1719_v26  ;;  %5949 = vmatprep.mubr.msk.f32.mxu1 %vm662_vm2, %v1536_v27 }
 0x7b1   :  { %v1535_v31 = vmul.f32 %v1532_v29, %v6861_v5  ;;  %5943 = vmatprep.subr.mxu1 %v1718_v28  ;;  %v1539_v5 = vmul.f32 %v7002_v16, %v6754_v6 }
 0x7b2   :  { %5944 = vmatpush3.msra.mxu1 %v1718_v28 }
 0x7b3   :  { %v1537_v32 = vmul.f32 %v1535_v31, %v7002_v16  ;;  %5945 = vmatprep.subr.mxu1 %v1717_v30  ;;  %v2134_v31 = vld [vmem:[%s6724_s8 + $0x10] sm:$0xff] }
 0x7b4   :  { %5946 = vmatpush3.msra.mxu1 %v1717_v30  ;;  %v2135_v30 = vld [vmem:[%s6724_s8 + $0x18] sm:$0xff] }
 0x7b5   :  { %5934 = vmatprep.subr.mxu0 %v1537_v32  ;;  %5947 = vmatprep.subr.mxu1 %v1716_v8 }
 0x7b6   :  { %5935 = vmatpush3.msra.mxu0 %v1537_v32  ;;  %5948 = vmatpush3.msra.mxu1 %v1716_v8  ;;  %v2133_v8 = vld [vmem:[%s6724_s8 + $0x8] sm:$0xff] }
 0x7b7   :  { %5936 = vmatprep.subr.mxu0 %v1536_v27  ;;  %5950 = vmatmul.mubr.msk.f32.vlgmr.msra.gmra.mxu1 %vm662_vm2, %v1537_v32  ;;  %v2132_v32 = vld [vmem:[%s6724_s8] sm:$0xff]  ;;  %s7678_s8 = sld [smem:[#allocation16_spill]] }
 0x7b8   :  { %5937 = vmatpush3.msra.mxu0 %v1536_v27  ;;  %5963 = vmatprep.subr.mxu1 %v6523_v22 }
 0x7b9   :  { %5967 = vmatprep.mubr.msk.f32.mxu1 %vm6524_vm1, %v6523_v22  ;;  %5952 = vmatprep.subr.mxu0 %v1715_v40 }
 0x86f   :  { %v5933_v33 = vpop.f32.mrf.mxu1 }
 0x870   :  { %v7031_v35 = vmul.f32 %v5933_v33, %v1539_v5  ;;  %v7110_v5 = vadd.s32 64, %v6808_v50  ;;  %v2131_v33 = vld [vmem:[%s7671_s0 + $0x18] sm:$0xff] }
 0x871   :  { %v1608_v37 = vpop.f32.mrf.mxu1 }
 0x872   :  { %v7035_v38 = vmul.f32 %v1608_v37, %v1538_v36  ;;  %v1703_v39 = vsel %vm225_vm0, %v7031_v35, 0.0  ;;  %vm7646_vm14 = vcmp.eq.s32.totalorder %v6813_v52, %v7110_v5  ;;  %v2130_v36 = vld [vmem:[%s7671_s0 + $0x10] sm:$0xff] }
 0x873   :  { %1704 = vadd.xlane.f32.xlu0 %v1703_v39 }
 0x874   :  { %5938 = vmatprep.mubr.msk.f32.mxu0 %vm225_vm0, %v7035_v38  ;;  %v1700_v6 = vsel %vm225_vm0, %v7035_v38, 0.0 }
 0x875   :  { %1701 = vadd.xlane.f32.xlu1 %v1700_v6  ;;  %5939 = vmatmul.mubr.msk.f32.vlgmr.msra.gmra.mxu0 %vm225_vm0, %v7031_v35  ;;  %v2128_v6 = vld [vmem:[%s7671_s0] sm:$0xff] }
 0x876   :  { %5953 = vmatpush3.msra.mxu0 %v1715_v40 }
 0x877   :  { %5954 = vmatprep.subr.mxu0 %v1714_v4  ;;  %v5951_v10 = vpop.f32.mrf.mxu1 }
 0x878   :  { %5955 = vmatpush3.msra.mxu0 %v1714_v4 }
 0x879   :  { %5956 = vmatprep.subr.mxu0 %v1713_v41  ;;  %v1792_v18 = vpop.f32.mrf.mxu1 }
 0x87a   :  { %5957 = vmatpush3.msra.mxu0 %v1713_v41 }
 0x87b   :  { %5958 = vmatprep.subr.mxu0 %v1712_v43 }
 0x87c   :  { %5959 = vmatpush3.msra.mxu0 %v1712_v43  ;;  %v7131_v43 = vld [vmem:[%s7672_s5] sm:$0xff] }
 0x87d   :  { %5970 = vmatprep.subr.mxu0 %v6523_v22 }
 0x8fc   :  { %v1705_v46 = vpop.xlane.xlu0 %1704 }
 0x8fd   :  { %v1707_v49 = vmax.f32 %v1705_v46, 1.0 }
 0x8fe   :  { %v1702_v45 = vpop.xlane.xlu1 %1701 }
 0x8ff   :  { %v1706_v48 = vmax.f32 %v1702_v45, 1.0  ;;  %v7134_v45 = vld [vmem:[%s7672_s5 + $0x8] sm:$0xff] }
 0x900   :  { %v2555_v46 = vsel %vm225_vm0, %v7134_v45, 0.0 }
 0x901   :  { %6418 = vrcp.f32 %v1706_v48  ;;  %v2552_v48 = vsel %vm225_vm0, %v7131_v43, 0.0  ;;  %2556 = vadd.xlane.f32.xlu1 %v2555_v46 }
 0x902   :  { %6420 = vrcp.f32 %v1707_v49  ;;  %2553 = vadd.xlane.f32.xlu0 %v2552_v48  ;;  %v7141_v49 = vadd.s32 96, %v6811_v51 }
 0x904   :  { %vm7645_vm15 = vcmp.eq.s32.totalorder %v6813_v52, %v7141_v49 }
 0x90e   :  { %v7050_v62 = vpop.eup %6418 }
 0x90f   :  { %v7052_v0 = vpop.eup %6420 }
 0x935   :  { %v5940_v60 = vpop.f32.mrf.mxu0 }
 0x936   :  { %v1711_v2 = vmul.f32 %v7052_v0, %v5940_v60  ;;  %v7144_v60 = vadd.s32 96, %v6819_v54 }
 0x937   :  { %v1691_v63 = vpop.f32.mrf.mxu0 }
 0x938   :  { %v1710_v1 = vmul.f32 %v7050_v62, %v1691_v63  ;;  %vm7644_vm12 = vcmp.eq.s32.totalorder %v6813_v52, %v7144_v60  ;;  %v1061_v63 = vadd.f32 %v6920_v15, %v6932_v21  ;;  %v2468_v21 = vld [vmem:[%s7674_s13 + $0x8] sm:$0xff] }
 0x93a   :  { %5960 = vmatprep.mubr.msk.f32.mxu0 %vm662_vm2, %v1710_v1 }
 0x93b   :  { %5961 = vmatmul.mubr.msk.f32.vlgmr.msra.gmra.mxu0 %vm662_vm2, %v1711_v2 }
 0x93c   :  { %5978 = vmatprep.mubr.msk.f32.mxu0 %vm6524_vm1, %v6523_v22  ;;  %5971 = vmatpush3.msk.msra.mxu0 %vm1972_vm8, %v6525_v57 }
 0x93d   :  { %5972 = vmatprep.subr.mxu0 %v6523_v22 }
 0x93e   :  { %5973 = vmatpush3.msk.msra.mxu0 %vm1971_vm9, %v6525_v57 }
 0x93f   :  { %5974 = vmatprep.subr.mxu0 %v6523_v22 }
 0x940   :  { %5975 = vmatpush3.msk.msra.mxu0 %vm1970_vm10, %v6525_v57 }
 0x941   :  { %5976 = vmatprep.subr.mxu0 %v6523_v22 }
 0x942   :  { %5977 = vmatpush3.msk.msra.mxu0 %vm7646_vm14, %v6525_v57 }
 0x943   :  { %5999 = vmatprep.subr.mxu0 %v2131_v33 }
 0x9fb   :  { %v5962_v11 = vpop.f32.mrf.mxu0 }
 0x9fc   :  { %v1879_v14 = vadd.f32 %v5962_v11, %v5951_v10 }
 0x9fd   :  { %v1873_v19 = vpop.f32.mrf.mxu0 }
 0x9fe   :  { %v1890_v20 = vadd.f32 %v5424_v12, %v1879_v14  ;;  %v1874_v24 = vadd.f32 %v1873_v19, %v1792_v18 }
 0xa00   :  { %v1892_v25 = vmax.f32 %v1890_v20, 0.0  ;;  %v1889_v26 = vadd.f32 %v5424_v12, %v1874_v24  ;;  %v5437_v12 = vld [vmem:[%s7673_s9] ss:$0 sm:$0xff] }
 0xa02   :  { %v1894_v27 = vmul.f32 %v1892_v25, %v7002_v16  ;;  %v1891_v28 = vmax.f32 %v1889_v26, 0.0 }
 0xa04   :  { %v1893_v29 = vmul.f32 %v1891_v28, %v7010_v23  ;;  %5964 = vmatpush3.msra.mxu1 %v1894_v27 }
 0xa05   :  { %5965 = vmatprep.subr.mxu1 %v6523_v22 }
 0xa06   :  { %5966 = vmatpush3.msra.mxu1 %v1893_v29 }
 0xa07   :  { %5968 = vmatmul.mubr.msk.f32.vlgmr.msra.gmra.mxu1 %vm225_vm0, %v6781_v34  ;;  %5981 = vmatprep.subr.mxu1 %v1894_v27 }
 0xa08   :  { %5982 = vmatpush3.msra.mxu1 %v1894_v27  ;;  %5985 = vmatprep.mubr.msk.f32.mxu1 %vm225_vm0, %v7035_v38  ;;  %v2129_v38 = vld [vmem:[%s7671_s0 + $0x8] sm:$0xff] }
 0xa09   :  { %5983 = vmatprep.subr.mxu1 %v1893_v29 }
 0xa0a   :  { %5984 = vmatpush3.msra.mxu1 %v1893_v29 }
 0xa0b   :  { %5986 = vmatmul.mubr.msk.f32.vlgmr.msra.gmra.mxu1 %vm225_vm0, %v7031_v35  ;;  %5988 = vmatprep.subr.mxu1 %v2135_v30 }
 0xa0c   :  { %5989 = vmatpush3.msra.mxu1 %v2135_v30  ;;  %5996 = vmatprep.mubr.msk.f32.mxu1 %vm662_vm2, %v1893_v29  ;;  %v2467_v29 = vld [vmem:[%s7674_s13] sm:$0xff] }
 0xa0d   :  { %5990 = vmatprep.subr.mxu1 %v2134_v31  ;;  %v2566_v30 = vld [vmem:[%s7675_s25] sm:$0xff] }
 0xa0e   :  { %5991 = vmatpush3.msra.mxu1 %v2134_v31  ;;  %v2565_v31 = vld [vmem:[%s7676_s29 + $0x8] sm:$0xff] }
 0xa0f   :  { %5992 = vmatprep.subr.mxu1 %v2133_v8 }
 0xa10   :  { %5993 = vmatpush3.msra.mxu1 %v2133_v8  ;;  %v2554_v8 = vpop.xlane.xlu0 %2553 }
 0xa11   :  { %5994 = vmatprep.subr.mxu1 %v2132_v32 }
 0xa12   :  { %5995 = vmatpush3.msra.mxu1 %v2132_v32  ;;  %v2557_v32 = vpop.xlane.xlu1 %2556 }
 0xa13   :  { %5997 = vmatmul.mubr.msk.f32.vlgmr.msra.gmra.mxu1 %vm662_vm2, %v1894_v27  ;;  %6010 = vmatprep.subr.mxu1 %v6523_v22 }
 0xa14   :  { %6014 = vmatprep.mubr.msk.f32.mxu1 %vm6524_vm1, %v6523_v22 }
 0xac7   :  { %v1961_v35 = vpop.f32.mrf.mxu1 }
 0xac8   :  { %5979 = vmatmul.mubr.msk.f32.vlgmr.msra.gmra.mxu0 %vm662_vm2, %v1961_v35  ;;  %v2559_v35 = vmax.f32 %v2557_v32, 1.0 }
 0xac9   :  { %v5969_v37 = vpop.f32.mrf.mxu1  ;;  %6000 = vmatpush3.msra.mxu0 %v2131_v33  ;;  %v2558_v33 = vmax.f32 %v2554_v8, 1.0 }
 0xaca   :  { %6001 = vmatprep.subr.mxu0 %v2130_v36  ;;  %v2564_v37 = vld [vmem:[%s7676_s29] sm:$0xff] }
 0xacb   :  { %v5987_v39 = vpop.f32.mrf.mxu1  ;;  %6002 = vmatpush3.msra.mxu0 %v2130_v36  ;;  %6422 = vrcp.f32 %v2558_v33 }
 0xacc   :  { %6003 = vmatprep.subr.mxu0 %v2129_v38  ;;  %v2127_v41 = vmul.f32 %v7052_v0, %v5987_v39  ;;  %6424 = vrcp.f32 %v2559_v35 }
 0xacd   :  { %v2117_v40 = vpop.f32.mrf.mxu1  ;;  %6004 = vmatpush3.msra.mxu0 %v2129_v38 }
 0xace   :  { %v2126_v4 = vmul.f32 %v7050_v62, %v2117_v40  ;;  %6005 = vmatprep.subr.mxu0 %v2128_v6  ;;  %v7147_v62 = vadd.s32 96, %v6827_v56 }
 0xacf   :  { %6006 = vmatpush3.msra.mxu0 %v2128_v6 }
 0xad0   :  { %6007 = vmatprep.mubr.msk.f32.mxu0 %vm662_vm2, %v2126_v4  ;;  %6017 = vmatprep.subr.mxu0 %v6523_v22  ;;  %vm7643_vm7 = vcmp.eq.s32.totalorder %v6813_v52, %v7147_v62 }
 0xad1   :  { %6008 = vmatmul.mubr.msk.f32.vlgmr.msra.gmra.mxu0 %vm662_vm2, %v2127_v41 }
 0xad2   :  { %6025 = vmatprep.mubr.msk.f32.mxu0 %vm6524_vm1, %v6523_v22  ;;  %6018 = vmatpush3.msk.msra.mxu0 %vm7645_vm15, %v6525_v57 }
 0xad3   :  { %6019 = vmatprep.subr.mxu0 %v6523_v22  ;;  %v5998_v10 = vpop.f32.mrf.mxu1 }
 0xad4   :  { %6020 = vmatpush3.msk.msra.mxu0 %vm7644_vm12, %v6525_v57 }
 0xad5   :  { %6021 = vmatprep.subr.mxu0 %v6523_v22  ;;  %v2208_v18 = vpop.f32.mrf.mxu1 }
 0xad6   :  { %6022 = vmatpush3.msk.msra.mxu0 %vm7643_vm7, %v6525_v57 }
 0xad7   :  { %6023 = vmatprep.subr.mxu0 %v6523_v22 }
 0xad8   :  { %v7205_v39 = vpop.eup %6422 }
 0xad9   :  { %v7207_v40 = vpop.eup %6424 }
 0xb88   :  { %v2046_v0 = vpop.f32.mrf.mxu0 }
 0xb89   :  { %v7172_v1 = vadd.f32 %v2046_v0, %v1061_v63 }
 0xb8a   :  { %v5980_v2 = vpop.f32.mrf.mxu0 }
 0xb91   :  { %v6009_v11 = vpop.f32.mrf.mxu0 }
 0xb92   :  { %v2295_v14 = vadd.f32 %v6009_v11, %v5998_v10  ;;  %v5450_v11 = vld [vmem:[%s7677_s3] ss:$0 sm:$0xff] }
 0xb93   :  { %v2289_v19 = vpop.f32.mrf.mxu0 }
 0xb94   :  { %v2306_v20 = vadd.f32 %v5437_v12, %v2295_v14  ;;  %v2290_v24 = vadd.f32 %v2289_v19, %v2208_v18 }
 0xb96   :  { %v2308_v25 = vmax.f32 %v2306_v20, 0.0  ;;  %v2305_v26 = vadd.f32 %v5437_v12, %v2290_v24 }
 0xb98   :  { %v2310_v27 = vmul.f32 %v2308_v25, %v7002_v16  ;;  %v2307_v28 = vmax.f32 %v2305_v26, 0.0  ;;  %v7188_v16 = vadd.s32 96, %v6808_v50 }
 0xb9a   :  { %v2309_v15 = vmul.f32 %v2307_v28, %v7010_v23  ;;  %6011 = vmatpush3.msra.mxu1 %v2310_v27  ;;  %vm7642_vm6 = vcmp.eq.s32.totalorder %v6813_v52, %v7188_v16  ;;  %v2567_v23 = vld [vmem:[%s7675_s25 + $0x8] sm:$0xff]  ;;  %v2894_v27 = vld [vmem:[%s7678_s8 + $0x10] sm:$0xff]  ;;  %v2891_v28 = vld [vmem:[%s7679_s14 + $0x18] sm:$0xff] }
 0xb9b   :  { %6012 = vmatprep.subr.mxu1 %v6523_v22  ;;  %6024 = vmatpush3.msk.msra.mxu0 %vm7642_vm6, %v6525_v57 }
 0xb9c   :  { %6013 = vmatpush3.msra.mxu1 %v2309_v15  ;;  %6042 = vmatprep.subr.mxu0 %v2565_v31  ;;  %v2893_v15 = vld [vmem:[%s7678_s8 + $0x8] sm:$0xff] }
 0xb9d   :  { %6015 = vmatmul.mubr.msk.f32.vlgmr.msra.gmra.mxu1 %vm225_vm0, %v6781_v34  ;;  %6028 = vmatprep.subr.mxu1 %v2468_v21 }
 0xb9e   :  { %6029 = vmatpush3.msra.mxu1 %v2468_v21  ;;  %6032 = vmatprep.mubr.msk.f32.mxu1 %vm225_vm0, %v7131_v43 }
 0xb9f   :  { %6030 = vmatprep.subr.mxu1 %v2467_v29 }
 0xba0   :  { %6031 = vmatpush3.msra.mxu1 %v2467_v29 }
 0xba1   :  { %6033 = vmatmul.mubr.msk.f32.vlgmr.msra.gmra.mxu1 %vm225_vm0, %v7134_v45  ;;  %6035 = vmatprep.subr.mxu1 %v2567_v23 }
 0xba2   :  { %6039 = vmatprep.mubr.msk.f32.mxu1 %vm225_vm0, %v2467_v29  ;;  %6036 = vmatpush3.msra.mxu1 %v2567_v23  ;;  %v2889_v29 = vld [vmem:[%s7679_s14 + $0x8] sm:$0xff]  ;;  %v2888_v23 = vld [vmem:[%s7679_s14] sm:$0xff] }
 0xba3   :  { %6037 = vmatprep.subr.mxu1 %v2566_v30 }
 0xba4   :  { %6038 = vmatpush3.msra.mxu1 %v2566_v30 }
 0xba5   :  { %6040 = vmatmul.mubr.msk.f32.vlgmr.msra.gmra.mxu1 %vm225_vm0, %v2468_v21  ;;  %6049 = vmatprep.subr.mxu1 %v6523_v22  ;;  %v2892_v21 = vld [vmem:[%s7678_s8] sm:$0xff] }
 0xba6   :  { %6053 = vmatprep.mubr.msk.f32.mxu1 %vm6524_vm1, %v6523_v22 }
 0xc5d   :  { %v2377_v36 = vpop.f32.mrf.mxu1 }
 0xc5e   :  { %6026 = vmatmul.mubr.msk.f32.vlgmr.msra.gmra.mxu0 %vm662_vm2, %v2377_v36 }
 0xc5f   :  { %v6016_v38 = vpop.f32.mrf.mxu1  ;;  %6043 = vmatpush3.msra.mxu0 %v2565_v31 }
 0xc60   :  { %6044 = vmatprep.subr.mxu0 %v2564_v37 }
 0xc61   :  { %v6034_v6 = vpop.f32.mrf.mxu1  ;;  %6045 = vmatpush3.msra.mxu0 %v2564_v37  ;;  %v5458_v37 = vld [vmem:[%s7680_s19] ss:$0 sm:$0xff] }
 0xc62   :  { %v2563_v46 = vmul.f32 %v7207_v40, %v6034_v6 }
 0xc63   :  { %v2543_v4 = vpop.f32.mrf.mxu1 }
 0xc64   :  { %v2562_v41 = vmul.f32 %v7205_v39, %v2543_v4 }
 0xc65   :  { %v6041_v2 = vpop.f32.mrf.mxu1 }
 0xc66   :  { %6046 = vmatprep.mubr.msk.f32.mxu0 %vm225_vm0, %v2562_v41 }
 0xc67   :  { %6047 = vmatmul.mubr.msk.f32.vlgmr.msra.gmra.mxu0 %vm225_vm0, %v2563_v46  ;;  %v2640_v14 = vpop.f32.mrf.mxu1  ;;  %v3366_v46 = vld [vmem:[%s7682_s24 + $0x10] sm:$0xff] }
 0xc68   :  { %6060 = vmatprep.mubr.msk.f32.mxu0 %vm225_vm0, %v7131_v43 }
 0xd1e   :  { %v2462_v48 = vpop.f32.mrf.mxu0 }
 0xd1f   :  { %v7216_v63 = vadd.f32 %v2462_v48, %v7172_v1  ;;  %v2895_v1 = vld [vmem:[%s7678_s8 + $0x18] sm:$0xff]  ;;  %v3364_v48 = vld [vmem:[%s7682_s24] sm:$0xff] }
 0xd20   :  { %v6027_v0 = vpop.f32.mrf.mxu0 }
 0xd27   :  { %v6048_v10 = vpop.f32.mrf.mxu0 }
 0xd28   :  { %v2727_v12 = vadd.f32 %v6048_v10, %v6041_v2 }
 0xd29   :  { %v2721_v18 = vpop.f32.mrf.mxu0 }
 0xd2a   :  { %v2738_v19 = vadd.f32 %v5450_v11, %v2727_v12  ;;  %v2722_v20 = vadd.f32 %v2721_v18, %v2640_v14 }
 0xd2c   :  { %v2740_v24 = vmax.f32 %v2738_v19, 0.0  ;;  %v2737_v25 = vadd.f32 %v5450_v11, %v2722_v20 }
 0xd2e   :  { %v2739_v26 = vmax.f32 %v2737_v25, 0.0  ;;  %6050 = vmatpush3.msra.mxu1 %v2740_v24  ;;  %6056 = vmatprep.subr.mxu0 %v2740_v24 }
 0xd2f   :  { %6051 = vmatprep.subr.mxu1 %v6523_v22  ;;  %6057 = vmatpush3.msra.mxu0 %v2740_v24 }
 0xd30   :  { %6052 = vmatpush3.msra.mxu1 %v2739_v26  ;;  %6058 = vmatprep.subr.mxu0 %v2739_v26 }
 0xd31   :  { %6054 = vmatmul.mubr.msk.f32.vlgmr.msra.gmra.mxu1 %vm225_vm0, %v6781_v34  ;;  %6059 = vmatpush3.msra.mxu0 %v2739_v26  ;;  %v2890_v34 = vld [vmem:[%s7679_s14 + $0x10] sm:$0xff] }
 0xd32   :  { %6063 = vmatprep.subr.mxu1 %v2895_v1  ;;  %6061 = vmatmul.mubr.msk.f32.vlgmr.msra.gmra.mxu0 %vm225_vm0, %v7134_v45 }
 0xd33   :  { %6064 = vmatpush3.msra.mxu1 %v2895_v1  ;;  %6071 = vmatprep.mubr.msk.f32.mxu1 %vm662_vm2, %v2739_v26 }
 0xd34   :  { %6065 = vmatprep.subr.mxu1 %v2894_v27  ;;  %6074 = vmatprep.subr.mxu0 %v2891_v28 }
 0xd35   :  { %6066 = vmatpush3.msra.mxu1 %v2894_v27  ;;  %6075 = vmatpush3.msra.mxu0 %v2891_v28  ;;  %v5476_v28 = vld [vmem:[#allocation2] ss:$0 sm:$0xff] }
 0xd36   :  { %6067 = vmatprep.subr.mxu1 %v2893_v15  ;;  %6076 = vmatprep.subr.mxu0 %v2890_v34 }
 0xd37   :  { %6068 = vmatpush3.msra.mxu1 %v2893_v15  ;;  %6077 = vmatpush3.msra.mxu0 %v2890_v34 }
 0xd38   :  { %6069 = vmatprep.subr.mxu1 %v2892_v21  ;;  %6078 = vmatprep.subr.mxu0 %v2889_v29 }
 0xd39   :  { %6070 = vmatpush3.msra.mxu1 %v2892_v21  ;;  %6079 = vmatpush3.msra.mxu0 %v2889_v29 }
 0xd3a   :  { %6072 = vmatmul.mubr.msk.f32.vlgmr.msra.gmra.mxu1 %vm662_vm2, %v2740_v24  ;;  %6085 = vmatprep.subr.mxu1 %v6523_v22 }
 0xd3b   :  { %6089 = vmatprep.mubr.msk.f32.mxu1 %vm6524_vm1, %v6523_v22  ;;  %6080 = vmatprep.subr.mxu0 %v2888_v23 }
 0xd3c   :  { %6081 = vmatpush3.msra.mxu0 %v2888_v23 }
 0xd3d   :  { %6092 = vmatprep.subr.mxu0 %v6523_v22 }
 0xdf1   :  { %v2807_v30 = vpop.f32.mrf.mxu1 }
 0xdf2   :  { %v6062_v31 = vpop.f32.mrf.mxu0 }
 0xdf3   :  { %v6055_v8 = vpop.f32.mrf.mxu1  ;;  %v2887_v35 = vmul.f32 %v7207_v40, %v6062_v31 }
 0xdf4   :  { %v2877_v32 = vpop.f32.mrf.mxu0 }
 0xdf5   :  { %v2886_v33 = vmul.f32 %v7205_v39, %v2877_v32 }
 0xdf7   :  { %6082 = vmatprep.mubr.msk.f32.mxu0 %vm662_vm2, %v2886_v33 }
 0xdf8   :  { %6083 = vmatmul.mubr.msk.f32.vlgmr.msra.gmra.mxu0 %vm662_vm2, %v2887_v35 }
 0xdf9   :  { %6093 = vmatpush3.msk.msra.mxu0 %vm913_vm3, %v6525_v57  ;;  %6100 = vmatprep.mubr.msk.f32.mxu0 %vm6524_vm1, %v6523_v22  ;;  %vm7681_vm3 = vcmp.eq.s32.totalorder %v6813_v52, %v6847_v59  ;;  %v7273_v59 = vld [vmem:[%s6556_s21] sm:$0x3]  ;;  %s7687_s21 = sld [smem:[#allocation23_spill]] }
 0xdfa   :  { %6094 = vmatprep.subr.mxu0 %v6523_v22  ;;  %v6073_v53 = vpop.f32.mrf.mxu1 }
 0xdfb   :  { %6095 = vmatpush3.msk.msra.mxu0 %vm912_vm4, %v6525_v57  ;;  %vm7683_vm4 = vcmp.eq.s32.totalorder %v6813_v52, %v6811_v51  ;;  %v3367_v51 = vld [vmem:[%s7682_s24 + $0x18] sm:$0xff] }
 0xdfc   :  { %6096 = vmatprep.subr.mxu0 %v6523_v22  ;;  %v2968_v38 = vpop.f32.mrf.mxu1 }
 0xdfd   :  { %6097 = vmatpush3.msk.msra.mxu0 %vm911_vm5, %v6525_v57  ;;  %vm7684_vm5 = vcmp.eq.s32.totalorder %v6813_v52, %v6819_v54  ;;  %v3365_v54 = vld [vmem:[%s7682_s24 + $0x8] sm:$0xff] }
 0xdfe   :  { %6098 = vmatprep.subr.mxu0 %v6523_v22 }
 0xdff   :  { %6099 = vmatpush3.msk.msra.mxu0 %vm7681_vm3, %v6525_v57  ;;  %vm7685_vm3 = vcmp.eq.s32.totalorder %v6813_v52, %v6827_v56  ;;  %v3363_v12 = vld [vmem:[%s7687_s21 + $0x18] sm:$0xff]  ;;  %v3362_v14 = vld [vmem:[%s7687_s21 + $0x10] sm:$0xff]  ;;  %v3361_v18 = vld [vmem:[%s7687_s21 + $0x8] sm:$0xff] }
 0xe00   :  { %v3360_v19 = vld [vmem:[%s7687_s21] sm:$0xff] }
 0xeb8   :  { %v6084_v36 = vpop.f32.mrf.mxu0 }
 0xeb9   :  { %v3055_v55 = vadd.f32 %v6084_v36, %v6073_v53 }
 0xeba   :  { %v3049_v39 = vpop.f32.mrf.mxu0 }
 0xebb   :  { %v3066_v6 = vadd.f32 %v5458_v37, %v3055_v55  ;;  %v3050_v40 = vadd.f32 %v3049_v39, %v2968_v38 }
 0xebd   :  { %v7264_v4 = vmax.f32 %v3066_v6, 0.0  ;;  %v3065_v58 = vadd.f32 %v5458_v37, %v3050_v40 }
 0xebf   :  { %v7266_v41 = vmax.f32 %v3065_v58, 0.0  ;;  %6086 = vmatpush3.msra.mxu1 %v7264_v4  ;;  %6114 = vmatprep.subr.mxu0 %v7264_v4 }
 0xec0   :  { %6087 = vmatprep.subr.mxu1 %v6523_v22 }
 0xec1   :  { %6088 = vmatpush3.msra.mxu1 %v7266_v41 }
 0xec2   :  { %6090 = vmatmul.mubr.msk.f32.vlgmr.msra.gmra.mxu1 %vm225_vm0, %v7273_v59  ;;  %6103 = vmatprep.subr.mxu1 %v6523_v22 }
 0xec3   :  { %6104 = vmatpush3.msk.msra.mxu1 %vm7683_vm4, %v6525_v57  ;;  %6111 = vmatprep.mubr.msk.f32.mxu1 %vm6524_vm1, %v6523_v22  ;;  %vm7686_vm4 = vcmp.eq.s32.totalorder %v6813_v52, %v6808_v50 }
 0xec4   :  { %6105 = vmatprep.subr.mxu1 %v6523_v22 }
 0xec5   :  { %6106 = vmatpush3.msk.msra.mxu1 %vm7684_vm5, %v6525_v57 }
 0xec6   :  { %6107 = vmatprep.subr.mxu1 %v6523_v22 }
 0xec7   :  { %6108 = vmatpush3.msk.msra.mxu1 %vm7685_vm3, %v6525_v57 }
 0xec8   :  { %6109 = vmatprep.subr.mxu1 %v6523_v22 }
 0xec9   :  { %6110 = vmatpush3.msk.msra.mxu1 %vm7686_vm4, %v6525_v57 }
 0xeca   :  { %6112 = vmatmul.mubr.msk.f32.vlgmr.msra.gmra.mxu1 %vm662_vm2, %v2807_v30  ;;  %6121 = vmatprep.subr.mxu1 %v3367_v51 }
 0xecb   :  { %6122 = vmatpush3.msra.mxu1 %v3367_v51  ;;  %6129 = vmatprep.mubr.msk.f32.mxu1 %vm662_vm2, %v7266_v41 }
 0xecc   :  { %6123 = vmatprep.subr.mxu1 %v3366_v46 }
 0xecd   :  { %6124 = vmatpush3.msra.mxu1 %v3366_v46 }
 0xece   :  { %6125 = vmatprep.subr.mxu1 %v3365_v54 }
 0xecf   :  { %6126 = vmatpush3.msra.mxu1 %v3365_v54 }
 0xed0   :  { %6127 = vmatprep.subr.mxu1 %v3364_v48 }
 0xed1   :  { %6128 = vmatpush3.msra.mxu1 %v3364_v48  ;;  %v3849_v48 = vld [vmem:[%s7688_s6 + $0x18] sm:$0xff] }
 0xed2   :  { %6130 = vmatmul.mubr.msk.f32.vlgmr.msra.gmra.mxu1 %vm662_vm2, %v7264_v4 }
 0xed3   :  { %6147 = vmatprep.mubr.msk.f32.mxu1 %vm225_vm0, %v6525_v57 }
 0xf82   :  { %v3135_v0 = vpop.f32.mrf.mxu1 }
 0xf83   :  { %6101 = vmatmul.mubr.msk.f32.vlgmr.msra.gmra.mxu0 %vm662_vm2, %v3135_v0 }
 0xf84   :  { %6115 = vmatpush3.msra.mxu0 %v7264_v4  ;;  %v6091_v2 = vpop.f32.mrf.mxu1  ;;  %6118 = vmatprep.mubr.msk.f32.mxu0 %vm225_vm0, %v7131_v43 }
 0xf85   :  { %6116 = vmatprep.subr.mxu0 %v7266_v41 }
 0xf86   :  { %6117 = vmatpush3.msra.mxu0 %v7266_v41 }
 0xf87   :  { %6119 = vmatmul.mubr.msk.f32.vlgmr.msra.gmra.mxu0 %vm225_vm0, %v7134_v45  ;;  %6132 = vmatprep.subr.mxu0 %v3363_v12 }
 0xf88   :  { %6133 = vmatpush3.msra.mxu0 %v3363_v12 }
 0xf89   :  { %6134 = vmatprep.subr.mxu0 %v3362_v14 }
 0xf8a   :  { %v7318_v10 = vpop.f32.mrf.mxu1  ;;  %6135 = vmatpush3.msra.mxu0 %v3362_v14 }
 0xf8b   :  { %6136 = vmatprep.subr.mxu0 %v3361_v18 }
 0xf8c   :  { %v6113_v11 = vpop.f32.mrf.mxu1  ;;  %6137 = vmatpush3.msra.mxu0 %v3361_v18 }
 0xf8d   :  { %6138 = vmatprep.subr.mxu0 %v3360_v19  ;;  %v3846_v11 = vld [vmem:[%s7688_s6] sm:$0xff] }
 0xf8e   :  { %6139 = vmatpush3.msra.mxu0 %v3360_v19 }
 0xf92   :  { %v6131_v1 = vpop.f32.mrf.mxu1 }
 0xf94   :  { %v3440_v21 = vpop.f32.mrf.mxu1 }
0x1043   :  { %v7324_v20 = vpop.f32.mrf.mxu0 }
0x1045   :  { %v6102_v24 = vpop.f32.mrf.mxu0 }
0x1047   :  { %v6120_v25 = vpop.f32.mrf.mxu0 }
0x1049   :  { %v3351_v26 = vpop.f32.mrf.mxu0 }
0x104a   :  { %6140 = vmatprep.mubr.msk.f32.mxu0 %vm662_vm2, %v3351_v26 }
0x104b   :  { %6141 = vmatmul.mubr.msk.f32.vlgmr.msra.gmra.mxu0 %vm662_vm2, %v6120_v25 }
0x104c   :  { %6154 = vmatprep.mubr.msk.f32.mxu0 %vm225_vm0, %v6525_v57 }
0x110b   :  { %v6142_v27 = vpop.f32.mrf.mxu0 }
0x110c   :  { %v3527_v15 = vadd.f32 %v6142_v27, %v6131_v1  ;;  %v4921_v1 = vmul.f32 %v7216_v63, %v7216_v63  ;;  %v3845_v27 = vld [vmem:[%s7689_s20 + $0x18] sm:$0xff] }
0x110d   :  { %v3521_v34 = vpop.f32.mrf.mxu0 }
0x110e   :  { %v3538_v29 = vadd.f32 %v5476_v28, %v3527_v15  ;;  %v3522_v23 = vadd.f32 %v3521_v34, %v3440_v21  ;;  %v3843_v15 = vld [vmem:[%s7689_s20 + $0x8] sm:$0xff]  ;;  %v3842_v21 = vld [vmem:[%s7689_s20] sm:$0xff] }
0x1110   :  { %6426 = vtanh.f32 %v3538_v29  ;;  %v3537_v30 = vadd.f32 %v5476_v28, %v3522_v23  ;;  %v3844_v28 = vld [vmem:[%s7689_s20 + $0x10] sm:$0xff] }
0x1112   :  { %6428 = vtanh.f32 %v3537_v30 }
0x111d   :  { %v6427_v31 = vpop.eup %6426 }
0x111e   :  { %3550 = vperm.xlu0 %6409, %v6427_v31  }
0x111f   :  { %v6429_v8 = vpop.eup %6428 }
0x1120   :  { %3545 = vperm.xlu1 %6408, %v6429_v8  }
0x1199   :  { %v3551_v32 = vpop.permute.xlu0 %3550 }
0x119a   :  { %v3554_v33 = vmul.f32 %v3551_v32, %v6963_v44 }
0x119b   :  { %v3546_v35 = vpop.permute.xlu1 %3545 }
0x119c   :  { %v3553_v53 = vmul.f32 %v3546_v35, %v6970_v47  ;;  %6143 = vmatprep.subr.mxu1 %v3554_v33 }
0x119d   :  { %6144 = vmatpush3.msra.mxu1 %v3554_v33 }
0x119e   :  { %6145 = vmatprep.subr.mxu1 %v3553_v53 }
0x119f   :  { %6146 = vmatpush3.msra.mxu1 %v3553_v53 }
0x11a0   :  { %6148 = vmatmul.mubr.msk.f32.vlgmr.msra.gmra.mxu1 %vm225_vm0, %v6525_v57 }
0x1260   :  { %v6149_v36 = vpop.f32.mrf.mxu1 }
0x1261   :  { %vm3631_vm5 = vcmp.gt.f32.partialorder %v6149_v36, %v3551_v32  ;;  %vm3633_vm3 = vcmp.eq.f32.partialorder %v6149_v36, %v3551_v32 }
0x1262   :  { %vm3635_vm4 = vmand %vm3633_vm3, %vm1501_vm13  ;;  %v3621_v37 = vpop.f32.mrf.mxu1 }
0x1263   :  { %vm3637_vm6 = vmor %vm3631_vm5, %vm3635_vm4  ;;  %vm3630_vm7 = vcmp.gt.f32.partialorder %v3621_v37, %v3546_v35  ;;  %vm3632_vm12 = vcmp.eq.f32.partialorder %v3621_v37, %v3546_v35  ;;  %v5487_v37 = vld [vmem:[%s7690_s27] ss:$0 sm:$0xff] }
0x1264   :  { %vm3634_vm15 = vmand %vm3632_vm12, %vm1500_vm11  ;;  %v3639_v55 = vsel %vm3637_vm6, 1.0, %v6523_v22  ;;  %vm7698_vm12 = vcmp.eq.s32.totalorder %v6813_v52, %v7188_v16 }
0x1265   :  { %vm3636_vm14 = vmor %vm3630_vm7, %vm3634_vm15  ;;  %v3641_v38 = vmul.f32 %v3639_v55, %v6978_v61  ;;  %vm7697_vm15 = vcmp.eq.s32.totalorder %v6813_v52, %v7147_v62  ;;  %v5500_v62 = vld [vmem:[%s7695_s28] ss:$0 sm:$0xff] }
0x1266   :  { %v3638_v39 = vsel %vm3636_vm14, 1.0, %v6523_v22  ;;  %vm4922_vm14 = vcmask 1041408  }
0x1267   :  { %v3645_v6 = vsel %vm225_vm0, %v3641_v38, 0.0  ;;  %v3640_v56 = vmul.f32 %v3638_v39, %v6955_v42 }
0x1268   :  { %3646 = vadd.xlane.f32.xlu1 %v3645_v6 }
0x1269   :  { %v3642_v40 = vsel %vm225_vm0, %v3640_v56, 0.0 }
0x126a   :  { %3643 = vadd.xlane.f32.xlu0 %v3642_v40 }
0x1279   :  { %3656 = vperm.xlu1 %6408, %v6429_v8  }
0x1280   :  { %3661 = vperm.xlu0 %6409, %v6427_v31  }
0x12f1   :  { %v3647_v50 = vpop.xlane.xlu1 %3646 }
0x12f2   :  { %vm3649_vm13 = vcmp.lt.f32.partialorder %v3647_v50, %v6998_v13 }
0x12f3   :  { %v7348_v58 = vsel %vm3649_vm13, 1.0, %v6523_v22  ;;  %v3644_v61 = vpop.xlane.xlu0 %3643 }
0x12f4   :  { %vm3648_vm11 = vcmp.lt.f32.partialorder %v3644_v61, %v7004_v17  ;;  %v3671_v42 = vmul.f32 %v7348_v58, %v6963_v44  ;;  %v3848_v17 = vld [vmem:[%s7688_s6 + $0x10] sm:$0xff] }
0x12f5   :  { %v7354_v51 = vsel %vm3648_vm11, 1.0, %v6523_v22  ;;  %v3657_v46 = vpop.permute.xlu1 %3656 }
0x12f6   :  { %v3664_v54 = vmul.f32 %v3657_v46, %v7266_v41  ;;  %6150 = vmatprep.subr.mxu0 %v3671_v42  ;;  %v3670_v13 = vmul.f32 %v7354_v51, %v6970_v47  ;;  %v3847_v41 = vld [vmem:[%s7688_s6 + $0x8] sm:$0xff]  ;;  %v3668_v19 = vmul.f32 %v7354_v51, %v7131_v43 }
0x12f7   :  { %6151 = vmatpush3.msra.mxu0 %v3671_v42  ;;  %v4252_v42 = vld [vmem:[%s7692_s16 + $0x10] sm:$0xff]  ;;  %v4251_v46 = vld [vmem:[%s7692_s16 + $0x8] sm:$0xff] }
0x12f8   :  { %v3666_v0 = vmul.f32 %v3664_v54, %v7354_v51  ;;  %6152 = vmatprep.subr.mxu0 %v3670_v13  ;;  %v4250_v54 = vld [vmem:[%s7692_s16] sm:$0xff] }
0x12f9   :  { %6153 = vmatpush3.msra.mxu0 %v3670_v13  ;;  %v4249_v13 = vld [vmem:[%s7693_s23 + $0x18] sm:$0xff] }
0x12fa   :  { %6155 = vmatmul.mubr.msk.f32.vlgmr.msra.gmra.mxu0 %vm225_vm0, %v6525_v57  ;;  %6164 = vmatprep.subr.mxu0 %v3849_v48 }
0x12fb   :  { %6165 = vmatpush3.msra.mxu0 %v3849_v48  ;;  %6172 = vmatprep.mubr.msk.f32.mxu0 %vm662_vm2, %v3666_v0  ;;  %v3662_v44 = vpop.permute.xlu0 %3661 }
0x12fc   :  { %v3665_v2 = vmul.f32 %v3662_v44, %v7264_v4  ;;  %6166 = vmatprep.subr.mxu0 %v3848_v17  ;;  %v3669_v4 = vmul.f32 %v7348_v58, %v7134_v45  ;;  %v4923_v45 = vsel %vm4922_vm14, %v4921_v1, 0.0  ;;  %v4247_v44 = vld [vmem:[%s7693_s23 + $0x8] sm:$0xff] }
0x12fd   :  { %6167 = vmatpush3.msra.mxu0 %v3848_v17 }
0x12fe   :  { %v3667_v12 = vmul.f32 %v3665_v2, %v7348_v58  ;;  %6168 = vmatprep.subr.mxu0 %v3847_v41  ;;  %v4246_v2 = vld [vmem:[%s7693_s23] sm:$0xff] }
0x12ff   :  { %6169 = vmatpush3.msra.mxu0 %v3847_v41 }
0x1300   :  { %6157 = vmatprep.subr.mxu1 %v3667_v12  ;;  %6170 = vmatprep.subr.mxu0 %v3846_v11 }
0x1301   :  { %6158 = vmatpush3.msra.mxu1 %v3667_v12  ;;  %6171 = vmatpush3.msra.mxu0 %v3846_v11 }
0x1302   :  { %6159 = vmatprep.subr.mxu1 %v3666_v0  ;;  %6173 = vmatmul.mubr.msk.f32.vlgmr.msra.gmra.mxu0 %vm662_vm2, %v3667_v12 }
0x1303   :  { %6160 = vmatpush3.msra.mxu1 %v3666_v0  ;;  %6186 = vmatprep.subr.mxu0 %v6523_v22  ;;  %v4248_v0 = vld [vmem:[%s7693_s23 + $0x10] sm:$0xff] }
0x1304   :  { %6190 = vmatprep.mubr.msk.f32.mxu0 %vm6524_vm1, %v6523_v22  ;;  %6175 = vmatprep.subr.mxu1 %v3845_v27 }
0x13ba   :  { %v6156_v14 = vpop.f32.mrf.mxu0 }
0x13bb   :  { %v7375_v18 = vmul.f32 %v6156_v14, %v3669_v4 }
0x13bc   :  { %v3738_v24 = vpop.f32.mrf.mxu0 }
0x13bd   :  { %v7379_v25 = vmul.f32 %v3738_v24, %v3668_v19  ;;  %v3833_v26 = vsel %vm225_vm0, %v7375_v18, 0.0 }
0x13be   :  { %3834 = vadd.xlane.f32.xlu0 %v3833_v26 }
0x13bf   :  { %6161 = vmatprep.mubr.msk.f32.mxu1 %vm225_vm0, %v7379_v25  ;;  %v3830_v43 = vsel %vm225_vm0, %v7379_v25, 0.0 }
0x13c0   :  { %3831 = vadd.xlane.f32.xlu1 %v3830_v43  ;;  %6162 = vmatmul.mubr.msk.f32.vlgmr.msra.gmra.mxu1 %vm225_vm0, %v7375_v18 }
0x13c1   :  { %6176 = vmatpush3.msra.mxu1 %v3845_v27  ;;  %v4604_v27 = vld [vmem:[%s7699_s12 + $0xf8] sm:$0xff] }
0x13c2   :  { %4924 = vadd.xlane.f32.xlu0 %v4923_v45  ;;  %6177 = vmatprep.subr.mxu1 %v3844_v28  ;;  %v6174_v3 = vpop.f32.mrf.mxu0 }
0x13c3   :  { %6178 = vmatpush3.msra.mxu1 %v3844_v28  ;;  %v4601_v28 = vld [vmem:[%s7699_s12 + $0xe0] sm:$0xff] }
0x13c4   :  { %6179 = vmatprep.subr.mxu1 %v3843_v15  ;;  %v3922_v7 = vpop.f32.mrf.mxu0 }
0x13c5   :  { %6180 = vmatpush3.msra.mxu1 %v3843_v15  ;;  %v4599_v15 = vld [vmem:[%s7699_s12 + $0xd0] sm:$0xff] }
0x13c6   :  { %6181 = vmatprep.subr.mxu1 %v3842_v21 }
0x13c7   :  { %6182 = vmatpush3.msra.mxu1 %v3842_v21  ;;  %v4598_v21 = vld [vmem:[%s7699_s12 + $0xc8] sm:$0xff] }
0x13c8   :  { %6193 = vmatprep.subr.mxu1 %v6523_v22 }
0x1447   :  { %v3835_v29 = vpop.xlane.xlu0 %3834 }
0x1448   :  { %v3837_v30 = vmax.f32 %v3835_v29, 1.0  ;;  %v4596_v29 = vld [vmem:[%s7699_s12 + $0xb8] sm:$0xff] }
0x1449   :  { %v3832_v34 = vpop.xlane.xlu1 %3831 }
0x144a   :  { %v3836_v23 = vmax.f32 %v3832_v34, 1.0  ;;  %v4597_v34 = vld [vmem:[%s7699_s12 + $0xc0] sm:$0xff] }
0x144c   :  { %6430 = vrcp.f32 %v3836_v23  ;;  %v4595_v23 = vld [vmem:[%s7699_s12 + $0xb0] sm:$0xff] }
0x144d   :  { %6432 = vrcp.f32 %v3837_v30  ;;  %v4594_v30 = vld [vmem:[%s7699_s12 + $0xa8] sm:$0xff] }
0x1459   :  { %v7397_v8 = vpop.eup %6430 }
0x145a   :  { %v7399_v33 = vpop.eup %6432 }
0x1480   :  { %v6163_v31 = vpop.f32.mrf.mxu1 }
0x1481   :  { %v3841_v53 = vmul.f32 %v7399_v33, %v6163_v31  ;;  %v4593_v31 = vld [vmem:[%s7699_s12 + $0xa0] sm:$0xff] }
0x1482   :  { %v3821_v32 = vpop.f32.mrf.mxu1 }
0x1483   :  { %v3840_v35 = vmul.f32 %v7397_v8, %v3821_v32  ;;  %v4591_v32 = vld [vmem:[%s7699_s12 + $0x90] sm:$0xff] }
0x1485   :  { %6183 = vmatprep.mubr.msk.f32.mxu1 %vm662_vm2, %v3840_v35 }
0x1486   :  { %6184 = vmatmul.mubr.msk.f32.vlgmr.msra.gmra.mxu1 %vm662_vm2, %v3841_v53  ;;  %v4587_v53 = vld [vmem:[%s7699_s12 + $0x70] sm:$0xff] }
0x1487   :  { %6194 = vmatpush3.msk.msra.mxu1 %vm1972_vm8, %v6525_v57  ;;  %6201 = vmatprep.mubr.msk.f32.mxu1 %vm6524_vm1, %v6523_v22  ;;  %vm7691_vm8 = vcmp.eq.s32.totalorder %v6813_v52, %v7110_v5  ;;  %v4253_v5 = vld [vmem:[%s7692_s16 + $0x18] sm:$0xff] }
0x1488   :  { %6195 = vmatprep.subr.mxu1 %v6523_v22 }
0x1489   :  { %6196 = vmatpush3.msk.msra.mxu1 %vm1971_vm9, %v6525_v57  ;;  %vm7694_vm9 = vcmp.eq.s32.totalorder %v6813_v52, %v7141_v49  ;;  %v3282_v49 = vadd.f32 %v7318_v10, %v7324_v20 }
0x148a   :  { %6197 = vmatprep.subr.mxu1 %v6523_v22 }
0x148b   :  { %6198 = vmatpush3.msk.msra.mxu1 %vm1970_vm10, %v6525_v57  ;;  %vm7696_vm10 = vcmp.eq.s32.totalorder %v6813_v52, %v7144_v60 }
0x148c   :  { %6199 = vmatprep.subr.mxu1 %v6523_v22 }
0x148d   :  { %6200 = vmatpush3.msk.msra.mxu1 %vm7691_vm8, %v6525_v57 }
0x148e   :  { %6222 = vmatprep.subr.mxu1 %v4249_v13 }
0x1546   :  { %v6185_v36 = vpop.f32.mrf.mxu1 }
0x1547   :  { %v4009_v55 = vadd.f32 %v6185_v36, %v6174_v3  ;;  %v4586_v36 = vld [vmem:[%s7699_s12 + $0x68] sm:$0xff] }
0x1548   :  { %v4003_v38 = vpop.f32.mrf.mxu1 }
0x1549   :  { %v4020_v39 = vadd.f32 %v5487_v37, %v4009_v55  ;;  %v4004_v6 = vadd.f32 %v4003_v38, %v3922_v7  ;;  %v4584_v55 = vld [vmem:[%s7699_s12 + $0x58] sm:$0xff]  ;;  %v4583_v7 = vld [vmem:[%s7699_s12 + $0x50] sm:$0xff]  ;;  %v4582_v38 = vld [vmem:[%s7699_s12 + $0x48] sm:$0xff] }
0x154b   :  { %v4022_v56 = vmax.f32 %v4020_v39, 0.0  ;;  %v4019_v9 = vadd.f32 %v5487_v37, %v4004_v6  ;;  %v4585_v37 = vld [vmem:[%s7699_s12 + $0x60] sm:$0xff]  ;;  %v4580_v6 = vld [vmem:[%s7699_s12 + $0x38] sm:$0xff] }
0x154c   :  { %v4581_v39 = vld [vmem:[%s7699_s12 + $0x40] sm:$0xff] }
0x154d   :  { %v4024_v40 = vmul.f32 %v4022_v56, %v7348_v58  ;;  %v4021_v50 = vmax.f32 %v4019_v9, 0.0  ;;  %v4579_v56 = vld [vmem:[%s7699_s12 + $0x30] sm:$0xff]  ;;  %v4578_v9 = vld [vmem:[%s7699_s12 + $0x28] sm:$0xff] }
0x154f   :  { %v4023_v61 = vmul.f32 %v4021_v50, %v7354_v51  ;;  %6187 = vmatpush3.msra.mxu0 %v4024_v40  ;;  %v4576_v50 = vld [vmem:[%s7699_s12 + $0x18] sm:$0xff] }
0x1550   :  { %6188 = vmatprep.subr.mxu0 %v6523_v22 }
0x1551   :  { %6189 = vmatpush3.msra.mxu0 %v4023_v61 }
0x1552   :  { %6191 = vmatmul.mubr.msk.f32.vlgmr.msra.gmra.mxu0 %vm225_vm0, %v7273_v59  ;;  %6204 = vmatprep.subr.mxu0 %v4024_v40 }
0x1553   :  { %6205 = vmatpush3.msra.mxu0 %v4024_v40  ;;  %6208 = vmatprep.mubr.msk.f32.mxu0 %vm225_vm0, %v7379_v25 }
0x1554   :  { %6206 = vmatprep.subr.mxu0 %v4023_v61 }
0x1555   :  { %6207 = vmatpush3.msra.mxu0 %v4023_v61 }
0x1556   :  { %6209 = vmatmul.mubr.msk.f32.vlgmr.msra.gmra.mxu0 %vm225_vm0, %v7375_v18  ;;  %6211 = vmatprep.subr.mxu0 %v4253_v5 }
0x1557   :  { %6212 = vmatpush3.msra.mxu0 %v4253_v5  ;;  %6219 = vmatprep.mubr.msk.f32.mxu0 %vm662_vm2, %v4023_v61  ;;  %v4575_v61 = vld [vmem:[%s7699_s12 + $0x10] sm:$0xff]  ;;  %v4574_v5 = vld [vmem:[%s7699_s12 + $0x8] sm:$0xff] }
0x1558   :  { %6213 = vmatprep.subr.mxu0 %v4252_v42 }
0x1559   :  { %6214 = vmatpush3.msra.mxu0 %v4252_v42  ;;  %v4573_v42 = vld [vmem:[%s7699_s12] sm:$0xff] }
0x155a   :  { %6215 = vmatprep.subr.mxu0 %v4251_v46 }
0x155b   :  { %6216 = vmatpush3.msra.mxu0 %v4251_v46  ;;  %v4590_v46 = vld [vmem:[%s7699_s12 + $0x88] sm:$0xff] }
0x155c   :  { %6217 = vmatprep.subr.mxu0 %v4250_v54 }
0x155d   :  { %6218 = vmatpush3.msra.mxu0 %v4250_v54  ;;  %v4589_v54 = vld [vmem:[%s7699_s12 + $0x80] sm:$0xff] }
0x155e   :  { %6220 = vmatmul.mubr.msk.f32.vlgmr.msra.gmra.mxu0 %vm662_vm2, %v4024_v40  ;;  %6233 = vmatprep.subr.mxu0 %v6523_v22  ;;  %v4577_v40 = vld [vmem:[%s7699_s12 + $0x20] sm:$0xff] }
0x155f   :  { %6237 = vmatprep.mubr.msk.f32.mxu0 %vm6524_vm1, %v6523_v22 }
0x1612   :  { %v4091_v48 = vpop.f32.mrf.mxu0 }
0x1613   :  { %6202 = vmatmul.mubr.msk.f32.vlgmr.msra.gmra.mxu1 %vm662_vm2, %v4091_v48 }
0x1614   :  { %v6192_v17 = vpop.f32.mrf.mxu0  ;;  %6223 = vmatpush3.msra.mxu1 %v4249_v13 }
0x1615   :  { %6224 = vmatprep.subr.mxu1 %v4248_v0 }
0x1616   :  { %v6210_v41 = vpop.f32.mrf.mxu0  ;;  %6225 = vmatpush3.msra.mxu1 %v4248_v0 }
0x1617   :  { %6226 = vmatprep.subr.mxu1 %v4247_v44  ;;  %v4245_v4 = vmul.f32 %v7399_v33, %v6210_v41  ;;  %v4588_v33 = vld [vmem:[%s7699_s12 + $0x78] sm:$0xff] }
0x1618   :  { %v4235_v11 = vpop.f32.mrf.mxu0  ;;  %6227 = vmatpush3.msra.mxu1 %v4247_v44  ;;  %v4757_v41 = vld [vmem:[%s7700_s15 + $0x18] sm:$0xff] }
0x1619   :  { %v4244_v12 = vmul.f32 %v7397_v8, %v4235_v11  ;;  %6228 = vmatprep.subr.mxu1 %v4246_v2  ;;  %v4592_v8 = vld [vmem:[%s7699_s12 + $0x98] sm:$0xff] }
0x161a   :  { %6229 = vmatpush3.msra.mxu1 %v4246_v2 }
0x161b   :  { %6230 = vmatprep.mubr.msk.f32.mxu1 %vm662_vm2, %v4244_v12  ;;  %6240 = vmatprep.subr.mxu1 %v6523_v22  ;;  %v4756_v12 = vld [vmem:[%s7700_s15 + $0x10] sm:$0xff] }
0x161c   :  { %6231 = vmatmul.mubr.msk.f32.vlgmr.msra.gmra.mxu1 %vm662_vm2, %v4245_v4  ;;  %v4755_v4 = vld [vmem:[%s7700_s15 + $0x8] sm:$0xff] }
0x161d   :  { %6241 = vmatpush3.msk.msra.mxu1 %vm7694_vm9, %v6525_v57  ;;  %6248 = vmatprep.mubr.msk.f32.mxu1 %vm6524_vm1, %v6523_v22 }
0x161e   :  { %6242 = vmatprep.subr.mxu1 %v6523_v22  ;;  %v6221_v19 = vpop.f32.mrf.mxu0 }
0x161f   :  { %6243 = vmatpush3.msk.msra.mxu1 %vm7696_vm10, %v6525_v57 }
0x1620   :  { %6244 = vmatprep.subr.mxu1 %v6523_v22  ;;  %v4326_v26 = vpop.f32.mrf.mxu0 }
0x1621   :  { %6245 = vmatpush3.msk.msra.mxu1 %vm7697_vm15, %v6525_v57 }
0x1622   :  { %6246 = vmatprep.subr.mxu1 %v6523_v22 }
0x1623   :  { %6247 = vmatpush3.msk.msra.mxu1 %vm7698_vm12, %v6525_v57 }
0x1624   :  { %6286 = vmatprep.subr.mxu1 %v6523_v22 }
0x16d3   :  { %v4164_v60 = vpop.f32.mrf.mxu1 }
0x16d4   :  { %v7479_v14 = vadd.f32 %v4164_v60, %v3282_v49  ;;  %v4754_v49 = vld [vmem:[%s7700_s15] sm:$0xff] }
0x16d5   :  { %v6203_v18 = vpop.f32.mrf.mxu1 }
0x16dc   :  { %v6232_v24 = vpop.f32.mrf.mxu1 }
0x16dd   :  { %v4413_v25 = vadd.f32 %v6232_v24, %v6221_v19 }
0x16de   :  { %v4407_v1 = vpop.f32.mrf.mxu1 }
0x16df   :  { %v4424_v43 = vadd.f32 %v5500_v62, %v4413_v25  ;;  %v4408_v52 = vadd.f32 %v4407_v1, %v4326_v26 }
0x16e1   :  { %v4426_v57 = vmax.f32 %v4424_v43, 0.0  ;;  %v4423_v16 = vadd.f32 %v5500_v62, %v4408_v52  ;;  %v5507_v62 = vld [vmem:[%s7701_s18] ss:$0 sm:$0xff] }
0x16e3   :  { %v4428_v45 = vmul.f32 %v4426_v57, %v7348_v58  ;;  %v4425_v10 = vmax.f32 %v4423_v16, 0.0  ;;  %v4603_v58 = vld [vmem:[%s7699_s12 + $0xf0] sm:$0xff] }
0x16e5   :  { %v4427_v20 = vmul.f32 %v4425_v10, %v7354_v51  ;;  %6234 = vmatpush3.msra.mxu0 %v4428_v45  ;;  %v4602_v51 = vld [vmem:[%s7699_s12 + $0xe8] sm:$0xff] }
0x16e6   :  { %6235 = vmatprep.subr.mxu0 %v6523_v22  ;;  %v4840_v10 = vld [vmem:[%s7702_s30 + $0x8] sm:$0xff] }
0x16e7   :  { %6236 = vmatpush3.msra.mxu0 %v4427_v20  ;;  %v4839_v20 = vld [vmem:[%s7702_s30] sm:$0xff] }
0x16e8   :  { %6238 = vmatmul.mubr.msk.f32.vlgmr.msra.gmra.mxu0 %vm225_vm0, %v7273_v59  ;;  %6251 = vmatprep.subr.mxu0 %v6523_v22  ;;  %v4600_v59 = vld [vmem:[%s7699_s12 + $0xd8] sm:$0xff] }
0x16e9   :  { %6283 = vmatprep.mubr.msk.f32.mxu0 %vm6524_vm1, %v6523_v22  ;;  %6252 = vmatpush3.msra.mxu0 %v4604_v27  ;;  %v5508_v27 = vld [vmem:[%s7703_s22] ss:$0 sm:$0xff] }
0x16ea   :  { %6253 = vmatprep.subr.mxu0 %v6523_v22 }
0x16eb   :  { %6254 = vmatpush3.msra.mxu0 %v4603_v58 }
0x16ec   :  { %6255 = vmatprep.subr.mxu0 %v6523_v22 }
0x16ed   :  { %6256 = vmatpush3.msra.mxu0 %v4602_v51 }
0x16ee   :  { %6257 = vmatprep.subr.mxu0 %v6523_v22 }
0x16ef   :  { %6258 = vmatpush3.msra.mxu0 %v4601_v28 }
0x16f0   :  { %6259 = vmatprep.subr.mxu0 %v6523_v22 }
0x16f1   :  { %6260 = vmatpush3.msra.mxu0 %v4600_v59 }
0x16f2   :  { %6261 = vmatprep.subr.mxu0 %v6523_v22 }
0x16f3   :  { %6262 = vmatpush3.msra.mxu0 %v4599_v15 }
0x16f4   :  { %6263 = vmatprep.subr.mxu0 %v6523_v22 }
0x16f5   :  { %6264 = vmatpush3.msra.mxu0 %v4598_v21 }
0x16f6   :  { %6265 = vmatprep.subr.mxu0 %v6523_v22 }
0x16f7   :  { %6266 = vmatpush3.msra.mxu0 %v4597_v34 }
0x16f8   :  { %6267 = vmatprep.subr.mxu0 %v6523_v22 }
0x16f9   :  { %6268 = vmatpush3.msra.mxu0 %v4596_v29  ;;  %v5220_v29 = vsub.f32 1.0, %v6970_v47 }
0x16fa   :  { %6269 = vmatprep.subr.mxu0 %v6523_v22 }
0x16fb   :  { %6270 = vmatpush3.msra.mxu0 %v4595_v23 }
0x16fc   :  { %6271 = vmatprep.subr.mxu0 %v6523_v22 }
0x16fd   :  { %6272 = vmatpush3.msra.mxu0 %v4594_v30 }
0x16fe   :  { %6273 = vmatprep.subr.mxu0 %v6523_v22 }
0x16ff   :  { %6274 = vmatpush3.msra.mxu0 %v4593_v31 }
0x1700   :  { %6275 = vmatprep.subr.mxu0 %v6523_v22 }
0x1701   :  { %6276 = vmatpush3.msra.mxu0 %v4592_v8 }
0x1702   :  { %6277 = vmatprep.subr.mxu0 %v6523_v22 }
0x1703   :  { %6278 = vmatpush3.msra.mxu0 %v4591_v32 }
0x1704   :  { %6279 = vmatprep.subr.mxu0 %v6523_v22 }
0x1705   :  { %6280 = vmatpush3.msra.mxu0 %v4590_v46 }
0x1706   :  { %6281 = vmatprep.subr.mxu0 %v6523_v22 }
0x1707   :  { %6282 = vmatpush3.msra.mxu0 %v4589_v54 }
0x1708   :  { %6321 = vmatprep.subr.mxu0 %v6523_v22 }
0x17a8   :  { %v4495_v35 = vpop.f32.mrf.mxu0 }
0x17a9   :  { %6249 = vmatmul.mubr.msk.f32.vlgmr.msra.gmra.mxu1 %vm662_vm2, %v4495_v35 }
0x17aa   :  { %6287 = vmatpush3.msra.mxu1 %v4588_v33  ;;  %v6239_v3 = vpop.f32.mrf.mxu0  ;;  %6318 = vmatprep.mubr.msk.f32.mxu1 %vm6524_vm1, %v6523_v22 }
0x17ab   :  { %6288 = vmatprep.subr.mxu1 %v6523_v22 }
0x17ac   :  { %6289 = vmatpush3.msra.mxu1 %v4587_v53 }
0x17ad   :  { %6290 = vmatprep.subr.mxu1 %v6523_v22 }
0x17ae   :  { %6291 = vmatpush3.msra.mxu1 %v4586_v36 }
0x17af   :  { %6292 = vmatprep.subr.mxu1 %v6523_v22 }
0x17b0   :  { %6293 = vmatpush3.msra.mxu1 %v4585_v37 }
0x17b1   :  { %6294 = vmatprep.subr.mxu1 %v6523_v22 }
0x17b2   :  { %6295 = vmatpush3.msra.mxu1 %v4584_v55 }
0x17b3   :  { %6296 = vmatprep.subr.mxu1 %v6523_v22 }
0x17b4   :  { %6297 = vmatpush3.msra.mxu1 %v4583_v7 }
0x17b5   :  { %6298 = vmatprep.subr.mxu1 %v6523_v22 }
0x17b6   :  { %6299 = vmatpush3.msra.mxu1 %v4582_v38 }
0x17b7   :  { %6300 = vmatprep.subr.mxu1 %v6523_v22 }
0x17b8   :  { %6301 = vmatpush3.msra.mxu1 %v4581_v39 }
0x17b9   :  { %6302 = vmatprep.subr.mxu1 %v6523_v22 }
0x17ba   :  { %6303 = vmatpush3.msra.mxu1 %v4580_v6  ;;  %v5510_v6 = vld [vmem:[%s7704_s26] ss:$0 sm:$0xff] }
0x17bb   :  { %6304 = vmatprep.subr.mxu1 %v6523_v22 }
0x17bc   :  { %6305 = vmatpush3.msra.mxu1 %v4579_v56 }
0x17bd   :  { %6306 = vmatprep.subr.mxu1 %v6523_v22 }
0x17be   :  { %6307 = vmatpush3.msra.mxu1 %v4578_v9 }
0x17bf   :  { %6308 = vmatprep.subr.mxu1 %v6523_v22 }
0x17c0   :  { %6309 = vmatpush3.msra.mxu1 %v4577_v40 }
0x17c1   :  { %6310 = vmatprep.subr.mxu1 %v6523_v22 }
0x17c2   :  { %6311 = vmatpush3.msra.mxu1 %v4576_v50 }
0x17c3   :  { %6312 = vmatprep.subr.mxu1 %v6523_v22 }
0x17c4   :  { %6313 = vmatpush3.msra.mxu1 %v4575_v61 }
0x17c5   :  { %6314 = vmatprep.subr.mxu1 %v6523_v22 }
0x17c6   :  { %6315 = vmatpush3.msra.mxu1 %v4574_v5 }
0x17c7   :  { %6316 = vmatprep.subr.mxu1 %v6523_v22 }
0x17c8   :  { %6317 = vmatpush3.msra.mxu1 %v4573_v42 }
0x17c9   :  { %6319 = vmatmul.mubr.f32.vlgmr.msra.gmra.mxu1 %v7216_v63  ;;  %6332 = vmatprep.subr.mxu1 %v6523_v22 }
0x17ca   :  { %6336 = vmatprep.mubr.msk.f32.mxu1 %vm6524_vm1, %v6523_v22  ;;  %6333 = vmatpush3.msra.mxu1 %v4840_v10 }
0x17cb   :  { %6334 = vmatprep.subr.mxu1 %v6523_v22 }
0x17cc   :  { %6335 = vmatpush3.msra.mxu1 %v4839_v20 }
0x17cd   :  { %6344 = vmatprep.subr.mxu1 %v6523_v22 }
0x1869   :  { %v4568_v13 = vpop.f32.mrf.mxu1 }
0x186a   :  { %v4572_v48 = vadd.f32 %v4568_v13, %v7479_v14  ;;  %v4925_v14 = vpop.xlane.xlu0 %4924 }
0x186b   :  { %v6250_v0 = vpop.f32.mrf.mxu1  ;;  %v4926_v19 = vmax.f32 %v4925_v14, 1e-24 }
0x186c   :  { %6284 = vmatmul.mubr.f32.vlgmr.msra.gmra.mxu0 %v4572_v48  ;;  %v4929_v17 = vmul.f32 %v4572_v48, %v4572_v48 }
0x186d   :  { %6329 = vmatprep.mubr.msk.f32.mxu0 %vm6524_vm1, %v6523_v22  ;;  %6322 = vmatpush3.msra.mxu0 %v4757_v41 }
0x186e   :  { %v4930_v44 = vsel %vm4922_vm14, %v4929_v17, 0.0  ;;  %6323 = vmatprep.subr.mxu0 %v6523_v22 }
0x186f   :  { %4931 = vadd.xlane.f32.xlu1 %v4930_v44  ;;  %6324 = vmatpush3.msra.mxu0 %v4756_v12 }
0x1870   :  { %6325 = vmatprep.subr.mxu0 %v6523_v22 }
0x1871   :  { %6326 = vmatpush3.msra.mxu0 %v4755_v4 }
0x1872   :  { %6327 = vmatprep.subr.mxu0 %v6523_v22 }
0x1873   :  { %6328 = vmatpush3.msra.mxu0 %v4754_v49 }
0x1874   :  { %6339 = vmatprep.subr.mxu0 %v6523_v22 }
0x1889   :  { %v4741_v2 = vpop.f32.mrf.mxu1 }
0x188b   :  { %v6320_v11 = vpop.f32.mrf.mxu1 }
0x18f8   :  { %v4932_v60 = vpop.xlane.xlu1 %4931 }
0x18f9   :  { %v4933_v18 = vmax.f32 %v4932_v60, 1e-24 }
0x18fb   :  { %6434 = vrsqrt.f32 %v4933_v18 }
0x18fc   :  { %6436 = vrsqrt.f32 %v4926_v19 }
0x1908   :  { %v6435_v1 = vpop.eup %6434 }
0x1909   :  { %v6437_v57 = vpop.eup %6436  ;;  %v4935_v16 = vmul.f32 %v6435_v1, %v4572_v48 }
0x190a   :  { %v4928_v45 = vmul.f32 %v6437_v57, %v7216_v63 }
0x192c   :  { %v4671_v24 = vpop.f32.mrf.mxu0 }
0x192d   :  { %v4742_v25 = vadd.f32 %v4741_v2, %v4671_v24 }
0x192e   :  { %v6285_v26 = vpop.f32.mrf.mxu0 }
0x192f   :  { %v4752_v43 = vadd.f32 %v5507_v62, %v4742_v25 }
0x1931   :  { %v4753_v52 = vmax.f32 %v4752_v43, 0.0 }
0x1933   :  { %6330 = vmatmul.mubr.msk.f32.vlgmr.msra.gmra.mxu0 %vm662_vm2, %v4753_v52  ;;  %vm5223_vm2 = vcmask 9216  }
0x1934   :  { %6340 = vmatpush3.xpose.msra.mxu0 %v4935_v16  ;;  %6341 = vmatprep.mubr.msk.f32.mxu0 %vm6524_vm1, %v6523_v22 }
0x1935   :  { %6349 = vmatprep.subr.mxu0 %v6523_v22 }
0x1937   :  { %6342 = vmatmul.mubr.f32.vlgmr.msra.gmra.mxu0 %v4928_v45 }
0x1938   :  { %6350 = vmatpush3.xpose.msra.mxu0 %v4928_v45  ;;  %6351 = vmatprep.mubr.msk.f32.mxu0 %vm6524_vm1, %v6523_v22 }
0x193b   :  { %6352 = vmatmul.mubr.f32.vlgmr.msra.gmra.mxu0 %v4928_v45 }
0x19f3   :  { %v4834_v58 = vpop.f32.mrf.mxu0 }
0x19f4   :  { %v4835_v51 = vadd.f32 %v5508_v27, %v4834_v58 }
0x19f5   :  { %v6331_v28 = vpop.f32.mrf.mxu0 }
0x19f6   :  { %v4838_v59 = vmax.f32 %v4835_v51, 0.0 }
0x19f7   :  { %v5002_v63 = vpop.f32.mrf.mxu0 }
0x19f8   :  { %v5006_v15 = vmul.f32 2.0, %v5002_v63  ;;  %6337 = vmatmul.mubr.msk.f32.vlgmr.msra.gmra.mxu1 %vm225_vm0, %v4838_v59  ;;  %vm5303_vm0 = vcmask 17408  }
0x19f9   :  { %6345 = vmatpush3.xpose.msra.mxu1 %v4928_v45  ;;  %v6343_v21 = vpop.f32.mrf.mxu0  ;;  %6346 = vmatprep.mubr.msk.f32.mxu1 %vm6524_vm1, %v6523_v22 }
0x19fa   :  { %6354 = vmatprep.subr.mxu1 %v6523_v22  ;;  %v5224_v34 = vsel %vm5223_vm2, %v5006_v15, -inf }
0x19fb   :  { %5225 = vmax.xlane.f32.xlu0 %v5224_v34  ;;  %v5144_v23 = vpop.f32.mrf.mxu0 }
0x19fc   :  { %v5148_v30 = vmul.f32 2.0, %v5144_v23  ;;  %6347 = vmatmul.mubr.f32.vlgmr.msra.gmra.mxu1 %v4935_v16 }
0x19fd   :  { %6355 = vmatpush3.xpose.msra.mxu1 %v4935_v16  ;;  %v6353_v31 = vpop.f32.mrf.mxu0  ;;  %6356 = vmatprep.mubr.msk.f32.mxu1 %vm6524_vm1, %v6523_v22 }
0x19fe   :  { %v5221_v8 = vmul.f32 %v5220_v29, %v5148_v30 }
0x1a00   :  { %6357 = vmatmul.mubr.f32.vlgmr.msra.gmra.mxu1 %v4935_v16  ;;  %v5222_v32 = vmul.f32 0.8, %v5221_v8 }
0x1a02   :  { %v5227_v33 = vsel %vm5223_vm2, %v5222_v32, -inf }
0x1a03   :  { %5228 = vmax.xlane.f32.xlu1 %v5227_v33 }
0x1a84   :  { %v5226_v53 = vpop.xlane.xlu0 %5225 }
0x1a8c   :  { %v5229_v35 = vpop.xlane.xlu1 %5228 }
0x1a8d   :  { %v5230_v3 = vmax.f32 %v5226_v53, %v5229_v35 }
0x1a8f   :  { %v5237_v36 = vsub.f32 %v5222_v32, %v5230_v3  ;;  %v5231_v37 = vsub.f32 %v5006_v15, %v5230_v3 }
0x1a91   :  { %v5238_v55 = vmul.f32 1.442695, %v5237_v36  ;;  %v5232_v7 = vmul.f32 1.442695, %v5231_v37 }
0x1a93   :  { %6438 = vpow2.f32 %v5238_v55 }
0x1a94   :  { %6440 = vpow2.f32 %v5232_v7 }
0x1aa0   :  { %v6439_v13 = vpop.eup %6438 }
0x1aa1   :  { %v5240_v17 = vsel %vm5223_vm2, %v6439_v13, 0.0  ;;  %v6441_v44 = vpop.eup %6440 }
0x1aa2   :  { %v5234_v41 = vsel %vm5223_vm2, %v6441_v44, 0.0  ;;  %v5244_v1 = vmul.f32 %v6441_v44, %v6970_v47 }
0x1aa4   :  { %v5245_v57 = vsel %vm5223_vm2, %v5244_v1, 0.0 }
0x1ab8   :  { %v4917_v38 = vpop.f32.mrf.mxu1 }
0x1ab9   :  { %v7595_v40 = vadd.f32 %v5510_v6, %v4917_v38 }
0x1aba   :  { %v6338_v39 = vpop.f32.mrf.mxu1 }
0x1abb   :  { %v5304_v54 = vsel %vm5303_vm0, %v7595_v40, -inf }
0x1abc   :  { %v5073_v22 = vpop.f32.mrf.mxu1 }
0x1abd   :  { %v5077_v56 = vmul.f32 2.0, %v5073_v22 }
0x1abe   :  { %v6348_v9 = vpop.f32.mrf.mxu1 }
0x1abf   :  { %v5264_v50 = vsel %vm5223_vm2, %v5077_v56, -inf }
0x1ac0   :  { %v5215_v61 = vpop.f32.mrf.mxu1  ;;  %5265 = vmax.xlane.f32.xlu0 %v5264_v50 }
0x1ac1   :  { %v5219_v5 = vmul.f32 2.0, %v5215_v61 }
0x1ac2   :  { %v6358_v42 = vpop.f32.mrf.mxu1 }
0x1ac3   :  { %v5262_v46 = vmul.f32 %v5220_v29, %v5219_v5 }
0x1ac4   :  { %5305 = vmax.xlane.f32.xlu0 %v5304_v54 }
0x1ac5   :  { %v5263_v48 = vmul.f32 0.8, %v5262_v46 }
0x1ac7   :  { %v5267_v0 = vsel %vm5223_vm2, %v5263_v48, -inf }
0x1ac8   :  { %5268 = vmax.xlane.f32.xlu1 %v5267_v0  ;;  %5241 = vadd.xlane.f32.xlu0 %v5240_v17 }
0x1acc   :  { %5235 = vadd.xlane.f32.xlu1 %v5234_v41 }
0x1b49   :  { %v5266_v2 = vpop.xlane.xlu0 %5265 }
0x1b4d   :  { %v7603_v4 = vpop.xlane.xlu0 %5305 }
0x1b4e   :  { %v5307_v14 = vsub.f32 %v7595_v40, %v7603_v4 }
0x1b50   :  { %v5308_v24 = vmul.f32 1.442695, %v5307_v14 }
0x1b51   :  { %v5269_v11 = vpop.xlane.xlu1 %5268  ;;  %v5242_v27 = vpop.xlane.xlu0 %5241 }
0x1b52   :  { %v5270_v12 = vmax.f32 %v5266_v2, %v5269_v11 }
0x1b54   :  { %v5271_v49 = vsub.f32 %v5077_v56, %v5270_v12  ;;  %v5277_v60 = vsub.f32 %v5263_v48, %v5270_v12 }
0x1b55   :  { %v5236_v20 = vpop.xlane.xlu1 %5235 }
0x1b56   :  { %v5272_v18 = vmul.f32 1.442695, %v5271_v49  ;;  %v5278_v19 = vmul.f32 1.442695, %v5277_v60  ;;  %v5243_v58 = vadd.f32 %v5242_v27, %v5236_v20 }
0x1b58   :  { %6442 = vpow2.f32 %v5272_v18 }
0x1b59   :  { %6444 = vpow2.f32 %v5278_v19 }
0x1b5a   :  { %6446 = vpow2.f32 %v5308_v24 }
0x1b5b   :  { %6448 = vlog2.f32 %v5243_v58 }
0x1b65   :  { %v6443_v62 = vpop.eup %6442 }
0x1b66   :  { %v6445_v25 = vpop.eup %6444  ;;  %v5274_v26 = vsel %vm5223_vm2, %v6443_v62, 0.0  ;;  %v5284_v52 = vmul.f32 %v6443_v62, %v6970_v47 }
0x1b67   :  { %v5280_v43 = vsel %vm5223_vm2, %v6445_v25, 0.0  ;;  %5275 = vadd.xlane.f32.xlu1 %v5274_v26  ;;  %v6447_v16 = vpop.eup %6446 }
0x1b68   :  { %5281 = vadd.xlane.f32.xlu0 %v5280_v43  ;;  %v5285_v45 = vsel %vm5223_vm2, %v5284_v52, 0.0  ;;  %v5310_v10 = vsel %vm5303_vm0, %v6447_v16, 0.0  ;;  %v6449_v21 = vpop.eup %6448 }
0x1b69   :  { %v5249_v30 = vmul.f32 0.6931472, %v6449_v21 }
0x1b6b   :  { %5246 = vadd.xlane.f32.xlu1 %v5245_v57 }
0x1b6c   :  { %5286 = vadd.xlane.f32.xlu0 %v5285_v45 }
0x1b6f   :  { %5311 = vadd.xlane.f32.xlu1 %v5310_v10 }
0x1bf0   :  { %v5276_v51 = vpop.xlane.xlu1 %5275 }
0x1bf1   :  { %v5282_v28 = vpop.xlane.xlu0 %5281 }
0x1bf2   :  { %v5283_v59 = vadd.f32 %v5282_v28, %v5276_v51 }
0x1bf4   :  { %6450 = vlog2.f32 %v5283_v59  ;;  %v5247_v47 = vpop.xlane.xlu1 %5246 }
0x1bf5   :  { %v5287_v63 = vpop.xlane.xlu0 %5286  ;;  %6452 = vlog2.f32 %v5247_v47 }
0x1bf6   :  { %6454 = vlog2.f32 %v5287_v63 }
0x1bf8   :  { %v5312_v15 = vpop.xlane.xlu1 %5311 }
0x1bf9   :  { %6456 = vlog2.f32 %v5312_v15 }
0x1c01   :  { %v6451_v34 = vpop.eup %6450 }
0x1c02   :  { %v6453_v29 = vpop.eup %6452  ;;  %v5289_v8 = vmul.f32 0.6931472, %v6451_v34 }
0x1c03   :  { %v6455_v23 = vpop.eup %6454  ;;  %v5251_v31 = vmul.f32 0.6931472, %v6453_v29 }
0x1c04   :  { %v5291_v32 = vmul.f32 0.6931472, %v6455_v23 }
0x1c05   :  { %v5252_v33 = vsub.f32 %v5249_v30, %v5251_v31 }
0x1c06   :  { %v5292_v35 = vsub.f32 %v5289_v8, %v5291_v32  ;;  %v6457_v6 = vpop.eup %6456 }
0x1c07   :  { %v5253_v53 = vsel %vm4922_vm14, %v5252_v33, 0.0  ;;  %v5314_v50 = vmul.f32 0.6931472, %v6457_v6 }
0x1c08   :  { %v5293_v3 = vsel %vm4922_vm14, %v5292_v35, 0.0  ;;  %v5254_v36 = vrot.slane %v5253_v53, 4 }
0x1c09   :  { %v5294_v37 = vrot.slane %v5293_v3, 4  ;;  %v5315_v54 = vadd.f32 %v5314_v50, %v7603_v4 }
0x1c0a   :  { %v5255_v55 = vadd.f32 %v5254_v36, %v5253_v53 }
0x1c0b   :  { %v5295_v7 = vadd.f32 %v5294_v37, %v5293_v3  ;;  %v5316_v17 = vsub.f32 %v7595_v40, %v5315_v54 }
0x1c0c   :  { %v5256_v38 = vrot.slane %v5255_v55, 2 }
0x1c0d   :  { %v5296_v39 = vrot.slane %v5295_v7, 2 }
0x1c0e   :  { %v5257_v22 = vadd.f32 %v5256_v38, %v5255_v55 }
0x1c0f   :  { %v5297_v56 = vadd.f32 %v5296_v39, %v5295_v7 }
0x1c10   :  { %v5258_v9 = vrot.slane %v5257_v22, 1 }
0x1c11   :  { %v5298_v61 = vrot.slane %v5297_v56, 1 }
0x1c12   :  { %v5259_v5 = vadd.f32 %v5258_v9, %v5257_v22 }
0x1c13   :  { %v5299_v42 = vadd.f32 %v5298_v61, %v5297_v56 }
0x1c14   :  { %v5261_v46 = vmul.f32 0.5, %v5259_v5 }
0x1c15   :  { %v5300_v13 = vmul.f32 0.5, %v5299_v42 }
0x1c17   :  { %v5301_v48 = vadd.f32 %v5300_v13, %v5261_v46 }
0x1c19   :  { %v5302_v0 = vmul.f32 0.5, %v5301_v48 }
0x1c1b   :  { %v5317_v44 = vadd.f32 %v5316_v17, %v5302_v0 }
0x1c1d   :  { %5318 = vst.msk [vmem:[#allocation6] sm:$0x3] %vm5303_vm0, %v5317_v44 }
0x1c1e   :  { %6470 = shalt.err (!%p6467_p4)
}
0x1c1f   :  { %5328 = dma.vmem_to_hbm [thread:$0]  %s5326_s1, 32, %s6739_s17, [#allocation7]  }
0x1c20   :  { %6479 = dma.done.wait [#allocation7], 32  }
0x1c21   :  { %6480 = vsyncadd [#allocation7], 4294967264 }
0x1c22   :  { %5332 = vsyncpa [#allocation7], 1 }

</bundles_post_ra>
